<compile_context>
chip_gen: v7x
topology: tpu7x:2x2x1
jax: 0.10.0
libtpu: 0.0.40
codegen_flags: <defaults>
</compile_context>

<pallas_src>
import functools
import math

import jax
import jax.numpy as jnp
import numpy as np
from jax.experimental import pallas as pl
from jax.experimental.pallas import tpu as pltpu


# ----------------------------- Pallas kernel -------------------------------

def _gpt2_block_kernel(x_ref,
                       ln1w_ref, ln1b_ref,
                       wqkv_ref, bqkv_ref,
                       wproj_ref, bproj_ref,
                       ln2w_ref, ln2b_ref,
                       wfc_ref, bfc_ref,
                       wfc2_ref, bfc2_ref,
                       o_ref,
                       q_scr, k_scr, v_scr,
                       *, n_head: int, tq: int):
    t = pl.program_id(1)                 # query-tile index within this batch element
    C = x_ref.shape[2]
    hd = C // n_head
    eps = 1e-5
    scale = 1.0 / math.sqrt(hd)

    def layernorm(h, w, b):              # rowwise LN, f32 statistics
        mu = jnp.mean(h, axis=-1, keepdims=True)
        cent = h - mu
        var = jnp.mean(cent * cent, axis=-1, keepdims=True)
        return cent * jax.lax.rsqrt(var + eps) * w + b

    row0 = pl.multiple_of(t * tq, tq)    # element offset of this tile in the sequence
    x_tile = x_ref[0]                    # (tq, C) f32 residual input

    # ---- LN1 + QKV projection for THIS tile only (incremental K/V) ----
    h = layernorm(x_tile, ln1w_ref[...], ln1b_ref[...]).astype(jnp.bfloat16)
    qkv = jnp.dot(h, wqkv_ref[...],
                  preferred_element_type=jnp.float32) + bqkv_ref[...]   # (tq, 3C) f32

    q_b = (qkv[:, 0 * C:1 * C] * scale).astype(jnp.bfloat16)   # scale folded into q
    k_b = qkv[:, 1 * C:2 * C].astype(jnp.bfloat16)
    v_b = qkv[:, 2 * C:3 * C].astype(jnp.bfloat16)

    # head-major scratch: K/V appended at rows [row0, row0+tq), Q local to tile
    for hi in range(n_head):
        q_scr[hi] = q_b[:, hi * hd:(hi + 1) * hd]
        k_scr[hi, pl.ds(row0, tq), :] = k_b[:, hi * hd:(hi + 1) * hd]
        v_scr[hi, pl.ds(row0, tq), :] = v_b[:, hi * hd:(hi + 1) * hd]
    qh = q_scr[...]                                            # (H, tq, hd) bf16

    # ---- causal attention: online softmax over KV chunks 0..t ----
    def chunk(j, carry, mask):
        m, l, acc = carry
        off = pl.multiple_of(j * tq, tq)
        kc = k_scr[:, pl.ds(off, tq), :]                       # (H, tq, hd) bf16
        vc = v_scr[:, pl.ds(off, tq), :]
        s = jnp.einsum("hqd,hkd->hqk", qh, kc,
                       preferred_element_type=jnp.float32)     # (H, tq, tq) f32
        if mask is not None:
            s = jnp.where(mask, s, -1e30)
        m_new = jnp.maximum(m, jnp.max(s, axis=-1, keepdims=True))
        alpha = jnp.exp(m - m_new)
        p = jnp.exp(s - m_new)
        l_new = alpha * l + jnp.sum(p, axis=-1, keepdims=True)
        acc_new = alpha * acc + jnp.einsum("hqk,hkd->hqd", p.astype(jnp.bfloat16),
                                           vc, preferred_element_type=jnp.float32)
        return m_new, l_new, acc_new

    m0 = jnp.full((n_head, tq, 1), -jnp.inf, jnp.float32)
    l0 = jnp.zeros((n_head, tq, 1), jnp.float32)
    a0 = jnp.zeros((n_head, tq, hd), jnp.float32)

    # fully-visible (off-diagonal) chunks: no mask, dynamic trip count = t
    carry = jax.lax.fori_loop(0, t, lambda j, c: chunk(j, c, None), (m0, l0, a0))

    # diagonal chunk with a 2-D causal mask (local row/col comparison)
    qi = jax.lax.broadcasted_iota(jnp.int32, (1, tq, tq), 1)
    ki = jax.lax.broadcasted_iota(jnp.int32, (1, tq, tq), 2)
    m, l, acc = chunk(t, carry, ki <= qi)

    inv_l = pl.reciprocal(l, approx=True)                      # EUP divide
    att = (acc * inv_l).astype(jnp.bfloat16)                   # (H, tq, hd)

    # ---- output projection: per-head MXU accumulation (no concat) ----
    y = jnp.zeros((tq, C), jnp.float32)
    for hi in range(n_head):
        y = y + jnp.dot(att[hi], wproj_ref[hi],
                        preferred_element_type=jnp.float32)
    y = y + bproj_ref[...]
    x1 = x_tile + y                                            # first residual (f32)

    # ---- MLP branch ----
    h2 = layernorm(x1, ln2w_ref[...], ln2b_ref[...]).astype(jnp.bfloat16)
    ff = jnp.dot(h2, wfc_ref[...],
                 preferred_element_type=jnp.float32) + bfc_ref[...]
    c = math.sqrt(2.0 / math.pi)                               # tanh-GELU in f32
    ff = 0.5 * ff * (1.0 + jnp.tanh(c * (ff + 0.044715 * ff * ff * ff)))
    ff = jnp.dot(ff.astype(jnp.bfloat16), wfc2_ref[...],
                 preferred_element_type=jnp.float32) + bfc2_ref[...]

    o_ref[0] = (x1 + ff).astype(o_ref.dtype)


# ------------------------------ wrapper -------------------------------------

def _padded_bytes(shape, dtype):
    """VMEM footprint estimate with (sublane, 128-lane) padding of the last two dims."""
    itemsize = jnp.dtype(dtype).itemsize
    dims = list(shape) if shape else [1]
    dims[-1] = -(-dims[-1] // 128) * 128
    if len(dims) >= 2:
        sub = 8 * max(1, 4 // itemsize)           # f32: 8, bf16: 16, int8: 32
        dims[-2] = -(-dims[-2] // sub) * sub
    n = 1
    for d in dims:
        n *= d
    return n * itemsize


def _vmem_limit_bytes(est):
    """Always set an explicit scoped-VMEM limit (v5e default is only 16 MiB)."""
    try:
        cap = int(pltpu.get_tpu_info().vmem_capacity_bytes)
    except Exception:
        cap = 64 * 1024 * 1024                    # conservative (v7x per-core VMEM)
    return int(min(max(est, 16 * 1024 * 1024), (cap * 7) // 8))


def gpt2_block(x, params, n_head, *, tq=None):
    """x: (B, T, C) float32.  params: dict of pre-transposed (in, out) weights."""
    B, T, C = x.shape
    assert C % n_head == 0
    hd = C // n_head
    if tq is None:
        # 128 rows/tile on real shapes; whole sequence if tiny.
        # TODO(synk): raise to 256 on v6e (128 MiB VMEM, 256-wide MXU) via get_tpu_info.
        tq = T if T <= 128 else 128
    assert T % tq == 0
    nt = T // tq

    bf16 = jnp.bfloat16
    # Matmul weights in bf16 (MXU); biases / LN params stay f32 (VPU math in f32).
    # w_proj is reshaped head-major so head contributions accumulate on the MXU.
    wproj3 = params["w_proj"].reshape(n_head, hd, C)
    plist = [
        params["ln1_w"].astype(jnp.float32), params["ln1_b"].astype(jnp.float32),
        params["w_qkv"].astype(bf16),        params["b_qkv"].astype(jnp.float32),
        wproj3.astype(bf16),                 params["b_proj"].astype(jnp.float32),
        params["ln2_w"].astype(jnp.float32), params["ln2_b"].astype(jnp.float32),
        params["w_fc"].astype(bf16),         params["b_fc"].astype(jnp.float32),
        params["w_fc2"].astype(bf16),        params["b_fc2"].astype(jnp.float32),
    ]
    big_weight_idx = {2, 4, 8, 10}           # w_qkv, w_proj, w_fc, w_fc2

    # --- padded working-set estimate -> explicit scoped-VMEM limit ---
    est = 0
    est += 2 * sum(_padded_bytes(p.shape, p.dtype) for p in plist)     # weights (<=2 bufs)
    est += 4 * _padded_bytes((tq, C), jnp.float32)                     # x + out blocks, 2 bufs
    est += _padded_bytes((n_head, tq, hd), bf16)                       # Q scratch
    est += 2 * _padded_bytes((n_head, T, hd), bf16)                    # K/V scratch
    est += 2 * _padded_bytes((tq, 3 * C), jnp.float32)                 # qkv transient
    est += 3 * _padded_bytes((n_head, tq, tq), jnp.float32)            # s, p, mask
    est += 2 * _padded_bytes((n_head, tq, hd), jnp.float32)            # acc, att
    est += 2 * _padded_bytes((tq, 4 * C), jnp.float32)                 # MLP hidden
    est += 4 * _padded_bytes((tq, C), jnp.float32)                     # y, x1, h2, out
    vmem_limit = _vmem_limit_bytes(int(est * 1.25))

    kernel = functools.partial(_gpt2_block_kernel, n_head=n_head, tq=tq)

    def build_and_call(single_buffer_weights):
        def const_spec(shape, single):
            nd = len(shape)
            kw = {}
            if single:
                kw["pipeline_mode"] = pl.Buffered(1)   # weights are grid-invariant
            return pl.BlockSpec(shape, lambda b, t, _nd=nd: (0,) * _nd, **kw)

        in_specs = [pl.BlockSpec((1, tq, C), lambda b, t: (b, t, 0))]
        in_specs += [const_spec(p.shape, single_buffer_weights and (i in big_weight_idx))
                     for i, p in enumerate(plist)]
        out_spec = pl.BlockSpec((1, tq, C), lambda b, t: (b, t, 0))

        scratch_shapes = [
            pltpu.VMEM((n_head, tq, hd), bf16),   # Q (current tile, head-major)
            pltpu.VMEM((n_head, T, hd), bf16),    # K (grows with t, head-major)
            pltpu.VMEM((n_head, T, hd), bf16),    # V
        ]

        return pl.pallas_call(
            kernel,
            out_shape=jax.ShapeDtypeStruct((B, T, C), jnp.float32),
            grid=(B, nt),
            in_specs=in_specs,
            out_specs=out_spec,
            scratch_shapes=scratch_shapes,
            compiler_params=pltpu.CompilerParams(
                dimension_semantics=("parallel", "arbitrary"),
                vmem_limit_bytes=vmem_limit),
        )(x, *plist)

    try:
        return build_and_call(True)
    except Exception:
        # Fallback if this JAX build rejects single-buffered (Buffered(1)) inputs.
        return build_and_call(False)


# ------------------------- pure-JAX reference --------------------------------

def gpt2_block_ref(x, params, n_head):
    eps = 1e-5

    def ln(h, w, b):
        mu = jnp.mean(h, axis=-1, keepdims=True)
        var = jnp.mean((h - mu) ** 2, axis=-1, keepdims=True)
        return (h - mu) / jnp.sqrt(var + eps) * w + b

    B, T, C = x.shape
    hd = C // n_head
    h = ln(x, params["ln1_w"], params["ln1_b"])
    qkv = h @ params["w_qkv"] + params["b_qkv"]
    q, k, v = jnp.split(qkv, 3, axis=-1)
    q = q.reshape(B, T, n_head, hd).transpose(0, 2, 1, 3)
    k = k.reshape(B, T, n_head, hd).transpose(0, 2, 1, 3)
    v = v.reshape(B, T, n_head, hd).transpose(0, 2, 1, 3)
    s = jnp.einsum("bhqd,bhkd->bhqk", q, k) / math.sqrt(hd)
    mask = jnp.tril(jnp.ones((T, T), dtype=bool))
    s = jnp.where(mask, s, -jnp.inf)
    p = jax.nn.softmax(s, axis=-1)
    y = jnp.einsum("bhqk,bhkd->bhqd", p, v)
    y = y.transpose(0, 2, 1, 3).reshape(B, T, C)
    y = y @ params["w_proj"] + params["b_proj"]
    x1 = x + y
    h2 = ln(x1, params["ln2_w"], params["ln2_b"])
    ff = h2 @ params["w_fc"] + params["b_fc"]
    c = math.sqrt(2.0 / math.pi)
    ff = 0.5 * ff * (1.0 + jnp.tanh(c * (ff + 0.044715 * ff ** 3)))
    ff = ff @ params["w_fc2"] + params["b_fc2"]
    return x1 + ff


# --------------------------------- main ---------------------------------------

if __name__ == "__main__":
    # TODO(synk): only the transformer Block forward is fused here; embedding gather,
    # final ln_f, tied lm_head and cross-entropy of the full GPT stay in plain JAX/XLA.

    def make_params(key, C):
        keys = jax.random.split(key, 12)
        std = 0.02
        return {
            "ln1_w": 1.0 + 0.1 * jax.random.normal(keys[0], (1, C), jnp.float32),
            "ln1_b": 0.1 * jax.random.normal(keys[1], (1, C), jnp.float32),
            # stored as (in, out) == transposed nn.Linear weight
            "w_qkv": std * jax.random.normal(keys[2], (C, 3 * C), jnp.float32),
            "b_qkv": std * jax.random.normal(keys[3], (1, 3 * C), jnp.float32),
            "w_proj": std * jax.random.normal(keys[4], (C, C), jnp.float32),
            "b_proj": std * jax.random.normal(keys[5], (1, C), jnp.float32),
            "ln2_w": 1.0 + 0.1 * jax.random.normal(keys[6], (1, C), jnp.float32),
            "ln2_b": 0.1 * jax.random.normal(keys[7], (1, C), jnp.float32),
            "w_fc": std * jax.random.normal(keys[8], (C, 4 * C), jnp.float32),
            "b_fc": std * jax.random.normal(keys[9], (1, 4 * C), jnp.float32),
            "w_fc2": std * jax.random.normal(keys[10], (4 * C, C), jnp.float32),
            "b_fc2": std * jax.random.normal(keys[11], (1, C), jnp.float32),
        }

    root = jax.random.PRNGKey(0)
    kp1, kx1, kp2, kx2 = jax.random.split(root, 4)

    # config 1: tiny shapes consistent with the module (single query tile).
    B1, T1, C1, NH1 = 2, 8, 32, 4
    params1 = make_params(kp1, C1)
    x1 = jax.random.normal(kx1, (B1, T1, C1), jnp.float32)
    out1 = jax.block_until_ready(gpt2_block(x1, params1, NH1))
    ref1 = jax.block_until_ready(gpt2_block_ref(x1, params1, NH1))
    np.testing.assert_allclose(np.asarray(out1), np.asarray(ref1), rtol=2e-2, atol=2e-2)

    # config 2: lane-aligned shapes exercising the sequence-tile grid axis and the
    # causal KV-chunk loop (grid (2, 2), one off-diagonal chunk at t=1).
    B2, T2, C2, NH2 = 2, 256, 128, 4
    params2 = make_params(kp2, C2)
    x2 = jax.random.normal(kx2, (B2, T2, C2), jnp.float32)
    out2 = jax.block_until_ready(gpt2_block(x2, params2, NH2))
    ref2 = jax.block_until_ready(gpt2_block_ref(x2, params2, NH2))
    np.testing.assert_allclose(np.asarray(out2), np.asarray(ref2), rtol=2e-2, atol=2e-2)

    print("KERNEL_OK")
</pallas_src>

<mosaic_0001>
module attributes {stable_mosaic.version = 11 : i64} {
  func.func @_gpt2_block_kernel(%arg0: i32, %arg1: i32, %arg2: memref<1x8x32xf32, #tpu.memory_space<vmem>>, %arg3: memref<1x32xf32, #tpu.memory_space<vmem>>, %arg4: memref<1x32xf32, #tpu.memory_space<vmem>>, %arg5: memref<32x96xbf16, #tpu.memory_space<vmem>>, %arg6: memref<1x96xf32, #tpu.memory_space<vmem>>, %arg7: memref<4x8x32xbf16, #tpu.memory_space<vmem>>, %arg8: memref<1x32xf32, #tpu.memory_space<vmem>>, %arg9: memref<1x32xf32, #tpu.memory_space<vmem>>, %arg10: memref<1x32xf32, #tpu.memory_space<vmem>>, %arg11: memref<32x128xbf16, #tpu.memory_space<vmem>>, %arg12: memref<1x128xf32, #tpu.memory_space<vmem>>, %arg13: memref<128x32xbf16, #tpu.memory_space<vmem>>, %arg14: memref<1x32xf32, #tpu.memory_space<vmem>>, %arg15: memref<1x8x32xf32, #tpu.memory_space<vmem>>, %arg16: memref<4x8x8xbf16, #tpu.memory_space<vmem>>, %arg17: memref<4x8x8xbf16, #tpu.memory_space<vmem>>, %arg18: memref<4x8x8xbf16, #tpu.memory_space<vmem>>) attributes {dimension_semantics = [#tpu.dimension_semantics<parallel>, #tpu.dimension_semantics<arbitrary>], iteration_bounds = array<i64: 2, 1>, scalar_prefetch = 0 : i64, scratch_operands = 3 : i64, tpu.core_type = #tpu.core_type<tc>, window_params = [{transform_indices = @transform_0, window_bounds = array<i64: 1, 8, 32>}, {pipeline_mode = #tpu.pipeline_mode<synchronous>, transform_indices = @transform_1, window_bounds = array<i64: 1, 32>}, {pipeline_mode = #tpu.pipeline_mode<synchronous>, transform_indices = @transform_2, window_bounds = array<i64: 1, 32>}, {pipeline_mode = #tpu.pipeline_mode<synchronous>, transform_indices = @transform_3, window_bounds = array<i64: 32, 96>}, {pipeline_mode = #tpu.pipeline_mode<synchronous>, transform_indices = @transform_4, window_bounds = array<i64: 1, 96>}, {pipeline_mode = #tpu.pipeline_mode<synchronous>, transform_indices = @transform_5, window_bounds = array<i64: 4, 8, 32>}, {pipeline_mode = #tpu.pipeline_mode<synchronous>, transform_indices = @transform_6, window_bounds = array<i64: 1, 32>}, {pipeline_mode = #tpu.pipeline_mode<synchronous>, transform_indices = @transform_7, window_bounds = array<i64: 1, 32>}, {pipeline_mode = #tpu.pipeline_mode<synchronous>, transform_indices = @transform_8, window_bounds = array<i64: 1, 32>}, {pipeline_mode = #tpu.pipeline_mode<synchronous>, transform_indices = @transform_9, window_bounds = array<i64: 32, 128>}, {pipeline_mode = #tpu.pipeline_mode<synchronous>, transform_indices = @transform_10, window_bounds = array<i64: 1, 128>}, {pipeline_mode = #tpu.pipeline_mode<synchronous>, transform_indices = @transform_11, window_bounds = array<i64: 128, 32>}, {pipeline_mode = #tpu.pipeline_mode<synchronous>, transform_indices = @transform_12, window_bounds = array<i64: 1, 32>}, {transform_indices = @transform_13, window_bounds = array<i64: 1, 8, 32>}]} {
    %c8_i32 = arith.constant 8 : i32
    %0 = arith.muli %arg1, %c8_i32 : i32
    %1 = tpu.assume_multiple %0, 8 : i32
    %c0 = arith.constant 0 : index
    %c0_0 = arith.constant 0 : index
    %c0_1 = arith.constant 0 : index
    %2 = vector.load %arg2[%c0, %c0_0, %c0_1] : memref<1x8x32xf32, #tpu.memory_space<vmem>>, vector<1x8x32xf32>
    %3 = vector.shape_cast %2 : vector<1x8x32xf32> to vector<8x32xf32>
    %c0_2 = arith.constant 0 : index
    %c0_3 = arith.constant 0 : index
    %4 = vector.load %arg3[%c0_2, %c0_3] : memref<1x32xf32, #tpu.memory_space<vmem>>, vector<1x32xf32>
    %c0_4 = arith.constant 0 : index
    %c0_5 = arith.constant 0 : index
    %5 = vector.load %arg4[%c0_4, %c0_5] : memref<1x32xf32, #tpu.memory_space<vmem>>, vector<1x32xf32>
    %cst = arith.constant dense<0.000000e+00> : vector<8xf32>
    %6 = vector.multi_reduction <add>, %3, %cst [1] : vector<8x32xf32> to vector<8xf32>
    %7 = vector.shape_cast %6 : vector<8xf32> to vector<8x1xf32>
    %cst_6 = arith.constant 3.200000e+01 : f32
    %8 = vector.broadcast %cst_6 : f32 to vector<8x1xf32>
    %9 = arith.divf %7, %8 : vector<8x1xf32>
    %10 = vector.broadcast %9 : vector<8x1xf32> to vector<8x32xf32>
    %11 = arith.subf %3, %10 : vector<8x32xf32>
    %12 = arith.mulf %11, %11 : vector<8x32xf32>
    %cst_7 = arith.constant dense<0.000000e+00> : vector<8xf32>
    %13 = vector.multi_reduction <add>, %12, %cst_7 [1] : vector<8x32xf32> to vector<8xf32>
    %14 = vector.shape_cast %13 : vector<8xf32> to vector<8x1xf32>
    %cst_8 = arith.constant 3.200000e+01 : f32
    %15 = vector.broadcast %cst_8 : f32 to vector<8x1xf32>
    %16 = arith.divf %14, %15 : vector<8x1xf32>
    %cst_9 = arith.constant 9.99999974E-6 : f32
    %17 = vector.broadcast %cst_9 : f32 to vector<8x1xf32>
    %18 = arith.addf %16, %17 : vector<8x1xf32>
    %19 = math.rsqrt %18 : vector<8x1xf32>
    %20 = vector.broadcast %19 : vector<8x1xf32> to vector<8x32xf32>
    %21 = arith.mulf %11, %20 : vector<8x32xf32>
    %22 = vector.broadcast %4 : vector<1x32xf32> to vector<8x32xf32>
    %23 = arith.mulf %21, %22 : vector<8x32xf32>
    %24 = vector.broadcast %5 : vector<1x32xf32> to vector<8x32xf32>
    %25 = arith.addf %23, %24 : vector<8x32xf32>
    %26 = arith.truncf %25 : vector<8x32xf32> to vector<8x32xbf16>
    %c0_10 = arith.constant 0 : index
    %c0_11 = arith.constant 0 : index
    %27 = vector.load %arg5[%c0_10, %c0_11] : memref<32x96xbf16, #tpu.memory_space<vmem>>, vector<32x96xbf16>
    %cst_12 = arith.constant dense<0.000000e+00> : vector<8x96xf32>
    %28 = tpu.matmul %26, %27, %cst_12 {dimension_numbers = #tpu.dot_dimension_numbers<[1], [0], [0], [1], [0, 0, 1, 1], [], []>} : vector<8x32xbf16>, vector<32x96xbf16>, vector<8x96xf32> -> vector<8x96xf32>
    %c0_13 = arith.constant 0 : index
    %c0_14 = arith.constant 0 : index
    %29 = vector.load %arg6[%c0_13, %c0_14] : memref<1x96xf32, #tpu.memory_space<vmem>>, vector<1x96xf32>
    %30 = vector.broadcast %29 : vector<1x96xf32> to vector<8x96xf32>
    %31 = arith.addf %28, %30 : vector<8x96xf32>
    %32 = vector.extract_strided_slice %31 {offsets = [0, 0], sizes = [8, 32], strides = [1, 1]} : vector<8x96xf32> to vector<8x32xf32>
    %cst_15 = arith.constant 0.353553385 : f32
    %33 = vector.broadcast %cst_15 : f32 to vector<8x32xf32>
    %34 = arith.mulf %32, %33 : vector<8x32xf32>
    %35 = arith.truncf %34 : vector<8x32xf32> to vector<8x32xbf16>
    %36 = vector.extract_strided_slice %31 {offsets = [0, 32], sizes = [8, 32], strides = [1, 1]} : vector<8x96xf32> to vector<8x32xf32>
    %37 = arith.truncf %36 : vector<8x32xf32> to vector<8x32xbf16>
    %38 = vector.extract_strided_slice %31 {offsets = [0, 64], sizes = [8, 32], strides = [1, 1]} : vector<8x96xf32> to vector<8x32xf32>
    %39 = arith.truncf %38 : vector<8x32xf32> to vector<8x32xbf16>
    %40 = vector.extract_strided_slice %35 {offsets = [0, 0], sizes = [8, 8], strides = [1, 1]} : vector<8x32xbf16> to vector<8x8xbf16>
    %c0_16 = arith.constant 0 : index
    %c0_17 = arith.constant 0 : index
    %c0_18 = arith.constant 0 : index
    %41 = vector.load %arg16[%c0_16, %c0_17, %c0_18] : memref<4x8x8xbf16, #tpu.memory_space<vmem>>, vector<1x8x8xbf16>
    %42 = vector.shape_cast %41 : vector<1x8x8xbf16> to vector<8x8xbf16>
    %43 = vector.shape_cast %40 : vector<8x8xbf16> to vector<1x8x8xbf16>
    tpu.vector_store %arg16[%c0_16, %c0_17, %c0_18], %43 {strides = array<i32>} : memref<4x8x8xbf16, #tpu.memory_space<vmem>>, vector<1x8x8xbf16>,
    %44 = vector.extract_strided_slice %37 {offsets = [0, 0], sizes = [8, 8], strides = [1, 1]} : vector<8x32xbf16> to vector<8x8xbf16>
    %c0_19 = arith.constant 0 : index
    %45 = arith.index_cast %1 : i32 to index
    %c0_20 = arith.constant 0 : index
    %46 = vector.load %arg17[%c0_19, %45, %c0_20] : memref<4x8x8xbf16, #tpu.memory_space<vmem>>, vector<1x8x8xbf16>
    %47 = vector.shape_cast %46 : vector<1x8x8xbf16> to vector<8x8xbf16>
    %48 = vector.shape_cast %44 : vector<8x8xbf16> to vector<1x8x8xbf16>
    tpu.vector_store %arg17[%c0_19, %45, %c0_20], %48 {strides = array<i32>} : memref<4x8x8xbf16, #tpu.memory_space<vmem>>, vector<1x8x8xbf16>,
    %49 = vector.extract_strided_slice %39 {offsets = [0, 0], sizes = [8, 8], strides = [1, 1]} : vector<8x32xbf16> to vector<8x8xbf16>
    %c0_21 = arith.constant 0 : index
    %50 = arith.index_cast %1 : i32 to index
    %c0_22 = arith.constant 0 : index
    %51 = vector.load %arg18[%c0_21, %50, %c0_22] : memref<4x8x8xbf16, #tpu.memory_space<vmem>>, vector<1x8x8xbf16>
    %52 = vector.shape_cast %51 : vector<1x8x8xbf16> to vector<8x8xbf16>
    %53 = vector.shape_cast %49 : vector<8x8xbf16> to vector<1x8x8xbf16>
    tpu.vector_store %arg18[%c0_21, %50, %c0_22], %53 {strides = array<i32>} : memref<4x8x8xbf16, #tpu.memory_space<vmem>>, vector<1x8x8xbf16>,
    %54 = vector.extract_strided_slice %35 {offsets = [0, 8], sizes = [8, 8], strides = [1, 1]} : vector<8x32xbf16> to vector<8x8xbf16>
    %c1 = arith.constant 1 : index
    %c0_23 = arith.constant 0 : index
    %c0_24 = arith.constant 0 : index
    %55 = vector.load %arg16[%c1, %c0_23, %c0_24] : memref<4x8x8xbf16, #tpu.memory_space<vmem>>, vector<1x8x8xbf16>
    %56 = vector.shape_cast %55 : vector<1x8x8xbf16> to vector<8x8xbf16>
    %57 = vector.shape_cast %54 : vector<8x8xbf16> to vector<1x8x8xbf16>
    tpu.vector_store %arg16[%c1, %c0_23, %c0_24], %57 {strides = array<i32>} : memref<4x8x8xbf16, #tpu.memory_space<vmem>>, vector<1x8x8xbf16>,
    %58 = vector.extract_strided_slice %37 {offsets = [0, 8], sizes = [8, 8], strides = [1, 1]} : vector<8x32xbf16> to vector<8x8xbf16>
    %c1_25 = arith.constant 1 : index
    %59 = arith.index_cast %1 : i32 to index
    %c0_26 = arith.constant 0 : index
    %60 = vector.load %arg17[%c1_25, %59, %c0_26] : memref<4x8x8xbf16, #tpu.memory_space<vmem>>, vector<1x8x8xbf16>
    %61 = vector.shape_cast %60 : vector<1x8x8xbf16> to vector<8x8xbf16>
    %62 = vector.shape_cast %58 : vector<8x8xbf16> to vector<1x8x8xbf16>
    tpu.vector_store %arg17[%c1_25, %59, %c0_26], %62 {strides = array<i32>} : memref<4x8x8xbf16, #tpu.memory_space<vmem>>, vector<1x8x8xbf16>,
    %63 = vector.extract_strided_slice %39 {offsets = [0, 8], sizes = [8, 8], strides = [1, 1]} : vector<8x32xbf16> to vector<8x8xbf16>
    %c1_27 = arith.constant 1 : index
    %64 = arith.index_cast %1 : i32 to index
    %c0_28 = arith.constant 0 : index
    %65 = vector.load %arg18[%c1_27, %64, %c0_28] : memref<4x8x8xbf16, #tpu.memory_space<vmem>>, vector<1x8x8xbf16>
    %66 = vector.shape_cast %65 : vector<1x8x8xbf16> to vector<8x8xbf16>
    %67 = vector.shape_cast %63 : vector<8x8xbf16> to vector<1x8x8xbf16>
    tpu.vector_store %arg18[%c1_27, %64, %c0_28], %67 {strides = array<i32>} : memref<4x8x8xbf16, #tpu.memory_space<vmem>>, vector<1x8x8xbf16>,
    %68 = vector.extract_strided_slice %35 {offsets = [0, 16], sizes = [8, 8], strides = [1, 1]} : vector<8x32xbf16> to vector<8x8xbf16>
    %c2 = arith.constant 2 : index
    %c0_29 = arith.constant 0 : index
    %c0_30 = arith.constant 0 : index
    %69 = vector.load %arg16[%c2, %c0_29, %c0_30] : memref<4x8x8xbf16, #tpu.memory_space<vmem>>, vector<1x8x8xbf16>
    %70 = vector.shape_cast %69 : vector<1x8x8xbf16> to vector<8x8xbf16>
    %71 = vector.shape_cast %68 : vector<8x8xbf16> to vector<1x8x8xbf16>
    tpu.vector_store %arg16[%c2, %c0_29, %c0_30], %71 {strides = array<i32>} : memref<4x8x8xbf16, #tpu.memory_space<vmem>>, vector<1x8x8xbf16>,
    %72 = vector.extract_strided_slice %37 {offsets = [0, 16], sizes = [8, 8], strides = [1, 1]} : vector<8x32xbf16> to vector<8x8xbf16>
    %c2_31 = arith.constant 2 : index
    %73 = arith.index_cast %1 : i32 to index
    %c0_32 = arith.constant 0 : index
    %74 = vector.load %arg17[%c2_31, %73, %c0_32] : memref<4x8x8xbf16, #tpu.memory_space<vmem>>, vector<1x8x8xbf16>
    %75 = vector.shape_cast %74 : vector<1x8x8xbf16> to vector<8x8xbf16>
    %76 = vector.shape_cast %72 : vector<8x8xbf16> to vector<1x8x8xbf16>
    tpu.vector_store %arg17[%c2_31, %73, %c0_32], %76 {strides = array<i32>} : memref<4x8x8xbf16, #tpu.memory_space<vmem>>, vector<1x8x8xbf16>,
    %77 = vector.extract_strided_slice %39 {offsets = [0, 16], sizes = [8, 8], strides = [1, 1]} : vector<8x32xbf16> to vector<8x8xbf16>
    %c2_33 = arith.constant 2 : index
    %78 = arith.index_cast %1 : i32 to index
    %c0_34 = arith.constant 0 : index
    %79 = vector.load %arg18[%c2_33, %78, %c0_34] : memref<4x8x8xbf16, #tpu.memory_space<vmem>>, vector<1x8x8xbf16>
    %80 = vector.shape_cast %79 : vector<1x8x8xbf16> to vector<8x8xbf16>
    %81 = vector.shape_cast %77 : vector<8x8xbf16> to vector<1x8x8xbf16>
    tpu.vector_store %arg18[%c2_33, %78, %c0_34], %81 {strides = array<i32>} : memref<4x8x8xbf16, #tpu.memory_space<vmem>>, vector<1x8x8xbf16>,
    %82 = vector.extract_strided_slice %35 {offsets = [0, 24], sizes = [8, 8], strides = [1, 1]} : vector<8x32xbf16> to vector<8x8xbf16>
    %c3 = arith.constant 3 : index
    %c0_35 = arith.constant 0 : index
    %c0_36 = arith.constant 0 : index
    %83 = vector.load %arg16[%c3, %c0_35, %c0_36] : memref<4x8x8xbf16, #tpu.memory_space<vmem>>, vector<1x8x8xbf16>
    %84 = vector.shape_cast %83 : vector<1x8x8xbf16> to vector<8x8xbf16>
    %85 = vector.shape_cast %82 : vector<8x8xbf16> to vector<1x8x8xbf16>
    tpu.vector_store %arg16[%c3, %c0_35, %c0_36], %85 {strides = array<i32>} : memref<4x8x8xbf16, #tpu.memory_space<vmem>>, vector<1x8x8xbf16>,
    %86 = vector.extract_strided_slice %37 {offsets = [0, 24], sizes = [8, 8], strides = [1, 1]} : vector<8x32xbf16> to vector<8x8xbf16>
    %c3_37 = arith.constant 3 : index
    %87 = arith.index_cast %1 : i32 to index
    %c0_38 = arith.constant 0 : index
    %88 = vector.load %arg17[%c3_37, %87, %c0_38] : memref<4x8x8xbf16, #tpu.memory_space<vmem>>, vector<1x8x8xbf16>
    %89 = vector.shape_cast %88 : vector<1x8x8xbf16> to vector<8x8xbf16>
    %90 = vector.shape_cast %86 : vector<8x8xbf16> to vector<1x8x8xbf16>
    tpu.vector_store %arg17[%c3_37, %87, %c0_38], %90 {strides = array<i32>} : memref<4x8x8xbf16, #tpu.memory_space<vmem>>, vector<1x8x8xbf16>,
    %91 = vector.extract_strided_slice %39 {offsets = [0, 24], sizes = [8, 8], strides = [1, 1]} : vector<8x32xbf16> to vector<8x8xbf16>
    %c3_39 = arith.constant 3 : index
    %92 = arith.index_cast %1 : i32 to index
    %c0_40 = arith.constant 0 : index
    %93 = vector.load %arg18[%c3_39, %92, %c0_40] : memref<4x8x8xbf16, #tpu.memory_space<vmem>>, vector<1x8x8xbf16>
    %94 = vector.shape_cast %93 : vector<1x8x8xbf16> to vector<8x8xbf16>
    %95 = vector.shape_cast %91 : vector<8x8xbf16> to vector<1x8x8xbf16>
    tpu.vector_store %arg18[%c3_39, %92, %c0_40], %95 {strides = array<i32>} : memref<4x8x8xbf16, #tpu.memory_space<vmem>>, vector<1x8x8xbf16>,
    %c0_41 = arith.constant 0 : index
    %c0_42 = arith.constant 0 : index
    %c0_43 = arith.constant 0 : index
    %96 = vector.load %arg16[%c0_41, %c0_42, %c0_43] : memref<4x8x8xbf16, #tpu.memory_space<vmem>>, vector<4x8x8xbf16>
    %cst_44 = arith.constant 0xFF800000 : f32
    %97 = vector.broadcast %cst_44 : f32 to vector<4x8x1xf32>
    %cst_45 = arith.constant 0.000000e+00 : f32
    %98 = vector.broadcast %cst_45 : f32 to vector<4x8x1xf32>
    %cst_46 = arith.constant 0.000000e+00 : f32
    %99 = vector.broadcast %cst_46 : f32 to vector<4x8x8xf32>
    %c0_i32 = arith.constant 0 : i32
    %100 = arith.subi %arg1, %c0_i32 : i32
    %101 = arith.addi %c0_i32, %100 : i32
    %c1_i32 = arith.constant 1 : i32
    %102:3 = scf.for %arg19 = %c0_i32 to %101 step %c1_i32 iter_args(%arg20 = %97, %arg21 = %98, %arg22 = %99) -> (vector<4x8x1xf32>, vector<4x8x1xf32>, vector<4x8x8xf32>)  : i32 {
      %c8_i32_102 = arith.constant 8 : i32
      %218 = arith.muli %arg19, %c8_i32_102 : i32
      %219 = tpu.assume_multiple %218, 8 : i32
      %c0_103 = arith.constant 0 : index
      %220 = arith.index_cast %219 : i32 to index
      %c0_104 = arith.constant 0 : index
      %221 = vector.load %arg17[%c0_103, %220, %c0_104] : memref<4x8x8xbf16, #tpu.memory_space<vmem>>, vector<4x8x8xbf16>
      %c0_105 = arith.constant 0 : index
      %222 = arith.index_cast %219 : i32 to index
      %c0_106 = arith.constant 0 : index
      %223 = vector.load %arg18[%c0_105, %222, %c0_106] : memref<4x8x8xbf16, #tpu.memory_space<vmem>>, vector<4x8x8xbf16>
      "tpu.trace_start"() <{level = 10 : i32, message = "hqd,hkd->hqk"}> : () -> ()
      %cst_107 = arith.constant dense<0.000000e+00> : vector<4x8x8xf32>
      %224 = tpu.matmul %96, %221, %cst_107 {dimension_numbers = #tpu.dot_dimension_numbers<[2], [2], [1], [1], [0, 0, 0, 1, 1, 1], [0], [0]>} : vector<4x8x8xbf16>, vector<4x8x8xbf16>, vector<4x8x8xf32> -> vector<4x8x8xf32>
      "tpu.trace_stop"() : () -> ()
      %cst_108 = arith.constant dense<0xFF800000> : vector<4x8xf32>
      %225 = vector.multi_reduction <maximumf>, %224, %cst_108 [2] : vector<4x8x8xf32> to vector<4x8xf32>
      %226 = vector.shape_cast %225 : vector<4x8xf32> to vector<4x8x1xf32>
      %227 = arith.maximumf %arg20, %226 : vector<4x8x1xf32>
      %228 = arith.subf %arg20, %227 : vector<4x8x1xf32>
      %229 = math.exp %228 : vector<4x8x1xf32>
      %230 = vector.broadcast %227 : vector<4x8x1xf32> to vector<4x8x8xf32>
      %231 = arith.subf %224, %230 : vector<4x8x8xf32>
      %232 = math.exp %231 : vector<4x8x8xf32>
      %233 = arith.mulf %229, %arg21 : vector<4x8x1xf32>
      %cst_109 = arith.constant dense<0.000000e+00> : vector<4x8xf32>
      %234 = vector.multi_reduction <add>, %232, %cst_109 [2] : vector<4x8x8xf32> to vector<4x8xf32>
      %235 = vector.shape_cast %234 : vector<4x8xf32> to vector<4x8x1xf32>
      %236 = arith.addf %233, %235 : vector<4x8x1xf32>
      %237 = vector.broadcast %229 : vector<4x8x1xf32> to vector<4x8x8xf32>
      %238 = arith.mulf %237, %arg22 : vector<4x8x8xf32>
      %239 = arith.truncf %232 : vector<4x8x8xf32> to vector<4x8x8xbf16>
      "tpu.trace_start"() <{level = 10 : i32, message = "hqk,hkd->hqd"}> : () -> ()
      %cst_110 = arith.constant dense<0.000000e+00> : vector<4x8x8xf32>
      %240 = tpu.matmul %239, %223, %cst_110 {dimension_numbers = #tpu.dot_dimension_numbers<[2], [1], [1], [2], [0, 0, 0, 1, 1, 2], [0], [0]>} : vector<4x8x8xbf16>, vector<4x8x8xbf16>, vector<4x8x8xf32> -> vector<4x8x8xf32>
      "tpu.trace_stop"() : () -> ()
      %241 = arith.addf %238, %240 : vector<4x8x8xf32>
      scf.yield %227, %236, %241 : vector<4x8x1xf32>, vector<4x8x1xf32>, vector<4x8x8xf32>
    }
    %103 = tpu.iota {dimensions = array<i32: 1>} : vector<1x8x8xi32>
    %104 = tpu.iota {dimensions = array<i32: 2>} : vector<1x8x8xi32>
    %105 = arith.cmpi sle, %104, %103 : vector<1x8x8xi32>
    %c8_i32_47 = arith.constant 8 : i32
    %106 = arith.muli %arg1, %c8_i32_47 : i32
    %107 = tpu.assume_multiple %106, 8 : i32
    %c0_48 = arith.constant 0 : index
    %108 = arith.index_cast %107 : i32 to index
    %c0_49 = arith.constant 0 : index
    %109 = vector.load %arg17[%c0_48, %108, %c0_49] : memref<4x8x8xbf16, #tpu.memory_space<vmem>>, vector<4x8x8xbf16>
    %c0_50 = arith.constant 0 : index
    %110 = arith.index_cast %107 : i32 to index
    %c0_51 = arith.constant 0 : index
    %111 = vector.load %arg18[%c0_50, %110, %c0_51] : memref<4x8x8xbf16, #tpu.memory_space<vmem>>, vector<4x8x8xbf16>
    "tpu.trace_start"() <{level = 10 : i32, message = "hqd,hkd->hqk"}> : () -> ()
    %cst_52 = arith.constant dense<0.000000e+00> : vector<4x8x8xf32>
    %112 = tpu.matmul %96, %109, %cst_52 {dimension_numbers = #tpu.dot_dimension_numbers<[2], [2], [1], [1], [0, 0, 0, 1, 1, 1], [0], [0]>} : vector<4x8x8xbf16>, vector<4x8x8xbf16>, vector<4x8x8xf32> -> vector<4x8x8xf32>
    %cst_53 = arith.constant -1.000000e+30 : f32
    "tpu.trace_stop"() : () -> ()
    %113 = vector.shape_cast %105 : vector<1x8x8xi1> to vector<1x8x8xi1>
    %114 = vector.broadcast %113 : vector<1x8x8xi1> to vector<4x8x8xi1>
    %115 = vector.broadcast %cst_53 : f32 to vector<4x8x8xf32>
    %116 = arith.select %114, %112, %115 : vector<4x8x8xi1>, vector<4x8x8xf32>
    %cst_54 = arith.constant dense<0xFF800000> : vector<4x8xf32>
    %117 = vector.multi_reduction <maximumf>, %116, %cst_54 [2] : vector<4x8x8xf32> to vector<4x8xf32>
    %118 = vector.shape_cast %117 : vector<4x8xf32> to vector<4x8x1xf32>
    %119 = arith.maximumf %102#0, %118 : vector<4x8x1xf32>
    %120 = arith.subf %102#0, %119 : vector<4x8x1xf32>
    %121 = math.exp %120 : vector<4x8x1xf32>
    %122 = vector.broadcast %119 : vector<4x8x1xf32> to vector<4x8x8xf32>
    %123 = arith.subf %116, %122 : vector<4x8x8xf32>
    %124 = math.exp %123 : vector<4x8x8xf32>
    %125 = arith.mulf %121, %102#1 : vector<4x8x1xf32>
    %cst_55 = arith.constant dense<0.000000e+00> : vector<4x8xf32>
    %126 = vector.multi_reduction <add>, %124, %cst_55 [2] : vector<4x8x8xf32> to vector<4x8xf32>
    %127 = vector.shape_cast %126 : vector<4x8xf32> to vector<4x8x1xf32>
    %128 = arith.addf %125, %127 : vector<4x8x1xf32>
    %129 = vector.broadcast %121 : vector<4x8x1xf32> to vector<4x8x8xf32>
    %130 = arith.mulf %129, %102#2 : vector<4x8x8xf32>
    %131 = arith.truncf %124 : vector<4x8x8xf32> to vector<4x8x8xbf16>
    "tpu.trace_start"() <{level = 10 : i32, message = "hqk,hkd->hqd"}> : () -> ()
    %cst_56 = arith.constant dense<0.000000e+00> : vector<4x8x8xf32>
    %132 = tpu.matmul %131, %111, %cst_56 {dimension_numbers = #tpu.dot_dimension_numbers<[2], [1], [1], [2], [0, 0, 0, 1, 1, 2], [0], [0]>} : vector<4x8x8xbf16>, vector<4x8x8xbf16>, vector<4x8x8xf32> -> vector<4x8x8xf32>
    "tpu.trace_stop"() : () -> ()
    %133 = arith.addf %130, %132 : vector<4x8x8xf32>
    %134 = tpu.reciprocal %128 {approx = true} : vector<4x8x1xf32> -> vector<4x8x1xf32>
    %135 = vector.broadcast %134 : vector<4x8x1xf32> to vector<4x8x8xf32>
    %136 = arith.mulf %133, %135 : vector<4x8x8xf32>
    %137 = arith.truncf %136 : vector<4x8x8xf32> to vector<4x8x8xbf16>
    %cst_57 = arith.constant 0.000000e+00 : f32
    %138 = vector.broadcast %cst_57 : f32 to vector<8x32xf32>
    %139 = vector.extract_strided_slice %137 {offsets = [0, 0, 0], sizes = [1, 8, 8], strides = [1, 1, 1]} : vector<4x8x8xbf16> to vector<1x8x8xbf16>
    %140 = vector.shape_cast %139 : vector<1x8x8xbf16> to vector<8x8xbf16>
    %c0_58 = arith.constant 0 : index
    %c0_59 = arith.constant 0 : index
    %c0_60 = arith.constant 0 : index
    %141 = vector.load %arg7[%c0_58, %c0_59, %c0_60] : memref<4x8x32xbf16, #tpu.memory_space<vmem>>, vector<1x8x32xbf16>
    %142 = vector.shape_cast %141 : vector<1x8x32xbf16> to vector<8x32xbf16>
    %cst_61 = arith.constant dense<0.000000e+00> : vector<8x32xf32>
    %143 = tpu.matmul %140, %142, %cst_61 {dimension_numbers = #tpu.dot_dimension_numbers<[1], [0], [0], [1], [0, 0, 1, 1], [], []>} : vector<8x8xbf16>, vector<8x32xbf16>, vector<8x32xf32> -> vector<8x32xf32>
    %144 = arith.addf %138, %143 : vector<8x32xf32>
    %145 = vector.extract_strided_slice %137 {offsets = [1, 0, 0], sizes = [1, 8, 8], strides = [1, 1, 1]} : vector<4x8x8xbf16> to vector<1x8x8xbf16>
    %146 = vector.shape_cast %145 : vector<1x8x8xbf16> to vector<8x8xbf16>
    %c1_62 = arith.constant 1 : index
    %c0_63 = arith.constant 0 : index
    %c0_64 = arith.constant 0 : index
    %147 = vector.load %arg7[%c1_62, %c0_63, %c0_64] : memref<4x8x32xbf16, #tpu.memory_space<vmem>>, vector<1x8x32xbf16>
    %148 = vector.shape_cast %147 : vector<1x8x32xbf16> to vector<8x32xbf16>
    %cst_65 = arith.constant dense<0.000000e+00> : vector<8x32xf32>
    %149 = tpu.matmul %146, %148, %cst_65 {dimension_numbers = #tpu.dot_dimension_numbers<[1], [0], [0], [1], [0, 0, 1, 1], [], []>} : vector<8x8xbf16>, vector<8x32xbf16>, vector<8x32xf32> -> vector<8x32xf32>
    %150 = arith.addf %144, %149 : vector<8x32xf32>
    %151 = vector.extract_strided_slice %137 {offsets = [2, 0, 0], sizes = [1, 8, 8], strides = [1, 1, 1]} : vector<4x8x8xbf16> to vector<1x8x8xbf16>
    %152 = vector.shape_cast %151 : vector<1x8x8xbf16> to vector<8x8xbf16>
    %c2_66 = arith.constant 2 : index
    %c0_67 = arith.constant 0 : index
    %c0_68 = arith.constant 0 : index
    %153 = vector.load %arg7[%c2_66, %c0_67, %c0_68] : memref<4x8x32xbf16, #tpu.memory_space<vmem>>, vector<1x8x32xbf16>
    %154 = vector.shape_cast %153 : vector<1x8x32xbf16> to vector<8x32xbf16>
    %cst_69 = arith.constant dense<0.000000e+00> : vector<8x32xf32>
    %155 = tpu.matmul %152, %154, %cst_69 {dimension_numbers = #tpu.dot_dimension_numbers<[1], [0], [0], [1], [0, 0, 1, 1], [], []>} : vector<8x8xbf16>, vector<8x32xbf16>, vector<8x32xf32> -> vector<8x32xf32>
    %156 = arith.addf %150, %155 : vector<8x32xf32>
    %157 = vector.extract_strided_slice %137 {offsets = [3, 0, 0], sizes = [1, 8, 8], strides = [1, 1, 1]} : vector<4x8x8xbf16> to vector<1x8x8xbf16>
    %158 = vector.shape_cast %157 : vector<1x8x8xbf16> to vector<8x8xbf16>
    %c3_70 = arith.constant 3 : index
    %c0_71 = arith.constant 0 : index
    %c0_72 = arith.constant 0 : index
    %159 = vector.load %arg7[%c3_70, %c0_71, %c0_72] : memref<4x8x32xbf16, #tpu.memory_space<vmem>>, vector<1x8x32xbf16>
    %160 = vector.shape_cast %159 : vector<1x8x32xbf16> to vector<8x32xbf16>
    %cst_73 = arith.constant dense<0.000000e+00> : vector<8x32xf32>
    %161 = tpu.matmul %158, %160, %cst_73 {dimension_numbers = #tpu.dot_dimension_numbers<[1], [0], [0], [1], [0, 0, 1, 1], [], []>} : vector<8x8xbf16>, vector<8x32xbf16>, vector<8x32xf32> -> vector<8x32xf32>
    %162 = arith.addf %156, %161 : vector<8x32xf32>
    %c0_74 = arith.constant 0 : index
    %c0_75 = arith.constant 0 : index
    %163 = vector.load %arg8[%c0_74, %c0_75] : memref<1x32xf32, #tpu.memory_space<vmem>>, vector<1x32xf32>
    %164 = vector.broadcast %163 : vector<1x32xf32> to vector<8x32xf32>
    %165 = arith.addf %162, %164 : vector<8x32xf32>
    %166 = arith.addf %3, %165 : vector<8x32xf32>
    %c0_76 = arith.constant 0 : index
    %c0_77 = arith.constant 0 : index
    %167 = vector.load %arg9[%c0_76, %c0_77] : memref<1x32xf32, #tpu.memory_space<vmem>>, vector<1x32xf32>
    %c0_78 = arith.constant 0 : index
    %c0_79 = arith.constant 0 : index
    %168 = vector.load %arg10[%c0_78, %c0_79] : memref<1x32xf32, #tpu.memory_space<vmem>>, vector<1x32xf32>
    %cst_80 = arith.constant dense<0.000000e+00> : vector<8xf32>
    %169 = vector.multi_reduction <add>, %166, %cst_80 [1] : vector<8x32xf32> to vector<8xf32>
    %170 = vector.shape_cast %169 : vector<8xf32> to vector<8x1xf32>
    %cst_81 = arith.constant 3.200000e+01 : f32
    %171 = vector.broadcast %cst_81 : f32 to vector<8x1xf32>
    %172 = arith.divf %170, %171 : vector<8x1xf32>
    %173 = vector.broadcast %172 : vector<8x1xf32> to vector<8x32xf32>
    %174 = arith.subf %166, %173 : vector<8x32xf32>
    %175 = arith.mulf %174, %174 : vector<8x32xf32>
    %cst_82 = arith.constant dense<0.000000e+00> : vector<8xf32>
    %176 = vector.multi_reduction <add>, %175, %cst_82 [1] : vector<8x32xf32> to vector<8xf32>
    %177 = vector.shape_cast %176 : vector<8xf32> to vector<8x1xf32>
    %cst_83 = arith.constant 3.200000e+01 : f32
    %178 = vector.broadcast %cst_83 : f32 to vector<8x1xf32>
    %179 = arith.divf %177, %178 : vector<8x1xf32>
    %cst_84 = arith.constant 9.99999974E-6 : f32
    %180 = vector.broadcast %cst_84 : f32 to vector<8x1xf32>
    %181 = arith.addf %179, %180 : vector<8x1xf32>
    %182 = math.rsqrt %181 : vector<8x1xf32>
    %183 = vector.broadcast %182 : vector<8x1xf32> to vector<8x32xf32>
    %184 = arith.mulf %174, %183 : vector<8x32xf32>
    %185 = vector.broadcast %167 : vector<1x32xf32> to vector<8x32xf32>
    %186 = arith.mulf %184, %185 : vector<8x32xf32>
    %187 = vector.broadcast %168 : vector<1x32xf32> to vector<8x32xf32>
    %188 = arith.addf %186, %187 : vector<8x32xf32>
    %189 = arith.truncf %188 : vector<8x32xf32> to vector<8x32xbf16>
    %c0_85 = arith.constant 0 : index
    %c0_86 = arith.constant 0 : index
    %190 = vector.load %arg11[%c0_85, %c0_86] : memref<32x128xbf16, #tpu.memory_space<vmem>>, vector<32x128xbf16>
    %cst_87 = arith.constant dense<0.000000e+00> : vector<8x128xf32>
    %191 = tpu.matmul %189, %190, %cst_87 {dimension_numbers = #tpu.dot_dimension_numbers<[1], [0], [0], [1], [0, 0, 1, 1], [], []>} : vector<8x32xbf16>, vector<32x128xbf16>, vector<8x128xf32> -> vector<8x128xf32>
    %c0_88 = arith.constant 0 : index
    %c0_89 = arith.constant 0 : index
    %192 = vector.load %arg12[%c0_88, %c0_89] : memref<1x128xf32, #tpu.memory_space<vmem>>, vector<1x128xf32>
    %193 = vector.broadcast %192 : vector<1x128xf32> to vector<8x128xf32>
    %194 = arith.addf %191, %193 : vector<8x128xf32>
    %cst_90 = arith.constant 5.000000e-01 : f32
    %195 = vector.broadcast %cst_90 : f32 to vector<8x128xf32>
    %196 = arith.mulf %195, %194 : vector<8x128xf32>
    %cst_91 = arith.constant 4.471500e-02 : f32
    %197 = vector.broadcast %cst_91 : f32 to vector<8x128xf32>
    %198 = arith.mulf %197, %194 : vector<8x128xf32>
    %199 = arith.mulf %198, %194 : vector<8x128xf32>
    %200 = arith.mulf %199, %194 : vector<8x128xf32>
    %201 = arith.addf %194, %200 : vector<8x128xf32>
    %cst_92 = arith.constant 0.797884583 : f32
    %202 = vector.broadcast %cst_92 : f32 to vector<8x128xf32>
    %203 = arith.mulf %202, %201 : vector<8x128xf32>
    %204 = math.tanh %203 : vector<8x128xf32>
    %cst_93 = arith.constant 1.000000e+00 : f32
    %205 = vector.broadcast %cst_93 : f32 to vector<8x128xf32>
    %206 = arith.addf %205, %204 : vector<8x128xf32>
    %207 = arith.mulf %196, %206 : vector<8x128xf32>
    %208 = arith.truncf %207 : vector<8x128xf32> to vector<8x128xbf16>
    %c0_94 = arith.constant 0 : index
    %c0_95 = arith.constant 0 : index
    %209 = vector.load %arg13[%c0_94, %c0_95] : memref<128x32xbf16, #tpu.memory_space<vmem>>, vector<128x32xbf16>
    %cst_96 = arith.constant dense<0.000000e+00> : vector<8x32xf32>
    %210 = tpu.matmul %208, %209, %cst_96 {dimension_numbers = #tpu.dot_dimension_numbers<[1], [0], [0], [1], [0, 0, 1, 1], [], []>} : vector<8x128xbf16>, vector<128x32xbf16>, vector<8x32xf32> -> vector<8x32xf32>
    %c0_97 = arith.constant 0 : index
    %c0_98 = arith.constant 0 : index
    %211 = vector.load %arg14[%c0_97, %c0_98] : memref<1x32xf32, #tpu.memory_space<vmem>>, vector<1x32xf32>
    %212 = vector.broadcast %211 : vector<1x32xf32> to vector<8x32xf32>
    %213 = arith.addf %210, %212 : vector<8x32xf32>
    %214 = arith.addf %166, %213 : vector<8x32xf32>
    %c0_99 = arith.constant 0 : index
    %c0_100 = arith.constant 0 : index
    %c0_101 = arith.constant 0 : index
    %215 = vector.load %arg15[%c0_99, %c0_100, %c0_101] : memref<1x8x32xf32, #tpu.memory_space<vmem>>, vector<1x8x32xf32>
    %216 = vector.shape_cast %215 : vector<1x8x32xf32> to vector<8x32xf32>
    %217 = vector.shape_cast %214 : vector<8x32xf32> to vector<1x8x32xf32>
    tpu.vector_store %arg15[%c0_99, %c0_100, %c0_101], %217 {strides = array<i32>} : memref<1x8x32xf32, #tpu.memory_space<vmem>>, vector<1x8x32xf32>,
    return
  }
  func.func @transform_0(%arg0: i32, %arg1: i32) -> (i32, i32, i32) {
    %c0_i32 = arith.constant 0 : i32
    %c0_i32_0 = arith.constant 0 : i32
    return %arg0, %arg1, %c0_i32 : i32, i32, i32
  }
  func.func @transform_1(%arg0: i32, %arg1: i32) -> (i32, i32) {
    %c0_i32 = arith.constant 0 : i32
    %c0_i32_0 = arith.constant 0 : i32
    %c0_i32_1 = arith.constant 0 : i32
    return %c0_i32, %c0_i32_0 : i32, i32
  }
  func.func @transform_2(%arg0: i32, %arg1: i32) -> (i32, i32) {
    %c0_i32 = arith.constant 0 : i32
    %c0_i32_0 = arith.constant 0 : i32
    %c0_i32_1 = arith.constant 0 : i32
    return %c0_i32, %c0_i32_0 : i32, i32
  }
  func.func @transform_3(%arg0: i32, %arg1: i32) -> (i32, i32) {
    %c0_i32 = arith.constant 0 : i32
    %c0_i32_0 = arith.constant 0 : i32
    %c0_i32_1 = arith.constant 0 : i32
    return %c0_i32, %c0_i32_0 : i32, i32
  }
  func.func @transform_4(%arg0: i32, %arg1: i32) -> (i32, i32) {
    %c0_i32 = arith.constant 0 : i32
    %c0_i32_0 = arith.constant 0 : i32
    %c0_i32_1 = arith.constant 0 : i32
    return %c0_i32, %c0_i32_0 : i32, i32
  }
  func.func @transform_5(%arg0: i32, %arg1: i32) -> (i32, i32, i32) {
    %c0_i32 = arith.constant 0 : i32
    %c0_i32_0 = arith.constant 0 : i32
    %c0_i32_1 = arith.constant 0 : i32
    %c0_i32_2 = arith.constant 0 : i32
    return %c0_i32, %c0_i32_0, %c0_i32_1 : i32, i32, i32
  }
  func.func @transform_6(%arg0: i32, %arg1: i32) -> (i32, i32) {
    %c0_i32 = arith.constant 0 : i32
    %c0_i32_0 = arith.constant 0 : i32
    %c0_i32_1 = arith.constant 0 : i32
    return %c0_i32, %c0_i32_0 : i32, i32
  }
  func.func @transform_7(%arg0: i32, %arg1: i32) -> (i32, i32) {
    %c0_i32 = arith.constant 0 : i32
    %c0_i32_0 = arith.constant 0 : i32
    %c0_i32_1 = arith.constant 0 : i32
    return %c0_i32, %c0_i32_0 : i32, i32
  }
  func.func @transform_8(%arg0: i32, %arg1: i32) -> (i32, i32) {
    %c0_i32 = arith.constant 0 : i32
    %c0_i32_0 = arith.constant 0 : i32
    %c0_i32_1 = arith.constant 0 : i32
    return %c0_i32, %c0_i32_0 : i32, i32
  }
  func.func @transform_9(%arg0: i32, %arg1: i32) -> (i32, i32) {
    %c0_i32 = arith.constant 0 : i32
    %c0_i32_0 = arith.constant 0 : i32
    %c0_i32_1 = arith.constant 0 : i32
    return %c0_i32, %c0_i32_0 : i32, i32
  }
  func.func @transform_10(%arg0: i32, %arg1: i32) -> (i32, i32) {
    %c0_i32 = arith.constant 0 : i32
    %c0_i32_0 = arith.constant 0 : i32
    %c0_i32_1 = arith.constant 0 : i32
    return %c0_i32, %c0_i32_0 : i32, i32
  }
  func.func @transform_11(%arg0: i32, %arg1: i32) -> (i32, i32) {
    %c0_i32 = arith.constant 0 : i32
    %c0_i32_0 = arith.constant 0 : i32
    %c0_i32_1 = arith.constant 0 : i32
    return %c0_i32, %c0_i32_0 : i32, i32
  }
  func.func @transform_12(%arg0: i32, %arg1: i32) -> (i32, i32) {
    %c0_i32 = arith.constant 0 : i32
    %c0_i32_0 = arith.constant 0 : i32
    %c0_i32_1 = arith.constant 0 : i32
    return %c0_i32, %c0_i32_0 : i32, i32
  }
  func.func @transform_13(%arg0: i32, %arg1: i32) -> (i32, i32, i32) {
    %c0_i32 = arith.constant 0 : i32
    %c0_i32_0 = arith.constant 0 : i32
    return %arg0, %arg1, %c0_i32 : i32, i32, i32
  }
}

module attributes {stable_mosaic.version = 11 : i64} {
  func.func @_gpt2_block_kernel(%arg0: i32, %arg1: i32, %arg2: memref<1x8x32xf32, #tpu.memory_space<vmem>>, %arg3: memref<1x32xf32, #tpu.memory_space<vmem>>, %arg4: memref<1x32xf32, #tpu.memory_space<vmem>>, %arg5: memref<32x96xbf16, #tpu.memory_space<vmem>>, %arg6: memref<1x96xf32, #tpu.memory_space<vmem>>, %arg7: memref<4x8x32xbf16, #tpu.memory_space<vmem>>, %arg8: memref<1x32xf32, #tpu.memory_space<vmem>>, %arg9: memref<1x32xf32, #tpu.memory_space<vmem>>, %arg10: memref<1x32xf32, #tpu.memory_space<vmem>>, %arg11: memref<32x128xbf16, #tpu.memory_space<vmem>>, %arg12: memref<1x128xf32, #tpu.memory_space<vmem>>, %arg13: memref<128x32xbf16, #tpu.memory_space<vmem>>, %arg14: memref<1x32xf32, #tpu.memory_space<vmem>>, %arg15: memref<1x8x32xf32, #tpu.memory_space<vmem>>, %arg16: memref<4x8x8xbf16, #tpu.memory_space<vmem>>, %arg17: memref<4x8x8xbf16, #tpu.memory_space<vmem>>, %arg18: memref<4x8x8xbf16, #tpu.memory_space<vmem>>) attributes {dimension_semantics = [#tpu.dimension_semantics<parallel>, #tpu.dimension_semantics<arbitrary>], iteration_bounds = array<i64: 2, 1>, scalar_prefetch = 0 : i64, scratch_operands = 3 : i64, tpu.core_type = #tpu.core_type<tc>, window_params = [{transform_indices = @transform_0, window_bounds = array<i64: 1, 8, 32>}, {pipeline_mode = #tpu.pipeline_mode<synchronous>, transform_indices = @transform_1, window_bounds = array<i64: 1, 32>}, {pipeline_mode = #tpu.pipeline_mode<synchronous>, transform_indices = @transform_2, window_bounds = array<i64: 1, 32>}, {pipeline_mode = #tpu.pipeline_mode<synchronous>, transform_indices = @transform_3, window_bounds = array<i64: 32, 96>}, {pipeline_mode = #tpu.pipeline_mode<synchronous>, transform_indices = @transform_4, window_bounds = array<i64: 1, 96>}, {pipeline_mode = #tpu.pipeline_mode<synchronous>, transform_indices = @transform_5, window_bounds = array<i64: 4, 8, 32>}, {pipeline_mode = #tpu.pipeline_mode<synchronous>, transform_indices = @transform_6, window_bounds = array<i64: 1, 32>}, {pipeline_mode = #tpu.pipeline_mode<synchronous>, transform_indices = @transform_7, window_bounds = array<i64: 1, 32>}, {pipeline_mode = #tpu.pipeline_mode<synchronous>, transform_indices = @transform_8, window_bounds = array<i64: 1, 32>}, {pipeline_mode = #tpu.pipeline_mode<synchronous>, transform_indices = @transform_9, window_bounds = array<i64: 32, 128>}, {pipeline_mode = #tpu.pipeline_mode<synchronous>, transform_indices = @transform_10, window_bounds = array<i64: 1, 128>}, {pipeline_mode = #tpu.pipeline_mode<synchronous>, transform_indices = @transform_11, window_bounds = array<i64: 128, 32>}, {pipeline_mode = #tpu.pipeline_mode<synchronous>, transform_indices = @transform_12, window_bounds = array<i64: 1, 32>}, {transform_indices = @transform_13, window_bounds = array<i64: 1, 8, 32>}]} {
    %c8_i32 = arith.constant 8 : i32
    %0 = arith.muli %arg1, %c8_i32 : i32
    %1 = tpu.assume_multiple %0, 8 : i32
    %c0 = arith.constant 0 : index
    %c0_0 = arith.constant 0 : index
    %c0_1 = arith.constant 0 : index
    %2 = vector.load %arg2[%c0, %c0_0, %c0_1] : memref<1x8x32xf32, #tpu.memory_space<vmem>>, vector<1x8x32xf32>
    %3 = vector.shape_cast %2 : vector<1x8x32xf32> to vector<8x32xf32>
    %c0_2 = arith.constant 0 : index
    %c0_3 = arith.constant 0 : index
    %4 = vector.load %arg3[%c0_2, %c0_3] : memref<1x32xf32, #tpu.memory_space<vmem>>, vector<1x32xf32>
    %c0_4 = arith.constant 0 : index
    %c0_5 = arith.constant 0 : index
    %5 = vector.load %arg4[%c0_4, %c0_5] : memref<1x32xf32, #tpu.memory_space<vmem>>, vector<1x32xf32>
    %cst = arith.constant dense<0.000000e+00> : vector<8xf32>
    %6 = vector.multi_reduction <add>, %3, %cst [1] : vector<8x32xf32> to vector<8xf32>
    %7 = vector.shape_cast %6 : vector<8xf32> to vector<8x1xf32>
    %cst_6 = arith.constant 3.200000e+01 : f32
    %8 = vector.broadcast %cst_6 : f32 to vector<8x1xf32>
    %9 = arith.divf %7, %8 : vector<8x1xf32>
    %10 = vector.broadcast %9 : vector<8x1xf32> to vector<8x32xf32>
    %11 = arith.subf %3, %10 : vector<8x32xf32>
    %12 = arith.mulf %11, %11 : vector<8x32xf32>
    %cst_7 = arith.constant dense<0.000000e+00> : vector<8xf32>
    %13 = vector.multi_reduction <add>, %12, %cst_7 [1] : vector<8x32xf32> to vector<8xf32>
    %14 = vector.shape_cast %13 : vector<8xf32> to vector<8x1xf32>
    %cst_8 = arith.constant 3.200000e+01 : f32
    %15 = vector.broadcast %cst_8 : f32 to vector<8x1xf32>
    %16 = arith.divf %14, %15 : vector<8x1xf32>
    %cst_9 = arith.constant 9.99999974E-6 : f32
    %17 = vector.broadcast %cst_9 : f32 to vector<8x1xf32>
    %18 = arith.addf %16, %17 : vector<8x1xf32>
    %19 = math.rsqrt %18 : vector<8x1xf32>
    %20 = vector.broadcast %19 : vector<8x1xf32> to vector<8x32xf32>
    %21 = arith.mulf %11, %20 : vector<8x32xf32>
    %22 = vector.broadcast %4 : vector<1x32xf32> to vector<8x32xf32>
    %23 = arith.mulf %21, %22 : vector<8x32xf32>
    %24 = vector.broadcast %5 : vector<1x32xf32> to vector<8x32xf32>
    %25 = arith.addf %23, %24 : vector<8x32xf32>
    %26 = arith.truncf %25 : vector<8x32xf32> to vector<8x32xbf16>
    %c0_10 = arith.constant 0 : index
    %c0_11 = arith.constant 0 : index
    %27 = vector.load %arg5[%c0_10, %c0_11] : memref<32x96xbf16, #tpu.memory_space<vmem>>, vector<32x96xbf16>
    %cst_12 = arith.constant dense<0.000000e+00> : vector<8x96xf32>
    %28 = tpu.matmul %26, %27, %cst_12 {dimension_numbers = #tpu.dot_dimension_numbers<[1], [0], [0], [1], [0, 0, 1, 1], [], []>} : vector<8x32xbf16>, vector<32x96xbf16>, vector<8x96xf32> -> vector<8x96xf32>
    %c0_13 = arith.constant 0 : index
    %c0_14 = arith.constant 0 : index
    %29 = vector.load %arg6[%c0_13, %c0_14] : memref<1x96xf32, #tpu.memory_space<vmem>>, vector<1x96xf32>
    %30 = vector.broadcast %29 : vector<1x96xf32> to vector<8x96xf32>
    %31 = arith.addf %28, %30 : vector<8x96xf32>
    %32 = vector.extract_strided_slice %31 {offsets = [0, 0], sizes = [8, 32], strides = [1, 1]} : vector<8x96xf32> to vector<8x32xf32>
    %cst_15 = arith.constant 0.353553385 : f32
    %33 = vector.broadcast %cst_15 : f32 to vector<8x32xf32>
    %34 = arith.mulf %32, %33 : vector<8x32xf32>
    %35 = arith.truncf %34 : vector<8x32xf32> to vector<8x32xbf16>
    %36 = vector.extract_strided_slice %31 {offsets = [0, 32], sizes = [8, 32], strides = [1, 1]} : vector<8x96xf32> to vector<8x32xf32>
    %37 = arith.truncf %36 : vector<8x32xf32> to vector<8x32xbf16>
    %38 = vector.extract_strided_slice %31 {offsets = [0, 64], sizes = [8, 32], strides = [1, 1]} : vector<8x96xf32> to vector<8x32xf32>
    %39 = arith.truncf %38 : vector<8x32xf32> to vector<8x32xbf16>
    %40 = vector.extract_strided_slice %35 {offsets = [0, 0], sizes = [8, 8], strides = [1, 1]} : vector<8x32xbf16> to vector<8x8xbf16>
    %c0_16 = arith.constant 0 : index
    %c0_17 = arith.constant 0 : index
    %c0_18 = arith.constant 0 : index
    %41 = vector.load %arg16[%c0_16, %c0_17, %c0_18] : memref<4x8x8xbf16, #tpu.memory_space<vmem>>, vector<1x8x8xbf16>
    %42 = vector.shape_cast %41 : vector<1x8x8xbf16> to vector<8x8xbf16>
    %43 = vector.shape_cast %40 : vector<8x8xbf16> to vector<1x8x8xbf16>
    tpu.vector_store %arg16[%c0_16, %c0_17, %c0_18], %43 {strides = array<i32>} : memref<4x8x8xbf16, #tpu.memory_space<vmem>>, vector<1x8x8xbf16>,
    %44 = vector.extract_strided_slice %37 {offsets = [0, 0], sizes = [8, 8], strides = [1, 1]} : vector<8x32xbf16> to vector<8x8xbf16>
    %c0_19 = arith.constant 0 : index
    %45 = arith.index_cast %1 : i32 to index
    %c0_20 = arith.constant 0 : index
    %46 = vector.load %arg17[%c0_19, %45, %c0_20] : memref<4x8x8xbf16, #tpu.memory_space<vmem>>, vector<1x8x8xbf16>
    %47 = vector.shape_cast %46 : vector<1x8x8xbf16> to vector<8x8xbf16>
    %48 = vector.shape_cast %44 : vector<8x8xbf16> to vector<1x8x8xbf16>
    tpu.vector_store %arg17[%c0_19, %45, %c0_20], %48 {strides = array<i32>} : memref<4x8x8xbf16, #tpu.memory_space<vmem>>, vector<1x8x8xbf16>,
    %49 = vector.extract_strided_slice %39 {offsets = [0, 0], sizes = [8, 8], strides = [1, 1]} : vector<8x32xbf16> to vector<8x8xbf16>
    %c0_21 = arith.constant 0 : index
    %50 = arith.index_cast %1 : i32 to index
    %c0_22 = arith.constant 0 : index
    %51 = vector.load %arg18[%c0_21, %50, %c0_22] : memref<4x8x8xbf16, #tpu.memory_space<vmem>>, vector<1x8x8xbf16>
    %52 = vector.shape_cast %51 : vector<1x8x8xbf16> to vector<8x8xbf16>
    %53 = vector.shape_cast %49 : vector<8x8xbf16> to vector<1x8x8xbf16>
    tpu.vector_store %arg18[%c0_21, %50, %c0_22], %53 {strides = array<i32>} : memref<4x8x8xbf16, #tpu.memory_space<vmem>>, vector<1x8x8xbf16>,
    %54 = vector.extract_strided_slice %35 {offsets = [0, 8], sizes = [8, 8], strides = [1, 1]} : vector<8x32xbf16> to vector<8x8xbf16>
    %c1 = arith.constant 1 : index
    %c0_23 = arith.constant 0 : index
    %c0_24 = arith.constant 0 : index
    %55 = vector.load %arg16[%c1, %c0_23, %c0_24] : memref<4x8x8xbf16, #tpu.memory_space<vmem>>, vector<1x8x8xbf16>
    %56 = vector.shape_cast %55 : vector<1x8x8xbf16> to vector<8x8xbf16>
    %57 = vector.shape_cast %54 : vector<8x8xbf16> to vector<1x8x8xbf16>
    tpu.vector_store %arg16[%c1, %c0_23, %c0_24], %57 {strides = array<i32>} : memref<4x8x8xbf16, #tpu.memory_space<vmem>>, vector<1x8x8xbf16>,
    %58 = vector.extract_strided_slice %37 {offsets = [0, 8], sizes = [8, 8], strides = [1, 1]} : vector<8x32xbf16> to vector<8x8xbf16>
    %c1_25 = arith.constant 1 : index
    %59 = arith.index_cast %1 : i32 to index
    %c0_26 = arith.constant 0 : index
    %60 = vector.load %arg17[%c1_25, %59, %c0_26] : memref<4x8x8xbf16, #tpu.memory_space<vmem>>, vector<1x8x8xbf16>
    %61 = vector.shape_cast %60 : vector<1x8x8xbf16> to vector<8x8xbf16>
    %62 = vector.shape_cast %58 : vector<8x8xbf16> to vector<1x8x8xbf16>
    tpu.vector_store %arg17[%c1_25, %59, %c0_26], %62 {strides = array<i32>} : memref<4x8x8xbf16, #tpu.memory_space<vmem>>, vector<1x8x8xbf16>,
    %63 = vector.extract_strided_slice %39 {offsets = [0, 8], sizes = [8, 8], strides = [1, 1]} : vector<8x32xbf16> to vector<8x8xbf16>
    %c1_27 = arith.constant 1 : index
    %64 = arith.index_cast %1 : i32 to index
    %c0_28 = arith.constant 0 : index
    %65 = vector.load %arg18[%c1_27, %64, %c0_28] : memref<4x8x8xbf16, #tpu.memory_space<vmem>>, vector<1x8x8xbf16>
    %66 = vector.shape_cast %65 : vector<1x8x8xbf16> to vector<8x8xbf16>
    %67 = vector.shape_cast %63 : vector<8x8xbf16> to vector<1x8x8xbf16>
    tpu.vector_store %arg18[%c1_27, %64, %c0_28], %67 {strides = array<i32>} : memref<4x8x8xbf16, #tpu.memory_space<vmem>>, vector<1x8x8xbf16>,
    %68 = vector.extract_strided_slice %35 {offsets = [0, 16], sizes = [8, 8], strides = [1, 1]} : vector<8x32xbf16> to vector<8x8xbf16>
    %c2 = arith.constant 2 : index
    %c0_29 = arith.constant 0 : index
    %c0_30 = arith.constant 0 : index
    %69 = vector.load %arg16[%c2, %c0_29, %c0_30] : memref<4x8x8xbf16, #tpu.memory_space<vmem>>, vector<1x8x8xbf16>
    %70 = vector.shape_cast %69 : vector<1x8x8xbf16> to vector<8x8xbf16>
    %71 = vector.shape_cast %68 : vector<8x8xbf16> to vector<1x8x8xbf16>
    tpu.vector_store %arg16[%c2, %c0_29, %c0_30], %71 {strides = array<i32>} : memref<4x8x8xbf16, #tpu.memory_space<vmem>>, vector<1x8x8xbf16>,
    %72 = vector.extract_strided_slice %37 {offsets = [0, 16], sizes = [8, 8], strides = [1, 1]} : vector<8x32xbf16> to vector<8x8xbf16>
    %c2_31 = arith.constant 2 : index
    %73 = arith.index_cast %1 : i32 to index
    %c0_32 = arith.constant 0 : index
    %74 = vector.load %arg17[%c2_31, %73, %c0_32] : memref<4x8x8xbf16, #tpu.memory_space<vmem>>, vector<1x8x8xbf16>
    %75 = vector.shape_cast %74 : vector<1x8x8xbf16> to vector<8x8xbf16>
    %76 = vector.shape_cast %72 : vector<8x8xbf16> to vector<1x8x8xbf16>
    tpu.vector_store %arg17[%c2_31, %73, %c0_32], %76 {strides = array<i32>} : memref<4x8x8xbf16, #tpu.memory_space<vmem>>, vector<1x8x8xbf16>,
    %77 = vector.extract_strided_slice %39 {offsets = [0, 16], sizes = [8, 8], strides = [1, 1]} : vector<8x32xbf16> to vector<8x8xbf16>
    %c2_33 = arith.constant 2 : index
    %78 = arith.index_cast %1 : i32 to index
    %c0_34 = arith.constant 0 : index
    %79 = vector.load %arg18[%c2_33, %78, %c0_34] : memref<4x8x8xbf16, #tpu.memory_space<vmem>>, vector<1x8x8xbf16>
    %80 = vector.shape_cast %79 : vector<1x8x8xbf16> to vector<8x8xbf16>
    %81 = vector.shape_cast %77 : vector<8x8xbf16> to vector<1x8x8xbf16>
    tpu.vector_store %arg18[%c2_33, %78, %c0_34], %81 {strides = array<i32>} : memref<4x8x8xbf16, #tpu.memory_space<vmem>>, vector<1x8x8xbf16>,
    %82 = vector.extract_strided_slice %35 {offsets = [0, 24], sizes = [8, 8], strides = [1, 1]} : vector<8x32xbf16> to vector<8x8xbf16>
    %c3 = arith.constant 3 : index
    %c0_35 = arith.constant 0 : index
    %c0_36 = arith.constant 0 : index
    %83 = vector.load %arg16[%c3, %c0_35, %c0_36] : memref<4x8x8xbf16, #tpu.memory_space<vmem>>, vector<1x8x8xbf16>
    %84 = vector.shape_cast %83 : vector<1x8x8xbf16> to vector<8x8xbf16>
    %85 = vector.shape_cast %82 : vector<8x8xbf16> to vector<1x8x8xbf16>
    tpu.vector_store %arg16[%c3, %c0_35, %c0_36], %85 {strides = array<i32>} : memref<4x8x8xbf16, #tpu.memory_space<vmem>>, vector<1x8x8xbf16>,
    %86 = vector.extract_strided_slice %37 {offsets = [0, 24], sizes = [8, 8], strides = [1, 1]} : vector<8x32xbf16> to vector<8x8xbf16>
    %c3_37 = arith.constant 3 : index
    %87 = arith.index_cast %1 : i32 to index
    %c0_38 = arith.constant 0 : index
    %88 = vector.load %arg17[%c3_37, %87, %c0_38] : memref<4x8x8xbf16, #tpu.memory_space<vmem>>, vector<1x8x8xbf16>
    %89 = vector.shape_cast %88 : vector<1x8x8xbf16> to vector<8x8xbf16>
    %90 = vector.shape_cast %86 : vector<8x8xbf16> to vector<1x8x8xbf16>
    tpu.vector_store %arg17[%c3_37, %87, %c0_38], %90 {strides = array<i32>} : memref<4x8x8xbf16, #tpu.memory_space<vmem>>, vector<1x8x8xbf16>,
    %91 = vector.extract_strided_slice %39 {offsets = [0, 24], sizes = [8, 8], strides = [1, 1]} : vector<8x32xbf16> to vector<8x8xbf16>
    %c3_39 = arith.constant 3 : index
    %92 = arith.index_cast %1 : i32 to index
    %c0_40 = arith.constant 0 : index
    %93 = vector.load %arg18[%c3_39, %92, %c0_40] : memref<4x8x8xbf16, #tpu.memory_space<vmem>>, vector<1x8x8xbf16>
    %94 = vector.shape_cast %93 : vector<1x8x8xbf16> to vector<8x8xbf16>
    %95 = vector.shape_cast %91 : vector<8x8xbf16> to vector<1x8x8xbf16>
    tpu.vector_store %arg18[%c3_39, %92, %c0_40], %95 {strides = array<i32>} : memref<4x8x8xbf16, #tpu.memory_space<vmem>>, vector<1x8x8xbf16>,
    %c0_41 = arith.constant 0 : index
    %c0_42 = arith.constant 0 : index
    %c0_43 = arith.constant 0 : index
    %96 = vector.load %arg16[%c0_41, %c0_42, %c0_43] : memref<4x8x8xbf16, #tpu.memory_space<vmem>>, vector<4x8x8xbf16>
    %cst_44 = arith.constant 0xFF800000 : f32
    %97 = vector.broadcast %cst_44 : f32 to vector<4x8x1xf32>
    %cst_45 = arith.constant 0.000000e+00 : f32
    %98 = vector.broadcast %cst_45 : f32 to vector<4x8x1xf32>
    %cst_46 = arith.constant 0.000000e+00 : f32
    %99 = vector.broadcast %cst_46 : f32 to vector<4x8x8xf32>
    %c0_i32 = arith.constant 0 : i32
    %100 = arith.subi %arg1, %c0_i32 : i32
    %101 = arith.addi %c0_i32, %100 : i32
    %c1_i32 = arith.constant 1 : i32
    %102:3 = scf.for %arg19 = %c0_i32 to %101 step %c1_i32 iter_args(%arg20 = %97, %arg21 = %98, %arg22 = %99) -> (vector<4x8x1xf32>, vector<4x8x1xf32>, vector<4x8x8xf32>)  : i32 {
      %c8_i32_102 = arith.constant 8 : i32
      %218 = arith.muli %arg19, %c8_i32_102 : i32
      %219 = tpu.assume_multiple %218, 8 : i32
      %c0_103 = arith.constant 0 : index
      %220 = arith.index_cast %219 : i32 to index
      %c0_104 = arith.constant 0 : index
      %221 = vector.load %arg17[%c0_103, %220, %c0_104] : memref<4x8x8xbf16, #tpu.memory_space<vmem>>, vector<4x8x8xbf16>
      %c0_105 = arith.constant 0 : index
      %222 = arith.index_cast %219 : i32 to index
      %c0_106 = arith.constant 0 : index
      %223 = vector.load %arg18[%c0_105, %222, %c0_106] : memref<4x8x8xbf16, #tpu.memory_space<vmem>>, vector<4x8x8xbf16>
      "tpu.trace_start"() <{level = 10 : i32, message = "hqd,hkd->hqk"}> : () -> ()
      %cst_107 = arith.constant dense<0.000000e+00> : vector<4x8x8xf32>
      %224 = tpu.matmul %96, %221, %cst_107 {dimension_numbers = #tpu.dot_dimension_numbers<[2], [2], [1], [1], [0, 0, 0, 1, 1, 1], [0], [0]>} : vector<4x8x8xbf16>, vector<4x8x8xbf16>, vector<4x8x8xf32> -> vector<4x8x8xf32>
      "tpu.trace_stop"() : () -> ()
      %cst_108 = arith.constant dense<0xFF800000> : vector<4x8xf32>
      %225 = vector.multi_reduction <maximumf>, %224, %cst_108 [2] : vector<4x8x8xf32> to vector<4x8xf32>
      %226 = vector.shape_cast %225 : vector<4x8xf32> to vector<4x8x1xf32>
      %227 = arith.maximumf %arg20, %226 : vector<4x8x1xf32>
      %228 = arith.subf %arg20, %227 : vector<4x8x1xf32>
      %229 = math.exp %228 : vector<4x8x1xf32>
      %230 = vector.broadcast %227 : vector<4x8x1xf32> to vector<4x8x8xf32>
      %231 = arith.subf %224, %230 : vector<4x8x8xf32>
      %232 = math.exp %231 : vector<4x8x8xf32>
      %233 = arith.mulf %229, %arg21 : vector<4x8x1xf32>
      %cst_109 = arith.constant dense<0.000000e+00> : vector<4x8xf32>
      %234 = vector.multi_reduction <add>, %232, %cst_109 [2] : vector<4x8x8xf32> to vector<4x8xf32>
      %235 = vector.shape_cast %234 : vector<4x8xf32> to vector<4x8x1xf32>
      %236 = arith.addf %233, %235 : vector<4x8x1xf32>
      %237 = vector.broadcast %229 : vector<4x8x1xf32> to vector<4x8x8xf32>
      %238 = arith.mulf %237, %arg22 : vector<4x8x8xf32>
      %239 = arith.truncf %232 : vector<4x8x8xf32> to vector<4x8x8xbf16>
      "tpu.trace_start"() <{level = 10 : i32, message = "hqk,hkd->hqd"}> : () -> ()
      %cst_110 = arith.constant dense<0.000000e+00> : vector<4x8x8xf32>
      %240 = tpu.matmul %239, %223, %cst_110 {dimension_numbers = #tpu.dot_dimension_numbers<[2], [1], [1], [2], [0, 0, 0, 1, 1, 2], [0], [0]>} : vector<4x8x8xbf16>, vector<4x8x8xbf16>, vector<4x8x8xf32> -> vector<4x8x8xf32>
      "tpu.trace_stop"() : () -> ()
      %241 = arith.addf %238, %240 : vector<4x8x8xf32>
      scf.yield %227, %236, %241 : vector<4x8x1xf32>, vector<4x8x1xf32>, vector<4x8x8xf32>
    }
    %103 = tpu.iota {dimensions = array<i32: 1>} : vector<1x8x8xi32>
    %104 = tpu.iota {dimensions = array<i32: 2>} : vector<1x8x8xi32>
    %105 = arith.cmpi sle, %104, %103 : vector<1x8x8xi32>
    %c8_i32_47 = arith.constant 8 : i32
    %106 = arith.muli %arg1, %c8_i32_47 : i32
    %107 = tpu.assume_multiple %106, 8 : i32
    %c0_48 = arith.constant 0 : index
    %108 = arith.index_cast %107 : i32 to index
    %c0_49 = arith.constant 0 : index
    %109 = vector.load %arg17[%c0_48, %108, %c0_49] : memref<4x8x8xbf16, #tpu.memory_space<vmem>>, vector<4x8x8xbf16>
    %c0_50 = arith.constant 0 : index
    %110 = arith.index_cast %107 : i32 to index
    %c0_51 = arith.constant 0 : index
    %111 = vector.load %arg18[%c0_50, %110, %c0_51] : memref<4x8x8xbf16, #tpu.memory_space<vmem>>, vector<4x8x8xbf16>
    "tpu.trace_start"() <{level = 10 : i32, message = "hqd,hkd->hqk"}> : () -> ()
    %cst_52 = arith.constant dense<0.000000e+00> : vector<4x8x8xf32>
    %112 = tpu.matmul %96, %109, %cst_52 {dimension_numbers = #tpu.dot_dimension_numbers<[2], [2], [1], [1], [0, 0, 0, 1, 1, 1], [0], [0]>} : vector<4x8x8xbf16>, vector<4x8x8xbf16>, vector<4x8x8xf32> -> vector<4x8x8xf32>
    %cst_53 = arith.constant -1.000000e+30 : f32
    "tpu.trace_stop"() : () -> ()
    %113 = vector.shape_cast %105 : vector<1x8x8xi1> to vector<1x8x8xi1>
    %114 = vector.broadcast %113 : vector<1x8x8xi1> to vector<4x8x8xi1>
    %115 = vector.broadcast %cst_53 : f32 to vector<4x8x8xf32>
    %116 = arith.select %114, %112, %115 : vector<4x8x8xi1>, vector<4x8x8xf32>
    %cst_54 = arith.constant dense<0xFF800000> : vector<4x8xf32>
    %117 = vector.multi_reduction <maximumf>, %116, %cst_54 [2] : vector<4x8x8xf32> to vector<4x8xf32>
    %118 = vector.shape_cast %117 : vector<4x8xf32> to vector<4x8x1xf32>
    %119 = arith.maximumf %102#0, %118 : vector<4x8x1xf32>
    %120 = arith.subf %102#0, %119 : vector<4x8x1xf32>
    %121 = math.exp %120 : vector<4x8x1xf32>
    %122 = vector.broadcast %119 : vector<4x8x1xf32> to vector<4x8x8xf32>
    %123 = arith.subf %116, %122 : vector<4x8x8xf32>
    %124 = math.exp %123 : vector<4x8x8xf32>
    %125 = arith.mulf %121, %102#1 : vector<4x8x1xf32>
    %cst_55 = arith.constant dense<0.000000e+00> : vector<4x8xf32>
    %126 = vector.multi_reduction <add>, %124, %cst_55 [2] : vector<4x8x8xf32> to vector<4x8xf32>
    %127 = vector.shape_cast %126 : vector<4x8xf32> to vector<4x8x1xf32>
    %128 = arith.addf %125, %127 : vector<4x8x1xf32>
    %129 = vector.broadcast %121 : vector<4x8x1xf32> to vector<4x8x8xf32>
    %130 = arith.mulf %129, %102#2 : vector<4x8x8xf32>
    %131 = arith.truncf %124 : vector<4x8x8xf32> to vector<4x8x8xbf16>
    "tpu.trace_start"() <{level = 10 : i32, message = "hqk,hkd->hqd"}> : () -> ()
    %cst_56 = arith.constant dense<0.000000e+00> : vector<4x8x8xf32>
    %132 = tpu.matmul %131, %111, %cst_56 {dimension_numbers = #tpu.dot_dimension_numbers<[2], [1], [1], [2], [0, 0, 0, 1, 1, 2], [0], [0]>} : vector<4x8x8xbf16>, vector<4x8x8xbf16>, vector<4x8x8xf32> -> vector<4x8x8xf32>
    "tpu.trace_stop"() : () -> ()
    %133 = arith.addf %130, %132 : vector<4x8x8xf32>
    %134 = tpu.reciprocal %128 {approx = true} : vector<4x8x1xf32> -> vector<4x8x1xf32>
    %135 = vector.broadcast %134 : vector<4x8x1xf32> to vector<4x8x8xf32>
    %136 = arith.mulf %133, %135 : vector<4x8x8xf32>
    %137 = arith.truncf %136 : vector<4x8x8xf32> to vector<4x8x8xbf16>
    %cst_57 = arith.constant 0.000000e+00 : f32
    %138 = vector.broadcast %cst_57 : f32 to vector<8x32xf32>
    %139 = vector.extract_strided_slice %137 {offsets = [0, 0, 0], sizes = [1, 8, 8], strides = [1, 1, 1]} : vector<4x8x8xbf16> to vector<1x8x8xbf16>
    %140 = vector.shape_cast %139 : vector<1x8x8xbf16> to vector<8x8xbf16>
    %c0_58 = arith.constant 0 : index
    %c0_59 = arith.constant 0 : index
    %c0_60 = arith.constant 0 : index
    %141 = vector.load %arg7[%c0_58, %c0_59, %c0_60] : memref<4x8x32xbf16, #tpu.memory_space<vmem>>, vector<1x8x32xbf16>
    %142 = vector.shape_cast %141 : vector<1x8x32xbf16> to vector<8x32xbf16>
    %cst_61 = arith.constant dense<0.000000e+00> : vector<8x32xf32>
    %143 = tpu.matmul %140, %142, %cst_61 {dimension_numbers = #tpu.dot_dimension_numbers<[1], [0], [0], [1], [0, 0, 1, 1], [], []>} : vector<8x8xbf16>, vector<8x32xbf16>, vector<8x32xf32> -> vector<8x32xf32>
    %144 = arith.addf %138, %143 : vector<8x32xf32>
    %145 = vector.extract_strided_slice %137 {offsets = [1, 0, 0], sizes = [1, 8, 8], strides = [1, 1, 1]} : vector<4x8x8xbf16> to vector<1x8x8xbf16>
    %146 = vector.shape_cast %145 : vector<1x8x8xbf16> to vector<8x8xbf16>
    %c1_62 = arith.constant 1 : index
    %c0_63 = arith.constant 0 : index
    %c0_64 = arith.constant 0 : index
    %147 = vector.load %arg7[%c1_62, %c0_63, %c0_64] : memref<4x8x32xbf16, #tpu.memory_space<vmem>>, vector<1x8x32xbf16>
    %148 = vector.shape_cast %147 : vector<1x8x32xbf16> to vector<8x32xbf16>
    %cst_65 = arith.constant dense<0.000000e+00> : vector<8x32xf32>
    %149 = tpu.matmul %146, %148, %cst_65 {dimension_numbers = #tpu.dot_dimension_numbers<[1], [0], [0], [1], [0, 0, 1, 1], [], []>} : vector<8x8xbf16>, vector<8x32xbf16>, vector<8x32xf32> -> vector<8x32xf32>
    %150 = arith.addf %144, %149 : vector<8x32xf32>
    %151 = vector.extract_strided_slice %137 {offsets = [2, 0, 0], sizes = [1, 8, 8], strides = [1, 1, 1]} : vector<4x8x8xbf16> to vector<1x8x8xbf16>
    %152 = vector.shape_cast %151 : vector<1x8x8xbf16> to vector<8x8xbf16>
    %c2_66 = arith.constant 2 : index
    %c0_67 = arith.constant 0 : index
    %c0_68 = arith.constant 0 : index
    %153 = vector.load %arg7[%c2_66, %c0_67, %c0_68] : memref<4x8x32xbf16, #tpu.memory_space<vmem>>, vector<1x8x32xbf16>
    %154 = vector.shape_cast %153 : vector<1x8x32xbf16> to vector<8x32xbf16>
    %cst_69 = arith.constant dense<0.000000e+00> : vector<8x32xf32>
    %155 = tpu.matmul %152, %154, %cst_69 {dimension_numbers = #tpu.dot_dimension_numbers<[1], [0], [0], [1], [0, 0, 1, 1], [], []>} : vector<8x8xbf16>, vector<8x32xbf16>, vector<8x32xf32> -> vector<8x32xf32>
    %156 = arith.addf %150, %155 : vector<8x32xf32>
    %157 = vector.extract_strided_slice %137 {offsets = [3, 0, 0], sizes = [1, 8, 8], strides = [1, 1, 1]} : vector<4x8x8xbf16> to vector<1x8x8xbf16>
    %158 = vector.shape_cast %157 : vector<1x8x8xbf16> to vector<8x8xbf16>
    %c3_70 = arith.constant 3 : index
    %c0_71 = arith.constant 0 : index
    %c0_72 = arith.constant 0 : index
    %159 = vector.load %arg7[%c3_70, %c0_71, %c0_72] : memref<4x8x32xbf16, #tpu.memory_space<vmem>>, vector<1x8x32xbf16>
    %160 = vector.shape_cast %159 : vector<1x8x32xbf16> to vector<8x32xbf16>
    %cst_73 = arith.constant dense<0.000000e+00> : vector<8x32xf32>
    %161 = tpu.matmul %158, %160, %cst_73 {dimension_numbers = #tpu.dot_dimension_numbers<[1], [0], [0], [1], [0, 0, 1, 1], [], []>} : vector<8x8xbf16>, vector<8x32xbf16>, vector<8x32xf32> -> vector<8x32xf32>
    %162 = arith.addf %156, %161 : vector<8x32xf32>
    %c0_74 = arith.constant 0 : index
    %c0_75 = arith.constant 0 : index
    %163 = vector.load %arg8[%c0_74, %c0_75] : memref<1x32xf32, #tpu.memory_space<vmem>>, vector<1x32xf32>
    %164 = vector.broadcast %163 : vector<1x32xf32> to vector<8x32xf32>
    %165 = arith.addf %162, %164 : vector<8x32xf32>
    %166 = arith.addf %3, %165 : vector<8x32xf32>
    %c0_76 = arith.constant 0 : index
    %c0_77 = arith.constant 0 : index
    %167 = vector.load %arg9[%c0_76, %c0_77] : memref<1x32xf32, #tpu.memory_space<vmem>>, vector<1x32xf32>
    %c0_78 = arith.constant 0 : index
    %c0_79 = arith.constant 0 : index
    %168 = vector.load %arg10[%c0_78, %c0_79] : memref<1x32xf32, #tpu.memory_space<vmem>>, vector<1x32xf32>
    %cst_80 = arith.constant dense<0.000000e+00> : vector<8xf32>
    %169 = vector.multi_reduction <add>, %166, %cst_80 [1] : vector<8x32xf32> to vector<8xf32>
    %170 = vector.shape_cast %169 : vector<8xf32> to vector<8x1xf32>
    %cst_81 = arith.constant 3.200000e+01 : f32
    %171 = vector.broadcast %cst_81 : f32 to vector<8x1xf32>
    %172 = arith.divf %170, %171 : vector<8x1xf32>
    %173 = vector.broadcast %172 : vector<8x1xf32> to vector<8x32xf32>
    %174 = arith.subf %166, %173 : vector<8x32xf32>
    %175 = arith.mulf %174, %174 : vector<8x32xf32>
    %cst_82 = arith.constant dense<0.000000e+00> : vector<8xf32>
    %176 = vector.multi_reduction <add>, %175, %cst_82 [1] : vector<8x32xf32> to vector<8xf32>
    %177 = vector.shape_cast %176 : vector<8xf32> to vector<8x1xf32>
    %cst_83 = arith.constant 3.200000e+01 : f32
    %178 = vector.broadcast %cst_83 : f32 to vector<8x1xf32>
    %179 = arith.divf %177, %178 : vector<8x1xf32>
    %cst_84 = arith.constant 9.99999974E-6 : f32
    %180 = vector.broadcast %cst_84 : f32 to vector<8x1xf32>
    %181 = arith.addf %179, %180 : vector<8x1xf32>
    %182 = math.rsqrt %181 : vector<8x1xf32>
    %183 = vector.broadcast %182 : vector<8x1xf32> to vector<8x32xf32>
    %184 = arith.mulf %174, %183 : vector<8x32xf32>
    %185 = vector.broadcast %167 : vector<1x32xf32> to vector<8x32xf32>
    %186 = arith.mulf %184, %185 : vector<8x32xf32>
    %187 = vector.broadcast %168 : vector<1x32xf32> to vector<8x32xf32>
    %188 = arith.addf %186, %187 : vector<8x32xf32>
    %189 = arith.truncf %188 : vector<8x32xf32> to vector<8x32xbf16>
    %c0_85 = arith.constant 0 : index
    %c0_86 = arith.constant 0 : index
    %190 = vector.load %arg11[%c0_85, %c0_86] : memref<32x128xbf16, #tpu.memory_space<vmem>>, vector<32x128xbf16>
    %cst_87 = arith.constant dense<0.000000e+00> : vector<8x128xf32>
    %191 = tpu.matmul %189, %190, %cst_87 {dimension_numbers = #tpu.dot_dimension_numbers<[1], [0], [0], [1], [0, 0, 1, 1], [], []>} : vector<8x32xbf16>, vector<32x128xbf16>, vector<8x128xf32> -> vector<8x128xf32>
    %c0_88 = arith.constant 0 : index
    %c0_89 = arith.constant 0 : index
    %192 = vector.load %arg12[%c0_88, %c0_89] : memref<1x128xf32, #tpu.memory_space<vmem>>, vector<1x128xf32>
    %193 = vector.broadcast %192 : vector<1x128xf32> to vector<8x128xf32>
    %194 = arith.addf %191, %193 : vector<8x128xf32>
    %cst_90 = arith.constant 5.000000e-01 : f32
    %195 = vector.broadcast %cst_90 : f32 to vector<8x128xf32>
    %196 = arith.mulf %195, %194 : vector<8x128xf32>
    %cst_91 = arith.constant 4.471500e-02 : f32
    %197 = vector.broadcast %cst_91 : f32 to vector<8x128xf32>
    %198 = arith.mulf %197, %194 : vector<8x128xf32>
    %199 = arith.mulf %198, %194 : vector<8x128xf32>
    %200 = arith.mulf %199, %194 : vector<8x128xf32>
    %201 = arith.addf %194, %200 : vector<8x128xf32>
    %cst_92 = arith.constant 0.797884583 : f32
    %202 = vector.broadcast %cst_92 : f32 to vector<8x128xf32>
    %203 = arith.mulf %202, %201 : vector<8x128xf32>
    %204 = math.tanh %203 : vector<8x128xf32>
    %cst_93 = arith.constant 1.000000e+00 : f32
    %205 = vector.broadcast %cst_93 : f32 to vector<8x128xf32>
    %206 = arith.addf %205, %204 : vector<8x128xf32>
    %207 = arith.mulf %196, %206 : vector<8x128xf32>
    %208 = arith.truncf %207 : vector<8x128xf32> to vector<8x128xbf16>
    %c0_94 = arith.constant 0 : index
    %c0_95 = arith.constant 0 : index
    %209 = vector.load %arg13[%c0_94, %c0_95] : memref<128x32xbf16, #tpu.memory_space<vmem>>, vector<128x32xbf16>
    %cst_96 = arith.constant dense<0.000000e+00> : vector<8x32xf32>
    %210 = tpu.matmul %208, %209, %cst_96 {dimension_numbers = #tpu.dot_dimension_numbers<[1], [0], [0], [1], [0, 0, 1, 1], [], []>} : vector<8x128xbf16>, vector<128x32xbf16>, vector<8x32xf32> -> vector<8x32xf32>
    %c0_97 = arith.constant 0 : index
    %c0_98 = arith.constant 0 : index
    %211 = vector.load %arg14[%c0_97, %c0_98] : memref<1x32xf32, #tpu.memory_space<vmem>>, vector<1x32xf32>
    %212 = vector.broadcast %211 : vector<1x32xf32> to vector<8x32xf32>
    %213 = arith.addf %210, %212 : vector<8x32xf32>
    %214 = arith.addf %166, %213 : vector<8x32xf32>
    %c0_99 = arith.constant 0 : index
    %c0_100 = arith.constant 0 : index
    %c0_101 = arith.constant 0 : index
    %215 = vector.load %arg15[%c0_99, %c0_100, %c0_101] : memref<1x8x32xf32, #tpu.memory_space<vmem>>, vector<1x8x32xf32>
    %216 = vector.shape_cast %215 : vector<1x8x32xf32> to vector<8x32xf32>
    %217 = vector.shape_cast %214 : vector<8x32xf32> to vector<1x8x32xf32>
    tpu.vector_store %arg15[%c0_99, %c0_100, %c0_101], %217 {strides = array<i32>} : memref<1x8x32xf32, #tpu.memory_space<vmem>>, vector<1x8x32xf32>,
    return
  }
  func.func @transform_0(%arg0: i32, %arg1: i32) -> (i32, i32, i32) {
    %c0_i32 = arith.constant 0 : i32
    %c0_i32_0 = arith.constant 0 : i32
    return %arg0, %arg1, %c0_i32 : i32, i32, i32
  }
  func.func @transform_1(%arg0: i32, %arg1: i32) -> (i32, i32) {
    %c0_i32 = arith.constant 0 : i32
    %c0_i32_0 = arith.constant 0 : i32
    %c0_i32_1 = arith.constant 0 : i32
    return %c0_i32, %c0_i32_0 : i32, i32
  }
  func.func @transform_2(%arg0: i32, %arg1: i32) -> (i32, i32) {
    %c0_i32 = arith.constant 0 : i32
    %c0_i32_0 = arith.constant 0 : i32
    %c0_i32_1 = arith.constant 0 : i32
    return %c0_i32, %c0_i32_0 : i32, i32
  }
  func.func @transform_3(%arg0: i32, %arg1: i32) -> (i32, i32) {
    %c0_i32 = arith.constant 0 : i32
    %c0_i32_0 = arith.constant 0 : i32
    %c0_i32_1 = arith.constant 0 : i32
    return %c0_i32, %c0_i32_0 : i32, i32
  }
  func.func @transform_4(%arg0: i32, %arg1: i32) -> (i32, i32) {
    %c0_i32 = arith.constant 0 : i32
    %c0_i32_0 = arith.constant 0 : i32
    %c0_i32_1 = arith.constant 0 : i32
    return %c0_i32, %c0_i32_0 : i32, i32
  }
  func.func @transform_5(%arg0: i32, %arg1: i32) -> (i32, i32, i32) {
    %c0_i32 = arith.constant 0 : i32
    %c0_i32_0 = arith.constant 0 : i32
    %c0_i32_1 = arith.constant 0 : i32
    %c0_i32_2 = arith.constant 0 : i32
    return %c0_i32, %c0_i32_0, %c0_i32_1 : i32, i32, i32
  }
  func.func @transform_6(%arg0: i32, %arg1: i32) -> (i32, i32) {
    %c0_i32 = arith.constant 0 : i32
    %c0_i32_0 = arith.constant 0 : i32
    %c0_i32_1 = arith.constant 0 : i32
    return %c0_i32, %c0_i32_0 : i32, i32
  }
  func.func @transform_7(%arg0: i32, %arg1: i32) -> (i32, i32) {
    %c0_i32 = arith.constant 0 : i32
    %c0_i32_0 = arith.constant 0 : i32
    %c0_i32_1 = arith.constant 0 : i32
    return %c0_i32, %c0_i32_0 : i32, i32
  }
  func.func @transform_8(%arg0: i32, %arg1: i32) -> (i32, i32) {
    %c0_i32 = arith.constant 0 : i32
    %c0_i32_0 = arith.constant 0 : i32
    %c0_i32_1 = arith.constant 0 : i32
    return %c0_i32, %c0_i32_0 : i32, i32
  }
  func.func @transform_9(%arg0: i32, %arg1: i32) -> (i32, i32) {
    %c0_i32 = arith.constant 0 : i32
    %c0_i32_0 = arith.constant 0 : i32
    %c0_i32_1 = arith.constant 0 : i32
    return %c0_i32, %c0_i32_0 : i32, i32
  }
  func.func @transform_10(%arg0: i32, %arg1: i32) -> (i32, i32) {
    %c0_i32 = arith.constant 0 : i32
    %c0_i32_0 = arith.constant 0 : i32
    %c0_i32_1 = arith.constant 0 : i32
    return %c0_i32, %c0_i32_0 : i32, i32
  }
  func.func @transform_11(%arg0: i32, %arg1: i32) -> (i32, i32) {
    %c0_i32 = arith.constant 0 : i32
    %c0_i32_0 = arith.constant 0 : i32
    %c0_i32_1 = arith.constant 0 : i32
    return %c0_i32, %c0_i32_0 : i32, i32
  }
  func.func @transform_12(%arg0: i32, %arg1: i32) -> (i32, i32) {
    %c0_i32 = arith.constant 0 : i32
    %c0_i32_0 = arith.constant 0 : i32
    %c0_i32_1 = arith.constant 0 : i32
    return %c0_i32, %c0_i32_0 : i32, i32
  }
  func.func @transform_13(%arg0: i32, %arg1: i32) -> (i32, i32, i32) {
    %c0_i32 = arith.constant 0 : i32
    %c0_i32_0 = arith.constant 0 : i32
    return %arg0, %arg1, %c0_i32 : i32, i32, i32
  }
}

</mosaic_0001>

<bundles_post_ra>
// kernel: tpu_custom_call.1
= control target key start
LH: loop header
LB: loop body
LE: loop exit
PB: predicated region body
PF: predicated region fallthrough
CT: control target
= control target key end

     0   :  { %s2986_s0 = inlined_call_operand.vmem [shape: f32[2,8,32], index: 0, kind: input, shape index: {}]   ;;  %s2987_s1 = inlined_call_operand.vmem [shape: f32[1,32], index: 1, kind: input, shape index: {}]   ;;  %s2988_s2 = inlined_call_operand.vmem [shape: f32[1,32], index: 2, kind: input, shape index: {}]   ;;  %s2989_s3 = inlined_call_operand.vmem [shape: bf16[32,96], index: 3, kind: input, shape index: {}]   ;;  %s2990_s4 = inlined_call_operand.vmem [shape: f32[1,96], index: 4, kind: input, shape index: {}]   ;;  %s2991_s5 = inlined_call_operand.vmem [shape: bf16[4,8,32], index: 5, kind: input, shape index: {}]   ;;  %s2992_s6 = inlined_call_operand.vmem [shape: f32[1,32], index: 6, kind: input, shape index: {}]   ;;  %s2993_s7 = inlined_call_operand.vmem [shape: f32[1,32], index: 7, kind: input, shape index: {}]   ;;  %s2994_s8 = inlined_call_operand.vmem [shape: f32[1,32], index: 8, kind: input, shape index: {}]   ;;  %s2995_s9 = inlined_call_operand.vmem [shape: bf16[32,128], index: 9, kind: input, shape index: {}]   ;;  %s2996_s10 = inlined_call_operand.vmem [shape: f32[1,128], index: 10, kind: input, shape index: {}]   ;;  %s2997_s11 = inlined_call_operand.vmem [shape: bf16[128,32], index: 11, kind: input, shape index: {}]   ;;  %s2998_s12 = inlined_call_operand.vmem [shape: f32[1,32], index: 12, kind: input, shape index: {}]   ;;  %s2999_s13 = inlined_call_operand.hbm [shape: f32[2,8,32], index: 13, kind: output, shape index: {}]  }
   0x1   :  { %3000 = sst [smem:[#allocation8_spill]] %s2986_s0 }
   0x2   :  { %3001 = sst [smem:[#allocation9_spill]] %s2987_s1 }
   0x3   :  { %3002 = sst [smem:[#allocation10_spill]] %s2988_s2 }
   0x4   :  { %3003 = sst [smem:[#allocation11_spill]] %s2989_s3 }
   0x5   :  { %18 = vsyncpa [#allocation6], 0 }
   0x6   :  { %20 = vsyncpa [#allocation6 + $0x1], 0  ;;  %s2657_s25 = smov 0   ;;  %s2659_s26 = smov 0  }
   0x7   :  { %s2661_s27 = smov 0   ;;  %s2663_s28 = smov 0  }
   0x8   :  { %s2665_s29 = smov 0   ;;  %s2667_s30 = smov 0  }
   0x9 LB: > { %s2167_s14 = sadd.s32 4294967295, %s2571_s30   ;;  %s2168_s15 = sadd.s32 4294967294, %s2571_s30   ;;  %s2571_s30 = sphi %s2667_s30, %s26_s30   ;;  %s2567_s29 = sphi %s2665_s29, %s3014_s29   ;;  %s2563_s28 = sphi %s2663_s28, %s3013_s28   ;;  %s2559_s27 = sphi %s2661_s27, %s3012_s27   ;;  %s2555_s26 = sphi %s2659_s26, %s3011_s26   ;;  %s2551_s25 = sphi %s2657_s25, %s3010_s25  }
   0xa   : > { %s38_s16 = sadd.s32 1, %s2567_s29  ;;  %s327_s17 = sadd.s32 1, %s2559_s27 }
   0xb   : > { %p40_p0 = scmp.ge.s32.totalorder %s38_s16, 2  ;;  %p337_p1 = scmp.ne.s32.totalorder %s2559_s27, %s2555_s26 }
   0xc   : > { %p338_p2 = scmp.eq.s32.totalorder %s2167_s14, 1  ;;  %p343_p3 = scmp.ne.s32.totalorder %s2555_s26, %s2551_s25 }
   0xd   : > { %s3016_s16 = smov (%p40_p0, %s38_s16), 0  ;;  %p344_p5 = scmp.eq.s32.totalorder %s2168_s15, 1 }
   0xe   : > { %p2697_p4 = por %p338_p2, %p337_p1  ;;  %s322_s19 = ssub.s32 %s2567_s29, %s3016_s16 }
   0xf   : > { %p2171_p6 = scmp.ge.s32.totalorder %s2571_s30, 1  ;;  %p325_p7 = scmp.eq.s32.totalorder %s322_s19, 0 }
  0x10   : > { %p2704_p8 = por %p344_p5, %p343_p3  ;;  %p408_p9 = scmp.lt.s32.totalorder %s2571_s30, 3 }
  0x11   : > { %s2710_s21 = scalar_select %p325_p7, %s2559_s27, %s327_s17  }
  0x12   : > { %p409_p10 = pnand %p2171_p6, %p408_p9 }
  0x13   : > { %p454_p11 = scmp.lt.s32.totalorder (!%p409_p10), %s2563_s28, 1  ;;  %vm466_vm0 = vcmask (!%p409_p10), 261120   ;;  %s3006_s0 = sld [smem:[#allocation8_spill]] (!%p409_p10)  ;;  %v2573_v8 = vmov (!%p409_p10), 0.0   ;;  %vm2574_vm1 = vmmov (!%p409_p10), 0   ;;  %vm565_vm2 = vcmask (!%p409_p10), 60416  }
  0x14   : > { %412 = sbr.rel (%p409_p10) target bundleno = 2344 (0x928), region = 72  ;;  %s3007_s3 = sld [smem:[#allocation11_spill]] (!%p409_p10)  ;;  %2275 = vmatprep.subr.bf16.mxu1 (!%p409_p10), %v2573_v8  ;;  %2279 = vmatprep.mubr.msk.bf16.mxu1 (!%p409_p10), %vm2574_vm1, %v2573_v8  ;;  %v2176_v20 = vld [vmem:[%s2990_s4] ss:$0 sm:$0xff] (!%p409_p10)  ;;  %vm1133_vm3 = vcmask (!%p409_p10), 64512   ;;  %vm1395_vm4 = vcmask (!%p409_p10), 1043456   ;;  %v1120_v51 = vlaneseq (!%p409_p10) }
  0x15   : > { %2301 = vmatprep.subr.bf16.mxu0 (!%p409_p10), %v2573_v8  ;;  %2303 = vmatprep.mubr.msk.bf16.mxu0 (!%p409_p10), %vm2574_vm1, %v2573_v8  ;;  %s3008_s1 = sld [smem:[#allocation9_spill]] (!%p409_p10)  ;;  %s3009_s2 = sld [smem:[#allocation10_spill]] (!%p409_p10) }
  0x16   : > { %s2576_s24 = smov (!%p409_p10), 120   ;;  %s2577_s14 = smov (!%p409_p10), 88   ;;  %v1121_v52 = vshrl.u32 (!%p409_p10), %v1120_v51, 7  ;;  %v1123_v53 = vand.u32 (!%p409_p10), 127, %v1120_v51  ;;  %v2207_v51 = vld [vmem:[%s2991_s5 + $0x4] sm:$0xf] (!%p409_p10) }
  0x17   : > { %s2579_s17 = smov (!%p409_p10), 72   ;;  %s2580_s19 = smov (!%p409_p10), 112  }
  0x18   : > { %vm1124_vm5 = vcmp.le.s32.totalorder (!%p409_p10), %v1123_v53, %v1121_v52  ;;  %v1600_v52 = vsel (!%p409_p10), %vm1395_vm4, %v2207_v51, 0 }
  0x1a   : > { %v2451_v7 = vld [vmem:[%s3007_s3] sm:$0xff] (!%p409_p10)   ;;  %v2452_v9 = vld [vmem:[%s3007_s3 + $0x8] sm:$0xff] (!%p409_p10)  }
  0x1b   : > { %s455_s22 = scalar_select %p454_p11, %s2563_s28, 1  ;;  %2276 = vmatpush3.bf16.msra.mxu1 %v2451_v7  ;;  %v2174_v14 = vld [vmem:[%s3008_s1] ss:$0 sm:$0xff] }
  0x1c   : > { %2277 = vmatprep.subr.bf16.mxu1 %v2573_v8  ;;  %v2175_v16 = vld [vmem:[%s3009_s2] ss:$0 sm:$0xff] }
  0x1d   : > { %s2173_s23 = sshll.u32 %s455_s22, 3  ;;  %s2581_s22 = smov 104  }
  0x1e   : > { %s460_s15 = scalar_lea.vmem %s3006_s0, %s2173_s23  ;;  %s2575_s23 = smov 96  }
  0x1f   : > { %v2717_v0 = vld [vmem:[%s460_s15] sm:$0xff]  ;;  %2278 = vmatpush3.bf16.msra.mxu1 %v2452_v9  ;;  %s2578_s15 = smov 80   ;;  %s2582_s0 = smov 64  }
  0x20   : > { %v467_v1 = vsel %vm466_vm0, %v2717_v0, 0.0  ;;  %2283 = vmatprep.subr.bf16.mxu1 %v2573_v8 }
  0x21   : > { %468 = vadd.xlane.f32.xlu0 %v467_v1 }
  0xae   : > { %v469_v2 = vpop.xlane.xlu0 %468 }
  0xaf   : > { %v471_v3 = vmul.f32 0.03125, %v469_v2 }
  0xb1   : > { %v472_v4 = vsub.f32 %v2717_v0, %v471_v3 }
  0xb3   : > { %v473_v5 = vmul.f32 %v472_v4, %v472_v4 }
  0xb5   : > { %v474_v6 = vsel %vm466_vm0, %v473_v5, 0.0 }
  0xb6   : > { %475 = vadd.xlane.f32.xlu0 %v474_v6 }
 0x143   : > { %v476_v10 = vpop.xlane.xlu0 %475 }
 0x144   : > { %v477_v11 = vmul.f32 0.03125, %v476_v10 }
 0x146   : > { %v478_v12 = vadd.f32 1e-05, %v477_v11 }
 0x148   : > { %2463 = vrsqrt.f32 %v478_v12 }
 0x152   : > { %v2464_v13 = vpop.eup %2463 }
 0x153   : > { %v480_v15 = vmul.f32 %v2464_v13, %v472_v4 }
 0x155   : > { %v487_v17 = vmul.f32 %v2174_v14, %v480_v15 }
 0x157   : > { %v494_v18 = vadd.f32 %v2175_v16, %v487_v17 }
 0x159   : > { %v495_v19 = vpack.c.bf16 %v494_v18, %v494_v18 }
 0x15b   : > { %2280 = vmatmul.mubr.msk.bf16.vlgmr.msra.gmra.mrb[0].mxu1 %vm466_vm0, %v495_v19 }
 0x15c   : > { %2285 = vmatprep.mubr.msk.bf16.mxu1 %vm2574_vm1, %v2573_v8 }
 0x22e   : > { %v556_v21 = vpop.f32.mrb[0].mxu1 }
 0x22f   : > { %v557_v22 = vadd.f32 %v2176_v20, %v556_v21  ;;  %v2281_v23 = vpop.f32.mrb[1].mxu1 }
 0x230   : > { %v559_v24 = vpop.f32.mrb[2].mxu1 }
 0x231   : > { %v562_v25 = vmul.f32 0.35355338, %v557_v22  ;;  %v2749_v26 = vpack.c.bf16 %v557_v22, %v557_v22  ;;  %v2282_v27 = vpop.f32.mrb[3].mxu1 }
 0x233   : > { %v563_v28 = vpack.c.bf16 %v562_v25, %v562_v25  ;;  %570 = vrot.lane.b32.xlu1 %v2749_v26, %s2575_s23  ;;  %s2584_s23 = smov 56  }
 0x235   : > { %566 = vst.msk [vmem:[#allocation2] sm:$0xf] %vm565_vm2, %v563_v28  ;;  %587 = vrot.lane.b32.xlu0 %v563_v28, %s2576_s24  ;;  %s2585_s24 = smov 40  }
 0x237   : > { %592 = vrot.lane.b32.xlu1 %v2749_v26, %s2577_s14  ;;  %s2231_s14 = sshll.u32 %s2563_s28, 7 }
 0x238   : > { %s2938_s2 = scalar_lea.hbm %s2999_s13, %s2231_s14 }
 0x23b   : > { %610 = vrot.lane.b32.xlu1 %v2749_v26, %s2578_s15 }
 0x23c   : > { %v641_v38 = vld [vmem:[#allocation2] sm:$0xf] }
 0x23f   : > { %628 = vrot.lane.b32.xlu1 %v2749_v26, %s2579_s17 }
 0x243   : > { %605 = vrot.lane.b32.xlu1 %v563_v28, %s2580_s19 }
 0x247   : > { %623 = vrot.lane.b32.xlu1 %v563_v28, %s2581_s22  ;;  %s451_s22 = sand.u32 1, %s2555_s26  }
 0x248   : > { %s2015_s28 = scalar_lea.sflag [#allocation6], %s451_s22 }
 0x24b   : > { %578 = vrot.lane.b32.xlu1 %v2749_v26, %s2582_s0  ;;  %s2583_s0 = smov 48  }
 0x2a5   : > { %v571_v29 = vpop.permute.xlu1 %570 }
 0x2a6   : > { %577 = vst.msk [vmem:[#allocation3] sm:$0xf] %vm565_vm2, %v571_v29 }
 0x2a7   : > { %v588_v30 = vpop.permute.xlu0 %587 }
 0x2a8   : > { %591 = vst.msk [vmem:[#allocation2 + $0x4] sm:$0xf] %vm565_vm2, %v588_v30 }
 0x2a9   : > { %v593_v31 = vpop.permute.xlu1 %592 }
 0x2aa   : > { %2182 = vst.msk [vmem:[#allocation3 + $0x4] sm:$0xf] %vm565_vm2, %v593_v31 }
 0x2ad   : > { %v611_v32 = vpop.permute.xlu1 %610  ;;  %v1125_v33 = vld [vmem:[#allocation3] sm:$0xf] }
 0x2ae   : > { %2184 = vst.msk [vmem:[#allocation3 + $0x8] sm:$0xf] %vm565_vm2, %v611_v32  ;;  %v1138_v34 = vsel %vm1133_vm3, %v1125_v33, 0 }
 0x2af   : > { %2284 = vmatpush3.bf16.xpose.msra.mxu1 %v1138_v34  ;;  %v642_v45 = vld [vmem:[#allocation2 + $0x4] sm:$0xf] }
 0x2b0   : > { %2289 = vmatprep.subr.bf16.mxu1 %v2573_v8 }
 0x2b1   : > { %v629_v35 = vpop.permute.xlu1 %628  ;;  %v1126_v36 = vld [vmem:[#allocation3 + $0x4] sm:$0xf] }
 0x2b2   : > { %2186 = vst.msk [vmem:[#allocation3 + $0xc] sm:$0xf] %vm565_vm2, %v629_v35  ;;  %v1184_v39 = vsel %vm1133_vm3, %v1126_v36, 0 }
 0x2b5   : > { %v606_v37 = vpop.permute.xlu1 %605  ;;  %v1127_v43 = vld [vmem:[#allocation3 + $0x8] sm:$0xf] }
 0x2b6   : > { %609 = vst.msk [vmem:[#allocation2 + $0x8] sm:$0xf] %vm565_vm2, %v606_v37  ;;  %2286 = vmatmul.mubr.msk.bf16.vlgmr.msra.gmra.mrb[4].mxu1 %vm1133_vm3, %v641_v38  ;;  %v1230_v46 = vsel %vm1133_vm3, %v1127_v43, 0 }
 0x2b7   : > { %2290 = vmatpush3.bf16.xpose.msra.mxu1 %v1184_v39  ;;  %2291 = vmatprep.mubr.msk.bf16.mxu1 %vm2574_vm1, %v2573_v8 }
 0x2b8   : > { %2295 = vmatprep.subr.bf16.mxu1 %v2573_v8 }
 0x2b9   : > { %v624_v40 = vpop.permute.xlu1 %623  ;;  %v1128_v41 = vld [vmem:[#allocation3 + $0xc] sm:$0xf] }
 0x2ba   : > { %627 = vst.msk [vmem:[#allocation2 + $0xc] sm:$0xf] %vm565_vm2, %v624_v40  ;;  %v1276_v42 = vsel %vm1133_vm3, %v1128_v41, 0 }
 0x2bb   : > { %2302 = vmatpush3.bf16.xpose.msra.mxu0 %v1276_v42 }
 0x2bc   : > { %2313 = vmatprep.subr.bf16.mxu0 %v2573_v8 }
 0x2bd   : > { %v579_v44 = vpop.permute.xlu1 %578  ;;  %v643_v48 = vld [vmem:[#allocation2 + $0x8] sm:$0xf] }
 0x2be   : > { %583 = vst.msk [vmem:[#allocation4] sm:$0xf] %vm565_vm2, %v579_v44  ;;  %2292 = vmatmul.mubr.msk.bf16.vlgmr.msra.gmra.mrb[8].mxu1 %vm1133_vm3, %v642_v45 }
 0x2bf   : > { %2296 = vmatpush3.bf16.xpose.msra.mxu1 %v1230_v46  ;;  %2297 = vmatprep.mubr.msk.bf16.mxu1 %vm2574_vm1, %v2573_v8 }
 0x2c0   : > { %2307 = vmatprep.subr.bf16.mxu1 %v2573_v8 }
 0x2c1   : > { %v644_v47 = vld [vmem:[#allocation2 + $0xc] sm:$0xf] }
 0x2c2   : > { %2304 = vmatmul.mubr.msk.bf16.vlgmr.msra.gmra.mrb[0].mxu0 %vm1133_vm3, %v644_v47 }
 0x2c3   : > { %2315 = vmatprep.mubr.msk.bf16.mxu0 %vm2574_vm1, %v2573_v8 }
 0x2c5   : > { %v1129_v49 = vld [vmem:[#allocation4] sm:$0xf] }
 0x2c6   : > { %2298 = vmatmul.mubr.msk.bf16.vlgmr.msra.gmra.mrb[12].mxu1 %vm1133_vm3, %v643_v48  ;;  %v1397_v50 = vsel %vm1395_vm4, %v1129_v49, 0  ;;  %v1593_v49 = vld [vmem:[%s2991_s5] sm:$0xf] }
 0x2c7   : > { %2308 = vmatpush3.bf16.msra.mxu1 %v1397_v50  ;;  %2309 = vmatprep.mubr.msk.bf16.mxu1 %vm2574_vm1, %v2573_v8  ;;  %v1646_v50 = vsel %vm1395_vm4, %v1593_v49, 0 }
 0x2c8   : > { %2319 = vmatprep.subr.bf16.mxu1 %v2573_v8 }
 0x389   : > { %v1174_v54 = vpop.f32.mrb[4].mxu1 }
 0x38a   : > { %v1320_v55 = vsel %vm1124_vm5, %v1174_v54, -1e+30  ;;  %v2287_v56 = vpop.f32.mrb[5].mxu1 }
 0x38b   : > { %v1177_v57 = vpop.f32.mrb[6].mxu1  ;;  %v1324_v58 = vsel %vm1133_vm3, %v1320_v55, -inf }
 0x38c   : > { %1325 = vmax.xlane.f32.xlu1 %v1324_v58  ;;  %v2288_v59 = vpop.f32.mrb[7].mxu1 }
 0x391   : > { %v1220_v60 = vpop.f32.mrb[8].mxu1 }
 0x392   : > { %v2293_v61 = vpop.f32.mrb[9].mxu1  ;;  %v1321_v6 = vsel %vm1124_vm5, %v1220_v60, -1e+30 }
 0x393   : > { %v1223_v62 = vpop.f32.mrb[10].mxu1  ;;  %v1327_v12 = vsel %vm1133_vm3, %v1321_v6, -inf }
 0x394   : > { %v2294_v63 = vpop.f32.mrb[11].mxu1 }
 0x395   : > { %v1312_v1 = vpop.f32.mrb[0].mxu0 }
 0x396   : > { %v1323_v2 = vsel %vm1124_vm5, %v1312_v1, -1e+30  ;;  %v2305_v3 = vpop.f32.mrb[1].mxu0 }
 0x397   : > { %v1315_v4 = vpop.f32.mrb[2].mxu0  ;;  %v1333_v5 = vsel %vm1133_vm3, %v1323_v2, -inf }
 0x398   : > { %v2306_v7 = vpop.f32.mrb[3].mxu0  ;;  %1334 = vmax.xlane.f32.xlu0 %v1333_v5 }
 0x399   : > { %v1266_v9 = vpop.f32.mrb[12].mxu1 }
 0x39a   : > { %v2299_v10 = vpop.f32.mrb[13].mxu1  ;;  %v1322_v14 = vsel %vm1124_vm5, %v1266_v9, -1e+30 }
 0x39b   : > { %v1269_v11 = vpop.f32.mrb[14].mxu1  ;;  %v1330_v15 = vsel %vm1133_vm3, %v1322_v14, -inf }
 0x39c   : > { %1328 = vmax.xlane.f32.xlu0 %v1327_v12  ;;  %v2300_v13 = vpop.f32.mrb[15].mxu1 }
 0x39d   : > { %617 = vrot.lane.b32.xlu1 %v2749_v26, %s2583_s0  ;;  %s2172_s0 = sshll.u32 %s451_s22, 3 }
 0x39e   : > { %s453_s15 = scalar_lea.vmem [#allocation5], %s2172_s0 }
 0x39f   : > { %s2029_s17 = sshll.u32 %s453_s15, 4  ;;  %s2940_s17 = int_to_ptr.vmem [resolvable:$true] %s2029_s17 }
 0x3a0   : > { %s2493_s0 = scalar_lea.vmem %s2940_s17, 128 }
 0x3a1   : > { %p2494_p12 = scmp.ne.s32.totalorder %s2940_s17, %s2493_s0 }
 0x3a3   : > { %p2495_p13 = pnand %p2494_p12, %p2697_p4 }
 0x3a5   : > { %p2496_p0 = pneg %p2495_p13 }
 0x3b2   : > { %599 = vrot.lane.b32.xlu0 %v2749_v26, %s2584_s23  ;;  %s2586_s23 = smov [#allocation5]  }
 0x3c1   : > { %1331 = vmax.xlane.f32.xlu1 %v1330_v15 }
 0x3d2   : > { %635 = vrot.lane.b32.xlu1 %v2749_v26, %s2585_s24  ;;  %s2497_s24 = sshll.u32 %s2586_s23, 4  ;;  %s2498_s24 = int_to_ptr.vmem [resolvable:$false] %s2497_s24 }
 0x3d3   : > { %s2499_s3 = scalar_lea.vmem %s2498_s24, 256  ;;  %p2500_p1 = scmp.lt.s32.totalorder %s2940_s17, %s2498_s24 }
 0x3d4   : > { %p2501_p2 = scmp.lt.s32.totalorder %s2499_s3, %s2493_s0 }
 0x3d6   : > { %p2502_p3 = por %p2501_p2, %p2500_p1 }
 0x3d8   : > { %p2503_p5 = pnand %p2502_p3, %p2496_p0 }
 0x419   : > { %v2798_v16 = vpop.xlane.xlu1 %1325 }
 0x41a   : > { %v1352_v17 = vsub.f32 %v1320_v55, %v2798_v16  ;;  %v1340_v53 = vsub.f32 -inf, %v2798_v16 }
 0x41c   : > { %v1356_v18 = vmul.f32 1.442695, %v1352_v17  ;;  %v1344_v54 = vmul.f32 1.442695, %v1340_v53 }
 0x41d   : > { %v618_v19 = vpop.permute.xlu1 %617 }
 0x41e   : > { %2185 = vst.msk [vmem:[#allocation4 + $0x8] sm:$0xf] %vm565_vm2, %v618_v19  ;;  %2465 = vpow2.f32 %v1356_v18 }
 0x425   : > { %v2802_v20 = vpop.xlane.xlu0 %1334  ;;  %v1131_v25 = vld [vmem:[#allocation4 + $0x8] sm:$0xf] }
 0x426   : > { %v1489_v28 = vsel %vm1395_vm4, %v1131_v25, 0  ;;  %v1355_v35 = vsub.f32 %v1323_v2, %v2802_v20  ;;  %v1343_v13 = vsub.f32 -inf, %v2802_v20 }
 0x428   : > { %v2466_v21 = vpop.eup %2465  ;;  %v1362_v36 = vmul.f32 1.442695, %v1355_v35 }
 0x429   : > { %v2804_v22 = vpop.xlane.xlu0 %1328  ;;  %v1368_v24 = vsel %vm1133_vm3, %v2466_v21, 0.0  ;;  %v1388_v26 = vpack.c.bf16 %v2466_v21, %v2466_v21  ;;  %v2210_v21 = vld [vmem:[%s2991_s5 + $0x8] sm:$0xf] }
 0x42a   : > { %v1353_v23 = vsub.f32 %v1321_v6, %v2804_v22  ;;  %1369 = vadd.xlane.f32.xlu1 %v1368_v24  ;;  %v1341_v55 = vsub.f32 -inf, %v2804_v22  ;;  %v2212_v6 = vld [vmem:[%s2991_s5 + $0xc] sm:$0xf]  ;;  %v1350_v24 = vmul.f32 1.442695, %v1343_v13 }
 0x42b   : > { %2310 = vmatmul.mubr.msk.bf16.vlgmr.msra.gmra.mrb[16].mxu1 %vm1133_vm3, %v1388_v26  ;;  %v1743_v12 = vsel %vm1395_vm4, %v2212_v6, 0  ;;  %v1694_v26 = vsel %vm1395_vm4, %v2210_v21, 0 }
 0x42c   : > { %v1358_v27 = vmul.f32 1.442695, %v1353_v23  ;;  %2320 = vmatpush3.bf16.msra.mxu1 %v1489_v28  ;;  %2321 = vmatprep.mubr.msk.bf16.mxu1 %vm2574_vm1, %v2573_v8  ;;  %v1346_v57 = vmul.f32 1.442695, %v1341_v55 }
 0x42d   : > { %v600_v29 = vpop.permute.xlu0 %599  ;;  %2331 = vmatprep.subr.bf16.mxu1 %v2573_v8 }
 0x42e   : > { %2183 = vst.msk [vmem:[#allocation4 + $0x4] sm:$0xf] %vm565_vm2, %v600_v29  ;;  %2467 = vpow2.f32 %v1358_v27 }
 0x42f   : > { %2469 = vpow2.f32 %v1362_v36 }
 0x435   : > { %v1130_v30 = vld [vmem:[#allocation4 + $0x4] sm:$0xf] }
 0x436   : > { %v1443_v31 = vsel %vm1395_vm4, %v1130_v30, 0 }
 0x437   : > { %2314 = vmatpush3.bf16.msra.mxu0 %v1443_v31 }
 0x438   : > { %2325 = vmatprep.subr.bf16.mxu0 %v2573_v8  ;;  %v2468_v32 = vpop.eup %2467 }
 0x439   : > { %v1371_v33 = vsel %vm1133_vm3, %v2468_v32, 0.0  ;;  %v1389_v34 = vpack.c.bf16 %v2468_v32, %v2468_v32  ;;  %v2470_v41 = vpop.eup %2469 }
 0x43a   : > { %1372 = vadd.xlane.f32.xlu0 %v1371_v33  ;;  %v1391_v44 = vpack.c.bf16 %v2470_v41, %v2470_v41  ;;  %v1377_v48 = vsel %vm1133_vm3, %v2470_v41, 0.0 }
 0x43b   : > { %2316 = vmatmul.mubr.msk.bf16.vlgmr.msra.gmra.mrb[4].mxu0 %vm1133_vm3, %v1389_v34 }
 0x43c   : > { %2327 = vmatprep.mubr.msk.bf16.mxu0 %vm2574_vm1, %v2573_v8 }
 0x44e   : > { %v2821_v37 = vpop.xlane.xlu1 %1331 }
 0x44f   : > { %v1354_v38 = vsub.f32 %v1322_v14, %v2821_v37  ;;  %v1342_v18 = vsub.f32 -inf, %v2821_v37 }
 0x451   : > { %v1360_v39 = vmul.f32 1.442695, %v1354_v38  ;;  %v1348_v27 = vmul.f32 1.442695, %v1342_v18  ;;  %v2455_v18 = vld [vmem:[%s2997_s11] sm:$0xff]  }
 0x452   : > { %v636_v40 = vpop.permute.xlu1 %635 }
 0x453   : > { %2187 = vst.msk [vmem:[#allocation4 + $0xc] sm:$0xf] %vm565_vm2, %v636_v40  ;;  %2471 = vpow2.f32 %v1360_v39 }
 0x454   : > { %2473 = vpow2.f32 %v1344_v54 }
 0x455   : > { %2475 = vpow2.f32 %v1346_v57 }
 0x45a   : > { %v1132_v42 = vld [vmem:[#allocation4 + $0xc] sm:$0xf] }
 0x45b   : > { %v1535_v43 = vsel %vm1395_vm4, %v1132_v42, 0 }
 0x45c   : > { %2326 = vmatpush3.bf16.msra.mxu0 %v1535_v43 }
 0x45d   : > { %2337 = vmatprep.subr.bf16.mxu0 %v2573_v8  ;;  %v2472_v45 = vpop.eup %2471 }
 0x45e   : > { %v1374_v46 = vsel %vm1133_vm3, %v2472_v45, 0.0  ;;  %v1390_v47 = vpack.c.bf16 %v2472_v45, %v2472_v45  ;;  %v2474_v56 = vpop.eup %2473 }
 0x45f   : > { %2328 = vmatmul.mubr.msk.bf16.vlgmr.msra.gmra.mrb[8].mxu0 %vm1133_vm3, %v1391_v44  ;;  %1375 = vadd.xlane.f32.xlu0 %v1374_v46  ;;  %v1364_v59 = vmul.f32 0.0, %v2474_v56  ;;  %v2476_v61 = vpop.eup %2475 }
 0x460   : > { %2339 = vmatprep.mubr.msk.bf16.mxu0 %vm2574_vm1, %v2573_v8  ;;  %2322 = vmatmul.mubr.msk.bf16.vlgmr.msra.gmra.mrb[20].mxu1 %vm1133_vm3, %v1390_v47  ;;  %v1365_v1 = vmul.f32 0.0, %v2476_v61 }
 0x461   : > { %2333 = vmatprep.mubr.msk.bf16.mxu1 %vm2574_vm1, %v2573_v8  ;;  %2338 = vmatpush3.bf16.msra.mxu0 %v1646_v50 }
 0x462   : > { %2349 = vmatprep.subr.bf16.mxu0 %v2573_v8  ;;  %2332 = vmatpush3.bf16.msra.mxu1 %v1600_v52 }
 0x463   : > { %1378 = vadd.xlane.f32.xlu0 %v1377_v48  ;;  %2343 = vmatprep.subr.bf16.mxu1 %v2573_v8 }
 0x4b7   : > { %v1370_v58 = vpop.xlane.xlu1 %1369 }
 0x4b8   : > { %v1380_v60 = vadd.f32 %v1370_v58, %v1364_v59 }
 0x4ba   : > { %2477 = vrcp.f32 %v1380_v60 }
 0x4c4   : > { %v2478_v4 = vpop.eup %2477 }
 0x4c7   : > { %v1373_v62 = vpop.xlane.xlu0 %1372 }
 0x4c8   : > { %v1381_v7 = vadd.f32 %v1373_v62, %v1365_v1 }
 0x4ca   : > { %2479 = vrcp.f32 %v1381_v7 }
 0x4cb   : > { %2481 = vpow2.f32 %v1350_v24  ;;  %v2215_v24 = vld [vmem:[%s2993_s7] ss:$0 sm:$0xff] }
 0x4cc   : > { %2483 = vpow2.f32 %v1348_v27 }
 0x4d4   : > { %v2480_v17 = vpop.eup %2479 }
 0x4d5   : > { %v2482_v28 = vpop.eup %2481 }
 0x4d6   : > { %v2484_v29 = vpop.eup %2483  ;;  %v1367_v31 = vmul.f32 0.0, %v2482_v28 }
 0x4d7   : > { %v1366_v32 = vmul.f32 0.0, %v2484_v29  ;;  %v2456_v29 = vld [vmem:[%s2997_s11 + $0x8] sm:$0xff]  }
 0x4ec   : > { %v1376_v20 = vpop.xlane.xlu0 %1375 }
 0x4ed   : > { %v1382_v34 = vadd.f32 %v1376_v20, %v1366_v32 }
 0x4f0   : > { %v1379_v30 = vpop.xlane.xlu0 %1378 }
 0x4f1   : > { %v1383_v33 = vadd.f32 %v1379_v30, %v1367_v31  ;;  %v2457_v30 = vld [vmem:[%s2997_s11 + $0x10] sm:$0xff]  }
 0x4f3   : > { %2485 = vrcp.f32 %v1383_v33  ;;  %v2460_v33 = vld [vmem:[%s2997_s11 + $0x28] sm:$0xff]  }
 0x4f4   : > { %2487 = vrcp.f32 %v1382_v34  ;;  %v2461_v34 = vld [vmem:[%s2997_s11 + $0x30] sm:$0xff]  }
 0x4fd   : > { %v2486_v38 = vpop.eup %2485 }
 0x4fe   : > { %v1433_v63 = vpop.f32.mrb[16].mxu1  ;;  %v2488_v45 = vpop.eup %2487 }
 0x4ff   : > { %v1577_v2 = vadd.f32 %v1433_v63, %v1364_v59  ;;  %v2311_v3 = vpop.f32.mrb[17].mxu1 }
 0x500   : > { %v1436_v5 = vpop.f32.mrb[18].mxu1 }
 0x501   : > { %v1585_v9 = vmul.f32 %v2478_v4, %v1577_v2  ;;  %v2312_v10 = vpop.f32.mrb[19].mxu1  ;;  %v2214_v4 = vld [vmem:[%s2992_s6] ss:$0 sm:$0xff] }
 0x503   : > { %v1589_v11 = vpack.c.bf16 %v1585_v9, %v1585_v9 }
 0x505   : > { %2340 = vmatmul.mubr.msk.bf16.vlgmr.msra.gmra.mrb[12].mxu0 %vm1133_vm3, %v1589_v11 }
 0x506   : > { %2350 = vmatpush3.bf16.msra.mxu0 %v1743_v12  ;;  %2351 = vmatprep.mubr.msk.bf16.mxu0 %vm2574_vm1, %v2573_v8 }
 0x507   : > { %2363 = vmatprep.subr.bf16.mxu0 %v2573_v8 }
 0x50e   : > { %v1479_v14 = vpop.f32.mrb[4].mxu0 }
 0x50f   : > { %v1578_v15 = vadd.f32 %v1479_v14, %v1365_v1  ;;  %v2317_v16 = vpop.f32.mrb[5].mxu0 }
 0x510   : > { %v1482_v19 = vpop.f32.mrb[6].mxu0 }
 0x511   : > { %v1586_v22 = vmul.f32 %v2480_v17, %v1578_v15  ;;  %v2318_v23 = vpop.f32.mrb[7].mxu0  ;;  %v2453_v17 = vld [vmem:[%s2995_s9] sm:$0xff]  }
 0x513   : > { %v1590_v25 = vpack.c.bf16 %v1586_v22, %v1586_v22 }
 0x515   : > { %2334 = vmatmul.mubr.msk.bf16.vlgmr.msra.gmra.mrb[24].mxu1 %vm1133_vm3, %v1590_v25 }
 0x516   : > { %2344 = vmatpush3.bf16.msra.mxu1 %v1694_v26  ;;  %2345 = vmatprep.mubr.msk.bf16.mxu1 %vm2574_vm1, %v2573_v8  ;;  %v2216_v26 = vld [vmem:[%s2994_s8] ss:$0 sm:$0xff] }
 0x517   : > { %2355 = vmatprep.subr.bf16.mxu1 %v2573_v8 }
 0x532   : > { %v1571_v35 = vpop.f32.mrb[8].mxu0 }
 0x533   : > { %v1580_v36 = vadd.f32 %v1571_v35, %v1367_v31  ;;  %v2329_v37 = vpop.f32.mrb[9].mxu0  ;;  %v1525_v39 = vpop.f32.mrb[20].mxu1  ;;  %v2458_v31 = vld [vmem:[%s2997_s11 + $0x18] sm:$0xff]  }
 0x534   : > { %v1574_v40 = vpop.f32.mrb[10].mxu0  ;;  %v1579_v42 = vadd.f32 %v1525_v39, %v1366_v32  ;;  %v2323_v43 = vpop.f32.mrb[21].mxu1  ;;  %v2459_v32 = vld [vmem:[%s2997_s11 + $0x20] sm:$0xff]   ;;  %v2462_v35 = vld [vmem:[%s2997_s11 + $0x38] sm:$0xff]  }
 0x535   : > { %v1588_v41 = vmul.f32 %v2486_v38, %v1580_v36  ;;  %v2330_v44 = vpop.f32.mrb[11].mxu0  ;;  %v1528_v46 = vpop.f32.mrb[22].mxu1  ;;  %v2217_v36 = vld [vmem:[%s2996_s10] ss:$0 sm:$0xff] }
 0x536   : > { %v1587_v48 = vmul.f32 %v2488_v45, %v1579_v42  ;;  %v2324_v49 = vpop.f32.mrb[23].mxu1 }
 0x537   : > { %v1592_v47 = vpack.c.bf16 %v1588_v41, %v1588_v41 }
 0x538   : > { %v1591_v50 = vpack.c.bf16 %v1587_v48, %v1587_v48 }
 0x539   : > { %2352 = vmatmul.mubr.msk.bf16.vlgmr.msra.gmra.mrb[16].mxu0 %vm1133_vm3, %v1592_v47 }
 0x53a   : > { %2379 = vmatprep.mubr.msk.bf16.mxu0 %vm2574_vm1, %v2573_v8  ;;  %2346 = vmatmul.mubr.msk.bf16.vlgmr.msra.gmra.mrb[28].mxu1 %vm1133_vm3, %v1591_v50 }
 0x53b   : > { %2359 = vmatprep.mubr.msk.bf16.mxu1 %vm2574_vm1, %v2573_v8  ;;  %2356 = vmatpush3.bf16.msra.mxu1 %v2453_v17 }
 0x53c   : > { %2357 = vmatprep.subr.bf16.mxu1 %v2573_v8  ;;  %2364 = vmatpush3.bf16.msra.mxu0 %v2455_v18 }
 0x53d   : > { %2365 = vmatprep.subr.bf16.mxu0 %v2573_v8 }
 0x540   : > { %2366 = vmatpush3.bf16.msra.mxu0 %v2456_v29 }
 0x541   : > { %2367 = vmatprep.subr.bf16.mxu0 %v2573_v8 }
 0x544   : > { %2368 = vmatpush3.bf16.msra.mxu0 %v2457_v30 }
 0x545   : > { %2369 = vmatprep.subr.bf16.mxu0 %v2573_v8 }
 0x548   : > { %2370 = vmatpush3.bf16.msra.mxu0 %v2458_v31 }
 0x549   : > { %2371 = vmatprep.subr.bf16.mxu0 %v2573_v8 }
 0x54c   : > { %2372 = vmatpush3.bf16.msra.mxu0 %v2459_v32 }
 0x54d   : > { %2373 = vmatprep.subr.bf16.mxu0 %v2573_v8 }
 0x550   : > { %2374 = vmatpush3.bf16.msra.mxu0 %v2460_v33 }
 0x551   : > { %2375 = vmatprep.subr.bf16.mxu0 %v2573_v8 }
 0x554   : > { %2376 = vmatpush3.bf16.msra.mxu0 %v2461_v34 }
 0x555   : > { %2377 = vmatprep.subr.bf16.mxu0 %v2573_v8 }
 0x558   : > { %2378 = vmatpush3.bf16.msra.mxu0 %v2462_v35 }
 0x5d8   : > { %v1682_v51 = vpop.f32.mrb[12].mxu0 }
 0x5d9   : > { %v2341_v52 = vpop.f32.mrb[13].mxu0 }
 0x5da   : > { %v1685_v53 = vpop.f32.mrb[14].mxu0 }
 0x5db   : > { %v2342_v54 = vpop.f32.mrb[15].mxu0 }
 0x5e8   : > { %v1636_v55 = vpop.f32.mrb[24].mxu1 }
 0x5e9   : > { %v1683_v56 = vadd.f32 %v1682_v51, %v1636_v55  ;;  %v2335_v57 = vpop.f32.mrb[25].mxu1  ;;  %v2221_v51 = vld [vmem:[%s2998_s12] ss:$0 sm:$0xff] }
 0x5ea   : > { %v1639_v58 = vpop.f32.mrb[26].mxu1 }
 0x5eb   : > { %v2336_v59 = vpop.f32.mrb[27].mxu1 }
 0x60c   : > { %v1779_v60 = vpop.f32.mrb[16].mxu0 }
 0x60d   : > { %v2353_v61 = vpop.f32.mrb[17].mxu0  ;;  %v1730_v62 = vpop.f32.mrb[28].mxu1 }
 0x60e   : > { %v1782_v63 = vpop.f32.mrb[18].mxu0  ;;  %v1736_v1 = vadd.f32 %v1730_v62, %v1683_v56  ;;  %v2347_v2 = vpop.f32.mrb[29].mxu1 }
 0x60f   : > { %v2354_v3 = vpop.f32.mrb[19].mxu0  ;;  %v1733_v5 = vpop.f32.mrb[30].mxu1 }
 0x610   : > { %v1785_v6 = vadd.f32 %v1779_v60, %v1736_v1  ;;  %v2348_v7 = vpop.f32.mrb[31].mxu1 }
 0x612   : > { %v1793_v9 = vadd.f32 %v2214_v4, %v1785_v6 }
 0x614   : > { %v2875_v10 = vadd.f32 %v1793_v9, %v2717_v0  ;;  %v2454_v0 = vld [vmem:[%s2995_s9 + $0x8] sm:$0xff]  }
 0x615   : > { %2358 = vmatpush3.bf16.msra.mxu1 %v2454_v0 }
 0x616   : > { %v1797_v11 = vsel %vm466_vm0, %v2875_v10, 0.0 }
 0x617   : > { %1798 = vadd.xlane.f32.xlu1 %v1797_v11 }
 0x6a4   : > { %v1799_v12 = vpop.xlane.xlu1 %1798 }
 0x6a5   : > { %v1800_v13 = vmul.f32 0.03125, %v1799_v12 }
 0x6a7   : > { %v1801_v14 = vsub.f32 %v2875_v10, %v1800_v13 }
 0x6a9   : > { %v1802_v15 = vmul.f32 %v1801_v14, %v1801_v14 }
 0x6ab   : > { %v1803_v16 = vsel %vm466_vm0, %v1802_v15, 0.0 }
 0x6ac   : > { %1804 = vadd.xlane.f32.xlu0 %v1803_v16 }
 0x739   : > { %v1805_v19 = vpop.xlane.xlu0 %1804 }
 0x73a   : > { %v1806_v21 = vmul.f32 0.03125, %v1805_v19 }
 0x73c   : > { %v1807_v22 = vadd.f32 1e-05, %v1806_v21 }
 0x73e   : > { %2489 = vrsqrt.f32 %v1807_v22 }
 0x748   : > { %v2490_v23 = vpop.eup %2489 }
 0x749   : > { %v1809_v25 = vmul.f32 %v2490_v23, %v1801_v14 }
 0x74b   : > { %v1816_v27 = vmul.f32 %v2215_v24, %v1809_v25 }
 0x74d   : > { %v1823_v20 = vadd.f32 %v2216_v26, %v1816_v27 }
 0x74f   : > { %v1824_v28 = vpack.c.bf16 %v1823_v20, %v1823_v20 }
 0x751   : > { %2360 = vmatmul.mubr.msk.bf16.vlgmr.msra.gmra.mrb[32].mxu1 %vm466_vm0, %v1824_v28 }
 0x824   : > { %v1885_v37 = vpop.f32.mrb[32].mxu1 }
 0x825   : > { %v1886_v38 = vadd.f32 %v2217_v36, %v1885_v37  ;;  %v2361_v39 = vpop.f32.mrb[33].mxu1 }
 0x826   : > { %v1888_v40 = vpop.f32.mrb[34].mxu1 }
 0x827   : > { %v1892_v41 = vmul.f32 0.044715, %v1886_v38  ;;  %v2362_v42 = vpop.f32.mrb[35].mxu1  ;;  %v1891_v8 = vmul.f32 0.5, %v1886_v38 }
 0x829   : > { %v1893_v43 = vmul.f32 %v1892_v41, %v1886_v38 }
 0x82b   : > { %v1894_v44 = vmul.f32 %v1893_v43, %v1886_v38 }
 0x82d   : > { %v1895_v45 = vadd.f32 %v1894_v44, %v1886_v38 }
 0x82f   : > { %v1896_v46 = vmul.f32 0.7978846, %v1895_v45 }
 0x831   : > { %2491 = vtanh.f32 %v1896_v46 }
 0x83b   : > { %v2492_v47 = vpop.eup %2491 }
 0x83c   : > { %v1898_v48 = vadd.f32 1.0, %v2492_v47 }
 0x83e   : > { %v1899_v49 = vmul.f32 %v1898_v48, %v1891_v8 }
 0x840   : > { %v1900_v50 = vpack.c.bf16 %v1899_v49, %v1899_v49 }
 0x842   : > { %2380 = vmatmul.mubr.bf16.vlgmr.msra.gmra.mrb[20].mxu0 %v1900_v50 }
 0x915   : > { %v2006_v52 = vpop.f32.mrb[20].mxu0 }
 0x916   : > { %v2007_v53 = vadd.f32 %v2221_v51, %v2006_v52  ;;  %v2381_v54 = vpop.f32.mrb[21].mxu0 }
 0x917   : > { %v2009_v55 = vpop.f32.mrb[22].mxu0 }
 0x918   : > { %v2012_v56 = vadd.f32 %v2007_v53, %v2875_v10  ;;  %v2382_v57 = vpop.f32.mrb[23].mxu0 }
 0x91a   : > { %2013 = vst.msk [vmem:[%s453_s15] sm:$0xff] %vm466_vm0, %v2012_v56 }
 0x91b   : > { %2506 = shalt.err (!%p2503_p5)
}
 0x91c   : > { %s2507_s1 = scalar_lea.hbm %s2938_s2, 128  ;;  %s2511_s15 = scalar_lea.hbm %s2999_s13, 256 }
 0x91d   : > { %p2508_p6 = scmp.ne.s32.totalorder %s2938_s2, %s2507_s1  ;;  %p2512_p10 = scmp.lt.u32.totalorder %s2938_s2, %s2999_s13 }
 0x91e   : > { %p2513_p11 = scmp.lt.u32.totalorder %s2511_s15, %s2507_s1  ;;  %p2515_p13 = scmp.lt.u32.totalorder %s2507_s1, %s2938_s2 }
 0x91f   : > { %p2509_p7 = pnand %p2508_p6, %p2697_p4 }
 0x920   : > { %p2514_p12 = por %p2513_p11, %p2512_p10 }
 0x921   : > { %p2510_p9 = pneg %p2509_p7 }
 0x922   : > { %p2516_p0 = por %p2515_p13, %p2514_p12 }
 0x924   : > { %p2517_p1 = pnand %p2516_p0, %p2510_p9 }
 0x926   : > { %2520 = shalt.err (!%p2517_p1)
}
 0x927   : > { %2383 = dma.vmem_to_hbm [thread:$0]  (%p2697_p4), %s2940_s17, 128, %s2938_s2, %s2015_s28  }
 0x928 PF: > { %p2389_p2 = scmp.ge.s32.totalorder %s2571_s30, 2  ;;  %s2041_s3 = sand.u32 1, %s2551_s25  }
 0x929   : > { %s2042_s0 = scalar_lea.sflag [#allocation6], %s2041_s3 }
 0x92a   : > { %p2386_p3 = pnand %p2389_p2, %p2704_p8 }
 0x92c   : > { %2546 = dma.done.wait (!%p2386_p3), %s2042_s0, 128  }
 0x92d   : > { %2548 = vsyncadd (!%p2386_p3), %s2042_s0, 4294967168  ;;  %s26_s30 = sadd.s32 1, %s2571_s30   ;;  %s3010_s25 = smov %s2555_s26 }
 0x92e   : > { %p23_p5 = scmp.ge.s32.totalorder %s26_s30, 4   ;;  %s3011_s26 = smov %s2559_s27 }
 0x92f   : > { %s3012_s27 = smov %s2710_s21  ;;  %s3013_s28 = smov %s2567_s29 }
 0x930   : > { %s3014_s29 = smov %s3016_s16  ;;  %25 = sbr.rel (!%p23_p5) target bundleno = 9 (0x9), region = 141 }
 0x937   :  { %2047 = vsyncpa [#allocation6], 1 }
 0x938   :  { %2049 = vsyncpa [#allocation6 + $0x1], 1 }

// kernel: tpu_custom_call.1
= control target key start
LH: loop header
LB: loop body
LE: loop exit
PB: predicated region body
PF: predicated region fallthrough
CT: control target
= control target key end

     0   :  { %s2986_s0 = inlined_call_operand.vmem [shape: f32[2,8,32], index: 0, kind: input, shape index: {}]   ;;  %s2987_s1 = inlined_call_operand.vmem [shape: f32[1,32], index: 1, kind: input, shape index: {}]   ;;  %s2988_s2 = inlined_call_operand.vmem [shape: f32[1,32], index: 2, kind: input, shape index: {}]   ;;  %s2989_s3 = inlined_call_operand.vmem [shape: bf16[32,96], index: 3, kind: input, shape index: {}]   ;;  %s2990_s4 = inlined_call_operand.vmem [shape: f32[1,96], index: 4, kind: input, shape index: {}]   ;;  %s2991_s5 = inlined_call_operand.vmem [shape: bf16[4,8,32], index: 5, kind: input, shape index: {}]   ;;  %s2992_s6 = inlined_call_operand.vmem [shape: f32[1,32], index: 6, kind: input, shape index: {}]   ;;  %s2993_s7 = inlined_call_operand.vmem [shape: f32[1,32], index: 7, kind: input, shape index: {}]   ;;  %s2994_s8 = inlined_call_operand.vmem [shape: f32[1,32], index: 8, kind: input, shape index: {}]   ;;  %s2995_s9 = inlined_call_operand.vmem [shape: bf16[32,128], index: 9, kind: input, shape index: {}]   ;;  %s2996_s10 = inlined_call_operand.vmem [shape: f32[1,128], index: 10, kind: input, shape index: {}]   ;;  %s2997_s11 = inlined_call_operand.vmem [shape: bf16[128,32], index: 11, kind: input, shape index: {}]   ;;  %s2998_s12 = inlined_call_operand.vmem [shape: f32[1,32], index: 12, kind: input, shape index: {}]   ;;  %s2999_s13 = inlined_call_operand.hbm [shape: f32[2,8,32], index: 13, kind: output, shape index: {}]  }
   0x1   :  { %3000 = sst [smem:[#allocation8_spill]] %s2986_s0 }
   0x2   :  { %3001 = sst [smem:[#allocation9_spill]] %s2987_s1 }
   0x3   :  { %3002 = sst [smem:[#allocation10_spill]] %s2988_s2 }
   0x4   :  { %3003 = sst [smem:[#allocation11_spill]] %s2989_s3 }
   0x5   :  { %18 = vsyncpa [#allocation6], 0 }
   0x6   :  { %20 = vsyncpa [#allocation6 + $0x1], 0  ;;  %s2657_s25 = smov 0   ;;  %s2659_s26 = smov 0  }
   0x7   :  { %s2661_s27 = smov 0   ;;  %s2663_s28 = smov 0  }
   0x8   :  { %s2665_s29 = smov 0   ;;  %s2667_s30 = smov 0  }
   0x9 LB: > { %s2167_s14 = sadd.s32 4294967295, %s2571_s30   ;;  %s2168_s15 = sadd.s32 4294967294, %s2571_s30   ;;  %s2571_s30 = sphi %s2667_s30, %s26_s30   ;;  %s2567_s29 = sphi %s2665_s29, %s3014_s29   ;;  %s2563_s28 = sphi %s2663_s28, %s3013_s28   ;;  %s2559_s27 = sphi %s2661_s27, %s3012_s27   ;;  %s2555_s26 = sphi %s2659_s26, %s3011_s26   ;;  %s2551_s25 = sphi %s2657_s25, %s3010_s25  }
   0xa   : > { %s38_s16 = sadd.s32 1, %s2567_s29  ;;  %s327_s17 = sadd.s32 1, %s2559_s27 }
   0xb   : > { %p40_p0 = scmp.ge.s32.totalorder %s38_s16, 2  ;;  %p337_p1 = scmp.ne.s32.totalorder %s2559_s27, %s2555_s26 }
   0xc   : > { %p338_p2 = scmp.eq.s32.totalorder %s2167_s14, 1  ;;  %p343_p3 = scmp.ne.s32.totalorder %s2555_s26, %s2551_s25 }
   0xd   : > { %s3016_s16 = smov (%p40_p0, %s38_s16), 0  ;;  %p344_p5 = scmp.eq.s32.totalorder %s2168_s15, 1 }
   0xe   : > { %p2697_p4 = por %p338_p2, %p337_p1  ;;  %s322_s19 = ssub.s32 %s2567_s29, %s3016_s16 }
   0xf   : > { %p2171_p6 = scmp.ge.s32.totalorder %s2571_s30, 1  ;;  %p325_p7 = scmp.eq.s32.totalorder %s322_s19, 0 }
  0x10   : > { %p2704_p8 = por %p344_p5, %p343_p3  ;;  %p408_p9 = scmp.lt.s32.totalorder %s2571_s30, 3 }
  0x11   : > { %s2710_s21 = scalar_select %p325_p7, %s2559_s27, %s327_s17  }
  0x12   : > { %p409_p10 = pnand %p2171_p6, %p408_p9 }
  0x13   : > { %p454_p11 = scmp.lt.s32.totalorder (!%p409_p10), %s2563_s28, 1  ;;  %vm466_vm0 = vcmask (!%p409_p10), 261120   ;;  %s3006_s0 = sld [smem:[#allocation8_spill]] (!%p409_p10)  ;;  %v2573_v8 = vmov (!%p409_p10), 0.0   ;;  %vm2574_vm1 = vmmov (!%p409_p10), 0   ;;  %vm565_vm2 = vcmask (!%p409_p10), 60416  }
  0x14   : > { %412 = sbr.rel (%p409_p10) target bundleno = 2344 (0x928), region = 72  ;;  %s3007_s3 = sld [smem:[#allocation11_spill]] (!%p409_p10)  ;;  %2275 = vmatprep.subr.bf16.mxu1 (!%p409_p10), %v2573_v8  ;;  %2279 = vmatprep.mubr.msk.bf16.mxu1 (!%p409_p10), %vm2574_vm1, %v2573_v8  ;;  %v2176_v20 = vld [vmem:[%s2990_s4] ss:$0 sm:$0xff] (!%p409_p10)  ;;  %vm1133_vm3 = vcmask (!%p409_p10), 64512   ;;  %vm1395_vm4 = vcmask (!%p409_p10), 1043456   ;;  %v1120_v51 = vlaneseq (!%p409_p10) }
  0x15   : > { %2301 = vmatprep.subr.bf16.mxu0 (!%p409_p10), %v2573_v8  ;;  %2303 = vmatprep.mubr.msk.bf16.mxu0 (!%p409_p10), %vm2574_vm1, %v2573_v8  ;;  %s3008_s1 = sld [smem:[#allocation9_spill]] (!%p409_p10)  ;;  %s3009_s2 = sld [smem:[#allocation10_spill]] (!%p409_p10) }
  0x16   : > { %s2576_s24 = smov (!%p409_p10), 120   ;;  %s2577_s14 = smov (!%p409_p10), 88   ;;  %v1121_v52 = vshrl.u32 (!%p409_p10), %v1120_v51, 7  ;;  %v1123_v53 = vand.u32 (!%p409_p10), 127, %v1120_v51  ;;  %v2207_v51 = vld [vmem:[%s2991_s5 + $0x4] sm:$0xf] (!%p409_p10) }
  0x17   : > { %s2579_s17 = smov (!%p409_p10), 72   ;;  %s2580_s19 = smov (!%p409_p10), 112  }
  0x18   : > { %vm1124_vm5 = vcmp.le.s32.totalorder (!%p409_p10), %v1123_v53, %v1121_v52  ;;  %v1600_v52 = vsel (!%p409_p10), %vm1395_vm4, %v2207_v51, 0 }
  0x1a   : > { %v2451_v7 = vld [vmem:[%s3007_s3] sm:$0xff] (!%p409_p10)   ;;  %v2452_v9 = vld [vmem:[%s3007_s3 + $0x8] sm:$0xff] (!%p409_p10)  }
  0x1b   : > { %s455_s22 = scalar_select %p454_p11, %s2563_s28, 1  ;;  %2276 = vmatpush3.bf16.msra.mxu1 %v2451_v7  ;;  %v2174_v14 = vld [vmem:[%s3008_s1] ss:$0 sm:$0xff] }
  0x1c   : > { %2277 = vmatprep.subr.bf16.mxu1 %v2573_v8  ;;  %v2175_v16 = vld [vmem:[%s3009_s2] ss:$0 sm:$0xff] }
  0x1d   : > { %s2173_s23 = sshll.u32 %s455_s22, 3  ;;  %s2581_s22 = smov 104  }
  0x1e   : > { %s460_s15 = scalar_lea.vmem %s3006_s0, %s2173_s23  ;;  %s2575_s23 = smov 96  }
  0x1f   : > { %v2717_v0 = vld [vmem:[%s460_s15] sm:$0xff]  ;;  %2278 = vmatpush3.bf16.msra.mxu1 %v2452_v9  ;;  %s2578_s15 = smov 80   ;;  %s2582_s0 = smov 64  }
  0x20   : > { %v467_v1 = vsel %vm466_vm0, %v2717_v0, 0.0  ;;  %2283 = vmatprep.subr.bf16.mxu1 %v2573_v8 }
  0x21   : > { %468 = vadd.xlane.f32.xlu0 %v467_v1 }
  0xae   : > { %v469_v2 = vpop.xlane.xlu0 %468 }
  0xaf   : > { %v471_v3 = vmul.f32 0.03125, %v469_v2 }
  0xb1   : > { %v472_v4 = vsub.f32 %v2717_v0, %v471_v3 }
  0xb3   : > { %v473_v5 = vmul.f32 %v472_v4, %v472_v4 }
  0xb5   : > { %v474_v6 = vsel %vm466_vm0, %v473_v5, 0.0 }
  0xb6   : > { %475 = vadd.xlane.f32.xlu0 %v474_v6 }
 0x143   : > { %v476_v10 = vpop.xlane.xlu0 %475 }
 0x144   : > { %v477_v11 = vmul.f32 0.03125, %v476_v10 }
 0x146   : > { %v478_v12 = vadd.f32 1e-05, %v477_v11 }
 0x148   : > { %2463 = vrsqrt.f32 %v478_v12 }
 0x152   : > { %v2464_v13 = vpop.eup %2463 }
 0x153   : > { %v480_v15 = vmul.f32 %v2464_v13, %v472_v4 }
 0x155   : > { %v487_v17 = vmul.f32 %v2174_v14, %v480_v15 }
 0x157   : > { %v494_v18 = vadd.f32 %v2175_v16, %v487_v17 }
 0x159   : > { %v495_v19 = vpack.c.bf16 %v494_v18, %v494_v18 }
 0x15b   : > { %2280 = vmatmul.mubr.msk.bf16.vlgmr.msra.gmra.mrb[0].mxu1 %vm466_vm0, %v495_v19 }
 0x15c   : > { %2285 = vmatprep.mubr.msk.bf16.mxu1 %vm2574_vm1, %v2573_v8 }
 0x22e   : > { %v556_v21 = vpop.f32.mrb[0].mxu1 }
 0x22f   : > { %v557_v22 = vadd.f32 %v2176_v20, %v556_v21  ;;  %v2281_v23 = vpop.f32.mrb[1].mxu1 }
 0x230   : > { %v559_v24 = vpop.f32.mrb[2].mxu1 }
 0x231   : > { %v562_v25 = vmul.f32 0.35355338, %v557_v22  ;;  %v2749_v26 = vpack.c.bf16 %v557_v22, %v557_v22  ;;  %v2282_v27 = vpop.f32.mrb[3].mxu1 }
 0x233   : > { %v563_v28 = vpack.c.bf16 %v562_v25, %v562_v25  ;;  %570 = vrot.lane.b32.xlu1 %v2749_v26, %s2575_s23  ;;  %s2584_s23 = smov 56  }
 0x235   : > { %566 = vst.msk [vmem:[#allocation2] sm:$0xf] %vm565_vm2, %v563_v28  ;;  %587 = vrot.lane.b32.xlu0 %v563_v28, %s2576_s24  ;;  %s2585_s24 = smov 40  }
 0x237   : > { %592 = vrot.lane.b32.xlu1 %v2749_v26, %s2577_s14  ;;  %s2231_s14 = sshll.u32 %s2563_s28, 7 }
 0x238   : > { %s2938_s2 = scalar_lea.hbm %s2999_s13, %s2231_s14 }
 0x23b   : > { %610 = vrot.lane.b32.xlu1 %v2749_v26, %s2578_s15 }
 0x23c   : > { %v641_v38 = vld [vmem:[#allocation2] sm:$0xf] }
 0x23f   : > { %628 = vrot.lane.b32.xlu1 %v2749_v26, %s2579_s17 }
 0x243   : > { %605 = vrot.lane.b32.xlu1 %v563_v28, %s2580_s19 }
 0x247   : > { %623 = vrot.lane.b32.xlu1 %v563_v28, %s2581_s22  ;;  %s451_s22 = sand.u32 1, %s2555_s26  }
 0x248   : > { %s2015_s28 = scalar_lea.sflag [#allocation6], %s451_s22 }
 0x24b   : > { %578 = vrot.lane.b32.xlu1 %v2749_v26, %s2582_s0  ;;  %s2583_s0 = smov 48  }
 0x2a5   : > { %v571_v29 = vpop.permute.xlu1 %570 }
 0x2a6   : > { %577 = vst.msk [vmem:[#allocation3] sm:$0xf] %vm565_vm2, %v571_v29 }
 0x2a7   : > { %v588_v30 = vpop.permute.xlu0 %587 }
 0x2a8   : > { %591 = vst.msk [vmem:[#allocation2 + $0x4] sm:$0xf] %vm565_vm2, %v588_v30 }
 0x2a9   : > { %v593_v31 = vpop.permute.xlu1 %592 }
 0x2aa   : > { %2182 = vst.msk [vmem:[#allocation3 + $0x4] sm:$0xf] %vm565_vm2, %v593_v31 }
 0x2ad   : > { %v611_v32 = vpop.permute.xlu1 %610  ;;  %v1125_v33 = vld [vmem:[#allocation3] sm:$0xf] }
 0x2ae   : > { %2184 = vst.msk [vmem:[#allocation3 + $0x8] sm:$0xf] %vm565_vm2, %v611_v32  ;;  %v1138_v34 = vsel %vm1133_vm3, %v1125_v33, 0 }
 0x2af   : > { %2284 = vmatpush3.bf16.xpose.msra.mxu1 %v1138_v34  ;;  %v642_v45 = vld [vmem:[#allocation2 + $0x4] sm:$0xf] }
 0x2b0   : > { %2289 = vmatprep.subr.bf16.mxu1 %v2573_v8 }
 0x2b1   : > { %v629_v35 = vpop.permute.xlu1 %628  ;;  %v1126_v36 = vld [vmem:[#allocation3 + $0x4] sm:$0xf] }
 0x2b2   : > { %2186 = vst.msk [vmem:[#allocation3 + $0xc] sm:$0xf] %vm565_vm2, %v629_v35  ;;  %v1184_v39 = vsel %vm1133_vm3, %v1126_v36, 0 }
 0x2b5   : > { %v606_v37 = vpop.permute.xlu1 %605  ;;  %v1127_v43 = vld [vmem:[#allocation3 + $0x8] sm:$0xf] }
 0x2b6   : > { %609 = vst.msk [vmem:[#allocation2 + $0x8] sm:$0xf] %vm565_vm2, %v606_v37  ;;  %2286 = vmatmul.mubr.msk.bf16.vlgmr.msra.gmra.mrb[4].mxu1 %vm1133_vm3, %v641_v38  ;;  %v1230_v46 = vsel %vm1133_vm3, %v1127_v43, 0 }
 0x2b7   : > { %2290 = vmatpush3.bf16.xpose.msra.mxu1 %v1184_v39  ;;  %2291 = vmatprep.mubr.msk.bf16.mxu1 %vm2574_vm1, %v2573_v8 }
 0x2b8   : > { %2295 = vmatprep.subr.bf16.mxu1 %v2573_v8 }
 0x2b9   : > { %v624_v40 = vpop.permute.xlu1 %623  ;;  %v1128_v41 = vld [vmem:[#allocation3 + $0xc] sm:$0xf] }
 0x2ba   : > { %627 = vst.msk [vmem:[#allocation2 + $0xc] sm:$0xf] %vm565_vm2, %v624_v40  ;;  %v1276_v42 = vsel %vm1133_vm3, %v1128_v41, 0 }
 0x2bb   : > { %2302 = vmatpush3.bf16.xpose.msra.mxu0 %v1276_v42 }
 0x2bc   : > { %2313 = vmatprep.subr.bf16.mxu0 %v2573_v8 }
 0x2bd   : > { %v579_v44 = vpop.permute.xlu1 %578  ;;  %v643_v48 = vld [vmem:[#allocation2 + $0x8] sm:$0xf] }
 0x2be   : > { %583 = vst.msk [vmem:[#allocation4] sm:$0xf] %vm565_vm2, %v579_v44  ;;  %2292 = vmatmul.mubr.msk.bf16.vlgmr.msra.gmra.mrb[8].mxu1 %vm1133_vm3, %v642_v45 }
 0x2bf   : > { %2296 = vmatpush3.bf16.xpose.msra.mxu1 %v1230_v46  ;;  %2297 = vmatprep.mubr.msk.bf16.mxu1 %vm2574_vm1, %v2573_v8 }
 0x2c0   : > { %2307 = vmatprep.subr.bf16.mxu1 %v2573_v8 }
 0x2c1   : > { %v644_v47 = vld [vmem:[#allocation2 + $0xc] sm:$0xf] }
 0x2c2   : > { %2304 = vmatmul.mubr.msk.bf16.vlgmr.msra.gmra.mrb[0].mxu0 %vm1133_vm3, %v644_v47 }
 0x2c3   : > { %2315 = vmatprep.mubr.msk.bf16.mxu0 %vm2574_vm1, %v2573_v8 }
 0x2c5   : > { %v1129_v49 = vld [vmem:[#allocation4] sm:$0xf] }
 0x2c6   : > { %2298 = vmatmul.mubr.msk.bf16.vlgmr.msra.gmra.mrb[12].mxu1 %vm1133_vm3, %v643_v48  ;;  %v1397_v50 = vsel %vm1395_vm4, %v1129_v49, 0  ;;  %v1593_v49 = vld [vmem:[%s2991_s5] sm:$0xf] }
 0x2c7   : > { %2308 = vmatpush3.bf16.msra.mxu1 %v1397_v50  ;;  %2309 = vmatprep.mubr.msk.bf16.mxu1 %vm2574_vm1, %v2573_v8  ;;  %v1646_v50 = vsel %vm1395_vm4, %v1593_v49, 0 }
 0x2c8   : > { %2319 = vmatprep.subr.bf16.mxu1 %v2573_v8 }
 0x389   : > { %v1174_v54 = vpop.f32.mrb[4].mxu1 }
 0x38a   : > { %v1320_v55 = vsel %vm1124_vm5, %v1174_v54, -1e+30  ;;  %v2287_v56 = vpop.f32.mrb[5].mxu1 }
 0x38b   : > { %v1177_v57 = vpop.f32.mrb[6].mxu1  ;;  %v1324_v58 = vsel %vm1133_vm3, %v1320_v55, -inf }
 0x38c   : > { %1325 = vmax.xlane.f32.xlu1 %v1324_v58  ;;  %v2288_v59 = vpop.f32.mrb[7].mxu1 }
 0x391   : > { %v1220_v60 = vpop.f32.mrb[8].mxu1 }
 0x392   : > { %v2293_v61 = vpop.f32.mrb[9].mxu1  ;;  %v1321_v6 = vsel %vm1124_vm5, %v1220_v60, -1e+30 }
 0x393   : > { %v1223_v62 = vpop.f32.mrb[10].mxu1  ;;  %v1327_v12 = vsel %vm1133_vm3, %v1321_v6, -inf }
 0x394   : > { %v2294_v63 = vpop.f32.mrb[11].mxu1 }
 0x395   : > { %v1312_v1 = vpop.f32.mrb[0].mxu0 }
 0x396   : > { %v1323_v2 = vsel %vm1124_vm5, %v1312_v1, -1e+30  ;;  %v2305_v3 = vpop.f32.mrb[1].mxu0 }
 0x397   : > { %v1315_v4 = vpop.f32.mrb[2].mxu0  ;;  %v1333_v5 = vsel %vm1133_vm3, %v1323_v2, -inf }
 0x398   : > { %v2306_v7 = vpop.f32.mrb[3].mxu0  ;;  %1334 = vmax.xlane.f32.xlu0 %v1333_v5 }
 0x399   : > { %v1266_v9 = vpop.f32.mrb[12].mxu1 }
 0x39a   : > { %v2299_v10 = vpop.f32.mrb[13].mxu1  ;;  %v1322_v14 = vsel %vm1124_vm5, %v1266_v9, -1e+30 }
 0x39b   : > { %v1269_v11 = vpop.f32.mrb[14].mxu1  ;;  %v1330_v15 = vsel %vm1133_vm3, %v1322_v14, -inf }
 0x39c   : > { %1328 = vmax.xlane.f32.xlu0 %v1327_v12  ;;  %v2300_v13 = vpop.f32.mrb[15].mxu1 }
 0x39d   : > { %617 = vrot.lane.b32.xlu1 %v2749_v26, %s2583_s0  ;;  %s2172_s0 = sshll.u32 %s451_s22, 3 }
 0x39e   : > { %s453_s15 = scalar_lea.vmem [#allocation5], %s2172_s0 }
 0x39f   : > { %s2029_s17 = sshll.u32 %s453_s15, 4  ;;  %s2940_s17 = int_to_ptr.vmem [resolvable:$true] %s2029_s17 }
 0x3a0   : > { %s2493_s0 = scalar_lea.vmem %s2940_s17, 128 }
 0x3a1   : > { %p2494_p12 = scmp.ne.s32.totalorder %s2940_s17, %s2493_s0 }
 0x3a3   : > { %p2495_p13 = pnand %p2494_p12, %p2697_p4 }
 0x3a5   : > { %p2496_p0 = pneg %p2495_p13 }
 0x3b2   : > { %599 = vrot.lane.b32.xlu0 %v2749_v26, %s2584_s23  ;;  %s2586_s23 = smov [#allocation5]  }
 0x3c1   : > { %1331 = vmax.xlane.f32.xlu1 %v1330_v15 }
 0x3d2   : > { %635 = vrot.lane.b32.xlu1 %v2749_v26, %s2585_s24  ;;  %s2497_s24 = sshll.u32 %s2586_s23, 4  ;;  %s2498_s24 = int_to_ptr.vmem [resolvable:$false] %s2497_s24 }
 0x3d3   : > { %s2499_s3 = scalar_lea.vmem %s2498_s24, 256  ;;  %p2500_p1 = scmp.lt.s32.totalorder %s2940_s17, %s2498_s24 }
 0x3d4   : > { %p2501_p2 = scmp.lt.s32.totalorder %s2499_s3, %s2493_s0 }
 0x3d6   : > { %p2502_p3 = por %p2501_p2, %p2500_p1 }
 0x3d8   : > { %p2503_p5 = pnand %p2502_p3, %p2496_p0 }
 0x419   : > { %v2798_v16 = vpop.xlane.xlu1 %1325 }
 0x41a   : > { %v1352_v17 = vsub.f32 %v1320_v55, %v2798_v16  ;;  %v1340_v53 = vsub.f32 -inf, %v2798_v16 }
 0x41c   : > { %v1356_v18 = vmul.f32 1.442695, %v1352_v17  ;;  %v1344_v54 = vmul.f32 1.442695, %v1340_v53 }
 0x41d   : > { %v618_v19 = vpop.permute.xlu1 %617 }
 0x41e   : > { %2185 = vst.msk [vmem:[#allocation4 + $0x8] sm:$0xf] %vm565_vm2, %v618_v19  ;;  %2465 = vpow2.f32 %v1356_v18 }
 0x425   : > { %v2802_v20 = vpop.xlane.xlu0 %1334  ;;  %v1131_v25 = vld [vmem:[#allocation4 + $0x8] sm:$0xf] }
 0x426   : > { %v1489_v28 = vsel %vm1395_vm4, %v1131_v25, 0  ;;  %v1355_v35 = vsub.f32 %v1323_v2, %v2802_v20  ;;  %v1343_v13 = vsub.f32 -inf, %v2802_v20 }
 0x428   : > { %v2466_v21 = vpop.eup %2465  ;;  %v1362_v36 = vmul.f32 1.442695, %v1355_v35 }
 0x429   : > { %v2804_v22 = vpop.xlane.xlu0 %1328  ;;  %v1368_v24 = vsel %vm1133_vm3, %v2466_v21, 0.0  ;;  %v1388_v26 = vpack.c.bf16 %v2466_v21, %v2466_v21  ;;  %v2210_v21 = vld [vmem:[%s2991_s5 + $0x8] sm:$0xf] }
 0x42a   : > { %v1353_v23 = vsub.f32 %v1321_v6, %v2804_v22  ;;  %1369 = vadd.xlane.f32.xlu1 %v1368_v24  ;;  %v1341_v55 = vsub.f32 -inf, %v2804_v22  ;;  %v2212_v6 = vld [vmem:[%s2991_s5 + $0xc] sm:$0xf]  ;;  %v1350_v24 = vmul.f32 1.442695, %v1343_v13 }
 0x42b   : > { %2310 = vmatmul.mubr.msk.bf16.vlgmr.msra.gmra.mrb[16].mxu1 %vm1133_vm3, %v1388_v26  ;;  %v1743_v12 = vsel %vm1395_vm4, %v2212_v6, 0  ;;  %v1694_v26 = vsel %vm1395_vm4, %v2210_v21, 0 }
 0x42c   : > { %v1358_v27 = vmul.f32 1.442695, %v1353_v23  ;;  %2320 = vmatpush3.bf16.msra.mxu1 %v1489_v28  ;;  %2321 = vmatprep.mubr.msk.bf16.mxu1 %vm2574_vm1, %v2573_v8  ;;  %v1346_v57 = vmul.f32 1.442695, %v1341_v55 }
 0x42d   : > { %v600_v29 = vpop.permute.xlu0 %599  ;;  %2331 = vmatprep.subr.bf16.mxu1 %v2573_v8 }
 0x42e   : > { %2183 = vst.msk [vmem:[#allocation4 + $0x4] sm:$0xf] %vm565_vm2, %v600_v29  ;;  %2467 = vpow2.f32 %v1358_v27 }
 0x42f   : > { %2469 = vpow2.f32 %v1362_v36 }
 0x435   : > { %v1130_v30 = vld [vmem:[#allocation4 + $0x4] sm:$0xf] }
 0x436   : > { %v1443_v31 = vsel %vm1395_vm4, %v1130_v30, 0 }
 0x437   : > { %2314 = vmatpush3.bf16.msra.mxu0 %v1443_v31 }
 0x438   : > { %2325 = vmatprep.subr.bf16.mxu0 %v2573_v8  ;;  %v2468_v32 = vpop.eup %2467 }
 0x439   : > { %v1371_v33 = vsel %vm1133_vm3, %v2468_v32, 0.0  ;;  %v1389_v34 = vpack.c.bf16 %v2468_v32, %v2468_v32  ;;  %v2470_v41 = vpop.eup %2469 }
 0x43a   : > { %1372 = vadd.xlane.f32.xlu0 %v1371_v33  ;;  %v1391_v44 = vpack.c.bf16 %v2470_v41, %v2470_v41  ;;  %v1377_v48 = vsel %vm1133_vm3, %v2470_v41, 0.0 }
 0x43b   : > { %2316 = vmatmul.mubr.msk.bf16.vlgmr.msra.gmra.mrb[4].mxu0 %vm1133_vm3, %v1389_v34 }
 0x43c   : > { %2327 = vmatprep.mubr.msk.bf16.mxu0 %vm2574_vm1, %v2573_v8 }
 0x44e   : > { %v2821_v37 = vpop.xlane.xlu1 %1331 }
 0x44f   : > { %v1354_v38 = vsub.f32 %v1322_v14, %v2821_v37  ;;  %v1342_v18 = vsub.f32 -inf, %v2821_v37 }
 0x451   : > { %v1360_v39 = vmul.f32 1.442695, %v1354_v38  ;;  %v1348_v27 = vmul.f32 1.442695, %v1342_v18  ;;  %v2455_v18 = vld [vmem:[%s2997_s11] sm:$0xff]  }
 0x452   : > { %v636_v40 = vpop.permute.xlu1 %635 }
 0x453   : > { %2187 = vst.msk [vmem:[#allocation4 + $0xc] sm:$0xf] %vm565_vm2, %v636_v40  ;;  %2471 = vpow2.f32 %v1360_v39 }
 0x454   : > { %2473 = vpow2.f32 %v1344_v54 }
 0x455   : > { %2475 = vpow2.f32 %v1346_v57 }
 0x45a   : > { %v1132_v42 = vld [vmem:[#allocation4 + $0xc] sm:$0xf] }
 0x45b   : > { %v1535_v43 = vsel %vm1395_vm4, %v1132_v42, 0 }
 0x45c   : > { %2326 = vmatpush3.bf16.msra.mxu0 %v1535_v43 }
 0x45d   : > { %2337 = vmatprep.subr.bf16.mxu0 %v2573_v8  ;;  %v2472_v45 = vpop.eup %2471 }
 0x45e   : > { %v1374_v46 = vsel %vm1133_vm3, %v2472_v45, 0.0  ;;  %v1390_v47 = vpack.c.bf16 %v2472_v45, %v2472_v45  ;;  %v2474_v56 = vpop.eup %2473 }
 0x45f   : > { %2328 = vmatmul.mubr.msk.bf16.vlgmr.msra.gmra.mrb[8].mxu0 %vm1133_vm3, %v1391_v44  ;;  %1375 = vadd.xlane.f32.xlu0 %v1374_v46  ;;  %v1364_v59 = vmul.f32 0.0, %v2474_v56  ;;  %v2476_v61 = vpop.eup %2475 }
 0x460   : > { %2339 = vmatprep.mubr.msk.bf16.mxu0 %vm2574_vm1, %v2573_v8  ;;  %2322 = vmatmul.mubr.msk.bf16.vlgmr.msra.gmra.mrb[20].mxu1 %vm1133_vm3, %v1390_v47  ;;  %v1365_v1 = vmul.f32 0.0, %v2476_v61 }
 0x461   : > { %2333 = vmatprep.mubr.msk.bf16.mxu1 %vm2574_vm1, %v2573_v8  ;;  %2338 = vmatpush3.bf16.msra.mxu0 %v1646_v50 }
 0x462   : > { %2349 = vmatprep.subr.bf16.mxu0 %v2573_v8  ;;  %2332 = vmatpush3.bf16.msra.mxu1 %v1600_v52 }
 0x463   : > { %1378 = vadd.xlane.f32.xlu0 %v1377_v48  ;;  %2343 = vmatprep.subr.bf16.mxu1 %v2573_v8 }
 0x4b7   : > { %v1370_v58 = vpop.xlane.xlu1 %1369 }
 0x4b8   : > { %v1380_v60 = vadd.f32 %v1370_v58, %v1364_v59 }
 0x4ba   : > { %2477 = vrcp.f32 %v1380_v60 }
 0x4c4   : > { %v2478_v4 = vpop.eup %2477 }
 0x4c7   : > { %v1373_v62 = vpop.xlane.xlu0 %1372 }
 0x4c8   : > { %v1381_v7 = vadd.f32 %v1373_v62, %v1365_v1 }
 0x4ca   : > { %2479 = vrcp.f32 %v1381_v7 }
 0x4cb   : > { %2481 = vpow2.f32 %v1350_v24  ;;  %v2215_v24 = vld [vmem:[%s2993_s7] ss:$0 sm:$0xff] }
 0x4cc   : > { %2483 = vpow2.f32 %v1348_v27 }
 0x4d4   : > { %v2480_v17 = vpop.eup %2479 }
 0x4d5   : > { %v2482_v28 = vpop.eup %2481 }
 0x4d6   : > { %v2484_v29 = vpop.eup %2483  ;;  %v1367_v31 = vmul.f32 0.0, %v2482_v28 }
 0x4d7   : > { %v1366_v32 = vmul.f32 0.0, %v2484_v29  ;;  %v2456_v29 = vld [vmem:[%s2997_s11 + $0x8] sm:$0xff]  }
 0x4ec   : > { %v1376_v20 = vpop.xlane.xlu0 %1375 }
 0x4ed   : > { %v1382_v34 = vadd.f32 %v1376_v20, %v1366_v32 }
 0x4f0   : > { %v1379_v30 = vpop.xlane.xlu0 %1378 }
 0x4f1   : > { %v1383_v33 = vadd.f32 %v1379_v30, %v1367_v31  ;;  %v2457_v30 = vld [vmem:[%s2997_s11 + $0x10] sm:$0xff]  }
 0x4f3   : > { %2485 = vrcp.f32 %v1383_v33  ;;  %v2460_v33 = vld [vmem:[%s2997_s11 + $0x28] sm:$0xff]  }
 0x4f4   : > { %2487 = vrcp.f32 %v1382_v34  ;;  %v2461_v34 = vld [vmem:[%s2997_s11 + $0x30] sm:$0xff]  }
 0x4fd   : > { %v2486_v38 = vpop.eup %2485 }
 0x4fe   : > { %v1433_v63 = vpop.f32.mrb[16].mxu1  ;;  %v2488_v45 = vpop.eup %2487 }
 0x4ff   : > { %v1577_v2 = vadd.f32 %v1433_v63, %v1364_v59  ;;  %v2311_v3 = vpop.f32.mrb[17].mxu1 }
 0x500   : > { %v1436_v5 = vpop.f32.mrb[18].mxu1 }
 0x501   : > { %v1585_v9 = vmul.f32 %v2478_v4, %v1577_v2  ;;  %v2312_v10 = vpop.f32.mrb[19].mxu1  ;;  %v2214_v4 = vld [vmem:[%s2992_s6] ss:$0 sm:$0xff] }
 0x503   : > { %v1589_v11 = vpack.c.bf16 %v1585_v9, %v1585_v9 }
 0x505   : > { %2340 = vmatmul.mubr.msk.bf16.vlgmr.msra.gmra.mrb[12].mxu0 %vm1133_vm3, %v1589_v11 }
 0x506   : > { %2350 = vmatpush3.bf16.msra.mxu0 %v1743_v12  ;;  %2351 = vmatprep.mubr.msk.bf16.mxu0 %vm2574_vm1, %v2573_v8 }
 0x507   : > { %2363 = vmatprep.subr.bf16.mxu0 %v2573_v8 }
 0x50e   : > { %v1479_v14 = vpop.f32.mrb[4].mxu0 }
 0x50f   : > { %v1578_v15 = vadd.f32 %v1479_v14, %v1365_v1  ;;  %v2317_v16 = vpop.f32.mrb[5].mxu0 }
 0x510   : > { %v1482_v19 = vpop.f32.mrb[6].mxu0 }
 0x511   : > { %v1586_v22 = vmul.f32 %v2480_v17, %v1578_v15  ;;  %v2318_v23 = vpop.f32.mrb[7].mxu0  ;;  %v2453_v17 = vld [vmem:[%s2995_s9] sm:$0xff]  }
 0x513   : > { %v1590_v25 = vpack.c.bf16 %v1586_v22, %v1586_v22 }
 0x515   : > { %2334 = vmatmul.mubr.msk.bf16.vlgmr.msra.gmra.mrb[24].mxu1 %vm1133_vm3, %v1590_v25 }
 0x516   : > { %2344 = vmatpush3.bf16.msra.mxu1 %v1694_v26  ;;  %2345 = vmatprep.mubr.msk.bf16.mxu1 %vm2574_vm1, %v2573_v8  ;;  %v2216_v26 = vld [vmem:[%s2994_s8] ss:$0 sm:$0xff] }
 0x517   : > { %2355 = vmatprep.subr.bf16.mxu1 %v2573_v8 }
 0x532   : > { %v1571_v35 = vpop.f32.mrb[8].mxu0 }
 0x533   : > { %v1580_v36 = vadd.f32 %v1571_v35, %v1367_v31  ;;  %v2329_v37 = vpop.f32.mrb[9].mxu0  ;;  %v1525_v39 = vpop.f32.mrb[20].mxu1  ;;  %v2458_v31 = vld [vmem:[%s2997_s11 + $0x18] sm:$0xff]  }
 0x534   : > { %v1574_v40 = vpop.f32.mrb[10].mxu0  ;;  %v1579_v42 = vadd.f32 %v1525_v39, %v1366_v32  ;;  %v2323_v43 = vpop.f32.mrb[21].mxu1  ;;  %v2459_v32 = vld [vmem:[%s2997_s11 + $0x20] sm:$0xff]   ;;  %v2462_v35 = vld [vmem:[%s2997_s11 + $0x38] sm:$0xff]  }
 0x535   : > { %v1588_v41 = vmul.f32 %v2486_v38, %v1580_v36  ;;  %v2330_v44 = vpop.f32.mrb[11].mxu0  ;;  %v1528_v46 = vpop.f32.mrb[22].mxu1  ;;  %v2217_v36 = vld [vmem:[%s2996_s10] ss:$0 sm:$0xff] }
 0x536   : > { %v1587_v48 = vmul.f32 %v2488_v45, %v1579_v42  ;;  %v2324_v49 = vpop.f32.mrb[23].mxu1 }
 0x537   : > { %v1592_v47 = vpack.c.bf16 %v1588_v41, %v1588_v41 }
 0x538   : > { %v1591_v50 = vpack.c.bf16 %v1587_v48, %v1587_v48 }
 0x539   : > { %2352 = vmatmul.mubr.msk.bf16.vlgmr.msra.gmra.mrb[16].mxu0 %vm1133_vm3, %v1592_v47 }
 0x53a   : > { %2379 = vmatprep.mubr.msk.bf16.mxu0 %vm2574_vm1, %v2573_v8  ;;  %2346 = vmatmul.mubr.msk.bf16.vlgmr.msra.gmra.mrb[28].mxu1 %vm1133_vm3, %v1591_v50 }
 0x53b   : > { %2359 = vmatprep.mubr.msk.bf16.mxu1 %vm2574_vm1, %v2573_v8  ;;  %2356 = vmatpush3.bf16.msra.mxu1 %v2453_v17 }
 0x53c   : > { %2357 = vmatprep.subr.bf16.mxu1 %v2573_v8  ;;  %2364 = vmatpush3.bf16.msra.mxu0 %v2455_v18 }
 0x53d   : > { %2365 = vmatprep.subr.bf16.mxu0 %v2573_v8 }
 0x540   : > { %2366 = vmatpush3.bf16.msra.mxu0 %v2456_v29 }
 0x541   : > { %2367 = vmatprep.subr.bf16.mxu0 %v2573_v8 }
 0x544   : > { %2368 = vmatpush3.bf16.msra.mxu0 %v2457_v30 }
 0x545   : > { %2369 = vmatprep.subr.bf16.mxu0 %v2573_v8 }
 0x548   : > { %2370 = vmatpush3.bf16.msra.mxu0 %v2458_v31 }
 0x549   : > { %2371 = vmatprep.subr.bf16.mxu0 %v2573_v8 }
 0x54c   : > { %2372 = vmatpush3.bf16.msra.mxu0 %v2459_v32 }
 0x54d   : > { %2373 = vmatprep.subr.bf16.mxu0 %v2573_v8 }
 0x550   : > { %2374 = vmatpush3.bf16.msra.mxu0 %v2460_v33 }
 0x551   : > { %2375 = vmatprep.subr.bf16.mxu0 %v2573_v8 }
 0x554   : > { %2376 = vmatpush3.bf16.msra.mxu0 %v2461_v34 }
 0x555   : > { %2377 = vmatprep.subr.bf16.mxu0 %v2573_v8 }
 0x558   : > { %2378 = vmatpush3.bf16.msra.mxu0 %v2462_v35 }
 0x5d8   : > { %v1682_v51 = vpop.f32.mrb[12].mxu0 }
 0x5d9   : > { %v2341_v52 = vpop.f32.mrb[13].mxu0 }
 0x5da   : > { %v1685_v53 = vpop.f32.mrb[14].mxu0 }
 0x5db   : > { %v2342_v54 = vpop.f32.mrb[15].mxu0 }
 0x5e8   : > { %v1636_v55 = vpop.f32.mrb[24].mxu1 }
 0x5e9   : > { %v1683_v56 = vadd.f32 %v1682_v51, %v1636_v55  ;;  %v2335_v57 = vpop.f32.mrb[25].mxu1  ;;  %v2221_v51 = vld [vmem:[%s2998_s12] ss:$0 sm:$0xff] }
 0x5ea   : > { %v1639_v58 = vpop.f32.mrb[26].mxu1 }
 0x5eb   : > { %v2336_v59 = vpop.f32.mrb[27].mxu1 }
 0x60c   : > { %v1779_v60 = vpop.f32.mrb[16].mxu0 }
 0x60d   : > { %v2353_v61 = vpop.f32.mrb[17].mxu0  ;;  %v1730_v62 = vpop.f32.mrb[28].mxu1 }
 0x60e   : > { %v1782_v63 = vpop.f32.mrb[18].mxu0  ;;  %v1736_v1 = vadd.f32 %v1730_v62, %v1683_v56  ;;  %v2347_v2 = vpop.f32.mrb[29].mxu1 }
 0x60f   : > { %v2354_v3 = vpop.f32.mrb[19].mxu0  ;;  %v1733_v5 = vpop.f32.mrb[30].mxu1 }
 0x610   : > { %v1785_v6 = vadd.f32 %v1779_v60, %v1736_v1  ;;  %v2348_v7 = vpop.f32.mrb[31].mxu1 }
 0x612   : > { %v1793_v9 = vadd.f32 %v2214_v4, %v1785_v6 }
 0x614   : > { %v2875_v10 = vadd.f32 %v1793_v9, %v2717_v0  ;;  %v2454_v0 = vld [vmem:[%s2995_s9 + $0x8] sm:$0xff]  }
 0x615   : > { %2358 = vmatpush3.bf16.msra.mxu1 %v2454_v0 }
 0x616   : > { %v1797_v11 = vsel %vm466_vm0, %v2875_v10, 0.0 }
 0x617   : > { %1798 = vadd.xlane.f32.xlu1 %v1797_v11 }
 0x6a4   : > { %v1799_v12 = vpop.xlane.xlu1 %1798 }
 0x6a5   : > { %v1800_v13 = vmul.f32 0.03125, %v1799_v12 }
 0x6a7   : > { %v1801_v14 = vsub.f32 %v2875_v10, %v1800_v13 }
 0x6a9   : > { %v1802_v15 = vmul.f32 %v1801_v14, %v1801_v14 }
 0x6ab   : > { %v1803_v16 = vsel %vm466_vm0, %v1802_v15, 0.0 }
 0x6ac   : > { %1804 = vadd.xlane.f32.xlu0 %v1803_v16 }
 0x739   : > { %v1805_v19 = vpop.xlane.xlu0 %1804 }
 0x73a   : > { %v1806_v21 = vmul.f32 0.03125, %v1805_v19 }
 0x73c   : > { %v1807_v22 = vadd.f32 1e-05, %v1806_v21 }
 0x73e   : > { %2489 = vrsqrt.f32 %v1807_v22 }
 0x748   : > { %v2490_v23 = vpop.eup %2489 }
 0x749   : > { %v1809_v25 = vmul.f32 %v2490_v23, %v1801_v14 }
 0x74b   : > { %v1816_v27 = vmul.f32 %v2215_v24, %v1809_v25 }
 0x74d   : > { %v1823_v20 = vadd.f32 %v2216_v26, %v1816_v27 }
 0x74f   : > { %v1824_v28 = vpack.c.bf16 %v1823_v20, %v1823_v20 }
 0x751   : > { %2360 = vmatmul.mubr.msk.bf16.vlgmr.msra.gmra.mrb[32].mxu1 %vm466_vm0, %v1824_v28 }
 0x824   : > { %v1885_v37 = vpop.f32.mrb[32].mxu1 }
 0x825   : > { %v1886_v38 = vadd.f32 %v2217_v36, %v1885_v37  ;;  %v2361_v39 = vpop.f32.mrb[33].mxu1 }
 0x826   : > { %v1888_v40 = vpop.f32.mrb[34].mxu1 }
 0x827   : > { %v1892_v41 = vmul.f32 0.044715, %v1886_v38  ;;  %v2362_v42 = vpop.f32.mrb[35].mxu1  ;;  %v1891_v8 = vmul.f32 0.5, %v1886_v38 }
 0x829   : > { %v1893_v43 = vmul.f32 %v1892_v41, %v1886_v38 }
 0x82b   : > { %v1894_v44 = vmul.f32 %v1893_v43, %v1886_v38 }
 0x82d   : > { %v1895_v45 = vadd.f32 %v1894_v44, %v1886_v38 }
 0x82f   : > { %v1896_v46 = vmul.f32 0.7978846, %v1895_v45 }
 0x831   : > { %2491 = vtanh.f32 %v1896_v46 }
 0x83b   : > { %v2492_v47 = vpop.eup %2491 }
 0x83c   : > { %v1898_v48 = vadd.f32 1.0, %v2492_v47 }
 0x83e   : > { %v1899_v49 = vmul.f32 %v1898_v48, %v1891_v8 }
 0x840   : > { %v1900_v50 = vpack.c.bf16 %v1899_v49, %v1899_v49 }
 0x842   : > { %2380 = vmatmul.mubr.bf16.vlgmr.msra.gmra.mrb[20].mxu0 %v1900_v50 }
 0x915   : > { %v2006_v52 = vpop.f32.mrb[20].mxu0 }
 0x916   : > { %v2007_v53 = vadd.f32 %v2221_v51, %v2006_v52  ;;  %v2381_v54 = vpop.f32.mrb[21].mxu0 }
 0x917   : > { %v2009_v55 = vpop.f32.mrb[22].mxu0 }
 0x918   : > { %v2012_v56 = vadd.f32 %v2007_v53, %v2875_v10  ;;  %v2382_v57 = vpop.f32.mrb[23].mxu0 }
 0x91a   : > { %2013 = vst.msk [vmem:[%s453_s15] sm:$0xff] %vm466_vm0, %v2012_v56 }
 0x91b   : > { %2506 = shalt.err (!%p2503_p5)
}
 0x91c   : > { %s2507_s1 = scalar_lea.hbm %s2938_s2, 128  ;;  %s2511_s15 = scalar_lea.hbm %s2999_s13, 256 }
 0x91d   : > { %p2508_p6 = scmp.ne.s32.totalorder %s2938_s2, %s2507_s1  ;;  %p2512_p10 = scmp.lt.u32.totalorder %s2938_s2, %s2999_s13 }
 0x91e   : > { %p2513_p11 = scmp.lt.u32.totalorder %s2511_s15, %s2507_s1  ;;  %p2515_p13 = scmp.lt.u32.totalorder %s2507_s1, %s2938_s2 }
 0x91f   : > { %p2509_p7 = pnand %p2508_p6, %p2697_p4 }
 0x920   : > { %p2514_p12 = por %p2513_p11, %p2512_p10 }
 0x921   : > { %p2510_p9 = pneg %p2509_p7 }
 0x922   : > { %p2516_p0 = por %p2515_p13, %p2514_p12 }
 0x924   : > { %p2517_p1 = pnand %p2516_p0, %p2510_p9 }
 0x926   : > { %2520 = shalt.err (!%p2517_p1)
}
 0x927   : > { %2383 = dma.vmem_to_hbm [thread:$0]  (%p2697_p4), %s2940_s17, 128, %s2938_s2, %s2015_s28  }
 0x928 PF: > { %p2389_p2 = scmp.ge.s32.totalorder %s2571_s30, 2  ;;  %s2041_s3 = sand.u32 1, %s2551_s25  }
 0x929   : > { %s2042_s0 = scalar_lea.sflag [#allocation6], %s2041_s3 }
 0x92a   : > { %p2386_p3 = pnand %p2389_p2, %p2704_p8 }
 0x92c   : > { %2546 = dma.done.wait (!%p2386_p3), %s2042_s0, 128  }
 0x92d   : > { %2548 = vsyncadd (!%p2386_p3), %s2042_s0, 4294967168  ;;  %s26_s30 = sadd.s32 1, %s2571_s30   ;;  %s3010_s25 = smov %s2555_s26 }
 0x92e   : > { %p23_p5 = scmp.ge.s32.totalorder %s26_s30, 4   ;;  %s3011_s26 = smov %s2559_s27 }
 0x92f   : > { %s3012_s27 = smov %s2710_s21  ;;  %s3013_s28 = smov %s2567_s29 }
 0x930   : > { %s3014_s29 = smov %s3016_s16  ;;  %25 = sbr.rel (!%p23_p5) target bundleno = 9 (0x9), region = 141 }
 0x937   :  { %2047 = vsyncpa [#allocation6], 1 }
 0x938   :  { %2049 = vsyncpa [#allocation6 + $0x1], 1 }

</bundles_post_ra>
